<compile_context>
chip_gen: v6e
topology: v6e:2x2x1
jax: 0.10.0
libtpu: 0.0.40
codegen_flags: <defaults>
</compile_context>

<pallas_src>
import functools
import math

import jax
import jax.numpy as jnp
from jax.experimental import pallas as pl
from jax.experimental.pallas import tpu as pltpu


def _resnet_block_kernel(x_ref, w1_ref, w2_ref, s1_ref, t1_ref, s2_ref, t2_ref,
                         o_ref, pad_ref, *, negative_slope, compute_dtype):
    # x_ref   : (bb, d, d, C)     unpadded input image block (native dtype)
    # w*_ref  : (9*C, C)          im2col conv weights, row = (ky*3+kx)*C + cin
    # s*/t*   : (1, C) f32        folded BN scale / shift (conv bias included)
    # o_ref   : (bb, d, d, C)     output image block
    # pad_ref : (bb, d+2, d+2, C) zero-halo VMEM scratch, reused for x and h
    bb, d, _, c = x_ref.shape
    dp = d + 2
    m = bb * d * d

    # Re-zero only the 1-px halo.  The interior is fully overwritten below and
    # the halo is never written, so this stays correct regardless of which
    # TensorCore executes which grid step (scratch persists per core).
    zrow = jnp.zeros((bb, 1, dp, c), pad_ref.dtype)
    pad_ref[:, 0:1, :, :] = zrow
    pad_ref[:, dp - 1:dp, :, :] = zrow
    zcol = jnp.zeros((bb, dp, 1, c), pad_ref.dtype)
    pad_ref[:, :, 0:1, :] = zcol
    pad_ref[:, :, dp - 1:dp, :] = zcol

    def im2col():
        # Build one (m, 9C) patch matrix -> a single MXU dot with K = 9C.
        # Hoist the 3 kx-shifted (sublane-offset) views once; the ky offsets
        # are leading-dim slices of those values and cost nothing.
        shifted = [pad_ref[:, :, kx:kx + d, :] for kx in range(3)]  # (bb,dp,d,C)
        slabs = [shifted[kx][:, ky:ky + d, :, :]                    # (bb,d,d,C)
                 for ky in range(3) for kx in range(3)]
        patches = jnp.concatenate(slabs, axis=-1)                   # (bb,d,d,9C)
        return patches.reshape(m, 9 * c).astype(compute_dtype)

    # conv1 (+bias) + BN1 (folded into s1/t1) + leaky_relu --------------------
    pad_ref[:, 1:1 + d, 1:1 + d, :] = x_ref[...].astype(pad_ref.dtype)
    h = jnp.dot(im2col(), w1_ref[...], preferred_element_type=jnp.float32)
    h = h * s1_ref[...] + t1_ref[...]
    h = jnp.where(h >= 0, h, negative_slope * h)

    # conv2 (+bias) + BN2 (folded) --------------------------------------------
    # Reuse the same padded scratch (its halo is still zero); the intermediate
    # activation never leaves VMEM.
    pad_ref[:, 1:1 + d, 1:1 + d, :] = h.reshape(bb, d, d, c).astype(pad_ref.dtype)
    y = jnp.dot(im2col(), w2_ref[...], preferred_element_type=jnp.float32)
    y = y * s2_ref[...] + t2_ref[...]

    # residual -----------------------------------------------------------------
    res = x_ref[...].reshape(m, c).astype(jnp.float32)
    o_ref[...] = (y + res).reshape(bb, d, d, c).astype(o_ref.dtype)


def _fold_conv_bn(conv_bias, gamma, beta, mean, var, eps):
    # BN(conv(x) + b) = conv(x) * scale + shift   (inference-mode BN)
    scale = (gamma / jnp.sqrt(var + eps)).astype(jnp.float32)
    shift = ((conv_bias - mean) * scale + beta).astype(jnp.float32)
    return scale.reshape(1, -1), shift.reshape(1, -1)


def _pick_block_batch(b, max_bb=8):
    # Largest divisor of b that is <= max_bb, preferring one that still leaves
    # >= 2 grid steps so both v7x TensorCores get work ("parallel" batch axis).
    divisors = [i for i in range(1, min(b, max_bb) + 1) if b % i == 0]
    two_step = [i for i in divisors if b // i >= 2]
    return max(two_step) if two_step else max(divisors)


def resnet_block_forward(x, time, params, *, eps=1e-5, negative_slope=0.01,
                         compute_dtype=jnp.bfloat16, max_block_batch=8):
    """Mirrors ResNetBlock.forward (inference-mode BatchNorm). `time` unused.

    x      : (B, S, C) with S = D*D
    params : dict with
      w1, w2           : (3, 3, C, C) HWIO conv weights
                         (torch weight (Cout,Cin,3,3) -> .permute(2,3,1,0))
      b1, b2           : (C,) conv biases
      g*, be*, m*, v*  : BN gamma / beta / running_mean / running_var, (C,)
    """
    del time  # accepted for signature parity; not used by the torch forward
    b, s, c = x.shape
    d = math.isqrt(s)
    assert d * d == s, "sequence length must be a perfect square"
    dp = d + 2
    bb = _pick_block_batch(b, max_block_batch)

    scale1, shift1 = _fold_conv_bn(params["b1"], params["g1"], params["be1"],
                                   params["m1"], params["v1"], eps)
    scale2, shift2 = _fold_conv_bn(params["b2"], params["g2"], params["be2"],
                                   params["m2"], params["v2"], eps)

    # HWIO (3,3,Cin,Cout) -> im2col (9*Cin, Cout), row index (ky*3+kx)*Cin+cin,
    # already in the MXU compute dtype (single bf16 pass, f32 accumulation).
    w1 = params["w1"].reshape(9 * c, c).astype(compute_dtype)
    w2 = params["w2"].reshape(9 * c, c).astype(compute_dtype)

    x_img = x.reshape(b, d, d, c)   # metadata reshape only; no HBM pad copy

    kernel = functools.partial(_resnet_block_kernel,
                               negative_slope=negative_slope,
                               compute_dtype=compute_dtype)

    out = pl.pallas_call(
        kernel,
        out_shape=jax.ShapeDtypeStruct((b, d, d, c), x.dtype),
        grid_spec=pltpu.PrefetchScalarGridSpec(
            num_scalar_prefetch=0,
            grid=(b // bb,),
            in_specs=[
                pl.BlockSpec((bb, d, d, c), lambda i: (i, 0, 0, 0)),
                pl.BlockSpec((9 * c, c), lambda i: (0, 0)),
                pl.BlockSpec((9 * c, c), lambda i: (0, 0)),
                pl.BlockSpec((1, c), lambda i: (0, 0)),
                pl.BlockSpec((1, c), lambda i: (0, 0)),
                pl.BlockSpec((1, c), lambda i: (0, 0)),
                pl.BlockSpec((1, c), lambda i: (0, 0)),
            ],
            out_specs=pl.BlockSpec((bb, d, d, c), lambda i: (i, 0, 0, 0)),
            scratch_shapes=[pltpu.VMEM((bb, dp, dp, c), x.dtype)],
        ),
        compiler_params=pltpu.CompilerParams(
            dimension_semantics=("parallel",),
            vmem_limit_bytes=64 * 1024 * 1024),
    )(x_img, w1, w2, scale1, shift1, scale2, shift2)

    return out.reshape(b, s, c)


def _reference_forward(x, params, *, eps=1e-5, negative_slope=0.01,
                       compute_dtype=jnp.bfloat16):
    """Pure-JAX reference (lax.conv, same bf16-operand / f32-accum setup)."""
    b, s, c = x.shape
    d = math.isqrt(s)
    xi = x.reshape(b, d, d, c)
    dn = jax.lax.conv_dimension_numbers(xi.shape, params["w1"].shape,
                                        ("NHWC", "HWIO", "NHWC"))

    def conv(inp, w, bias):
        y = jax.lax.conv_general_dilated(
            inp.astype(compute_dtype), w.astype(compute_dtype),
            window_strides=(1, 1), padding="SAME", dimension_numbers=dn,
            preferred_element_type=jnp.float32)
        return y + bias

    def bn(y, g, be, m, v):
        return (y - m) * (g / jnp.sqrt(v + eps)) + be

    y = conv(xi, params["w1"], params["b1"])
    y = bn(y, params["g1"], params["be1"], params["m1"], params["v1"])
    y = jnp.where(y >= 0, y, negative_slope * y)
    y = conv(y, params["w2"], params["b2"])
    y = bn(y, params["g2"], params["be2"], params["m2"], params["v2"])
    return y.reshape(b, s, c) + x


if __name__ == "__main__":
    # Small shapes consistent with the module: B=2, S=16*16=256, hidden C=32.
    B, D, C = 2, 16, 32
    S = D * D

    key = jax.random.PRNGKey(0)
    ks = jax.random.split(key, 13)
    bound = 1.0 / math.sqrt(9 * C)

    params = {
        "w1": jax.random.uniform(ks[0], (3, 3, C, C), jnp.float32, -bound, bound),
        "b1": jax.random.uniform(ks[1], (C,), jnp.float32, -bound, bound),
        "g1": 1.0 + 0.1 * jax.random.normal(ks[2], (C,), jnp.float32),
        "be1": 0.1 * jax.random.normal(ks[3], (C,), jnp.float32),
        "m1": 0.1 * jax.random.normal(ks[4], (C,), jnp.float32),
        "v1": jax.random.uniform(ks[5], (C,), jnp.float32, 0.5, 1.5),
        "w2": jax.random.uniform(ks[6], (3, 3, C, C), jnp.float32, -bound, bound),
        "b2": jax.random.uniform(ks[7], (C,), jnp.float32, -bound, bound),
        "g2": 1.0 + 0.1 * jax.random.normal(ks[8], (C,), jnp.float32),
        "be2": 0.1 * jax.random.normal(ks[9], (C,), jnp.float32),
        "m2": 0.1 * jax.random.normal(ks[10], (C,), jnp.float32),
        "v2": jax.random.uniform(ks[11], (C,), jnp.float32, 0.5, 1.5),
    }
    x = jax.random.normal(ks[12], (B, S, C), dtype=jnp.float32)
    t = jnp.zeros((B,), jnp.float32)  # `time` is unused by the forward

    out = resnet_block_forward(x, t, params)
    out = jax.block_until_ready(out)

    ref = _reference_forward(x, params)
    assert out.shape == (B, S, C), out.shape
    err = float(jnp.max(jnp.abs(out - ref)))
    assert jnp.allclose(out, ref, atol=1e-2, rtol=1e-2), err

    print("KERNEL_OK")
</pallas_src>

<mosaic_0001>
module attributes {stable_mosaic.version = 11 : i64} {
  func.func @_resnet_block_kernel(%arg0: i32, %arg1: memref<1x16x16x32xf32, #tpu.memory_space<vmem>>, %arg2: memref<288x32xbf16, #tpu.memory_space<vmem>>, %arg3: memref<288x32xbf16, #tpu.memory_space<vmem>>, %arg4: memref<1x32xf32, #tpu.memory_space<vmem>>, %arg5: memref<1x32xf32, #tpu.memory_space<vmem>>, %arg6: memref<1x32xf32, #tpu.memory_space<vmem>>, %arg7: memref<1x32xf32, #tpu.memory_space<vmem>>, %arg8: memref<1x16x16x32xf32, #tpu.memory_space<vmem>>, %arg9: memref<1x18x18x32xf32, #tpu.memory_space<vmem>>) attributes {dimension_semantics = [#tpu.dimension_semantics<parallel>], iteration_bounds = array<i64: 2>, scalar_prefetch = 0 : i64, scratch_operands = 1 : i64, tpu.core_type = #tpu.core_type<tc>, window_params = [{transform_indices = @transform_0, window_bounds = array<i64: 1, 16, 16, 32>}, {pipeline_mode = #tpu.pipeline_mode<synchronous>, transform_indices = @transform_1, window_bounds = array<i64: 288, 32>}, {pipeline_mode = #tpu.pipeline_mode<synchronous>, transform_indices = @transform_2, window_bounds = array<i64: 288, 32>}, {pipeline_mode = #tpu.pipeline_mode<synchronous>, transform_indices = @transform_3, window_bounds = array<i64: 1, 32>}, {pipeline_mode = #tpu.pipeline_mode<synchronous>, transform_indices = @transform_4, window_bounds = array<i64: 1, 32>}, {pipeline_mode = #tpu.pipeline_mode<synchronous>, transform_indices = @transform_5, window_bounds = array<i64: 1, 32>}, {pipeline_mode = #tpu.pipeline_mode<synchronous>, transform_indices = @transform_6, window_bounds = array<i64: 1, 32>}, {transform_indices = @transform_7, window_bounds = array<i64: 1, 16, 16, 32>}]} {
    %cst = arith.constant 0.000000e+00 : f32
    %0 = vector.broadcast %cst : f32 to vector<1x1x18x32xf32>
    %c0 = arith.constant 0 : index
    %c0_0 = arith.constant 0 : index
    %c0_1 = arith.constant 0 : index
    %c0_2 = arith.constant 0 : index
    %1 = vector.load %arg9[%c0, %c0_0, %c0_1, %c0_2] : memref<1x18x18x32xf32, #tpu.memory_space<vmem>>, vector<1x1x18x32xf32>
    tpu.vector_store %arg9[%c0, %c0_0, %c0_1, %c0_2], %0 {strides = array<i32>} : memref<1x18x18x32xf32, #tpu.memory_space<vmem>>, vector<1x1x18x32xf32>,
    %c0_3 = arith.constant 0 : index
    %c17 = arith.constant 17 : index
    %c0_4 = arith.constant 0 : index
    %c0_5 = arith.constant 0 : index
    %2 = vector.load %arg9[%c0_3, %c17, %c0_4, %c0_5] : memref<1x18x18x32xf32, #tpu.memory_space<vmem>>, vector<1x1x18x32xf32>
    tpu.vector_store %arg9[%c0_3, %c17, %c0_4, %c0_5], %0 {strides = array<i32>} : memref<1x18x18x32xf32, #tpu.memory_space<vmem>>, vector<1x1x18x32xf32>,
    %cst_6 = arith.constant 0.000000e+00 : f32
    %3 = vector.broadcast %cst_6 : f32 to vector<1x18x1x32xf32>
    %c0_7 = arith.constant 0 : index
    %c0_8 = arith.constant 0 : index
    %c0_9 = arith.constant 0 : index
    %c0_10 = arith.constant 0 : index
    %4 = vector.load %arg9[%c0_7, %c0_8, %c0_9, %c0_10] : memref<1x18x18x32xf32, #tpu.memory_space<vmem>>, vector<1x18x1x32xf32>
    tpu.vector_store %arg9[%c0_7, %c0_8, %c0_9, %c0_10], %3 {strides = array<i32>} : memref<1x18x18x32xf32, #tpu.memory_space<vmem>>, vector<1x18x1x32xf32>,
    %c0_11 = arith.constant 0 : index
    %c0_12 = arith.constant 0 : index
    %c17_13 = arith.constant 17 : index
    %c0_14 = arith.constant 0 : index
    %5 = vector.load %arg9[%c0_11, %c0_12, %c17_13, %c0_14] : memref<1x18x18x32xf32, #tpu.memory_space<vmem>>, vector<1x18x1x32xf32>
    tpu.vector_store %arg9[%c0_11, %c0_12, %c17_13, %c0_14], %3 {strides = array<i32>} : memref<1x18x18x32xf32, #tpu.memory_space<vmem>>, vector<1x18x1x32xf32>,
    %c0_15 = arith.constant 0 : index
    %c0_16 = arith.constant 0 : index
    %c0_17 = arith.constant 0 : index
    %c0_18 = arith.constant 0 : index
    %6 = vector.load %arg1[%c0_15, %c0_16, %c0_17, %c0_18] : memref<1x16x16x32xf32, #tpu.memory_space<vmem>>, vector<1x16x16x32xf32>
    %c0_19 = arith.constant 0 : index
    %c1 = arith.constant 1 : index
    %c1_20 = arith.constant 1 : index
    %c0_21 = arith.constant 0 : index
    %7 = vector.load %arg9[%c0_19, %c1, %c1_20, %c0_21] : memref<1x18x18x32xf32, #tpu.memory_space<vmem>>, vector<1x16x16x32xf32>
    tpu.vector_store %arg9[%c0_19, %c1, %c1_20, %c0_21], %6 {strides = array<i32>} : memref<1x18x18x32xf32, #tpu.memory_space<vmem>>, vector<1x16x16x32xf32>,
    %c0_22 = arith.constant 0 : index
    %c0_23 = arith.constant 0 : index
    %c0_24 = arith.constant 0 : index
    %c0_25 = arith.constant 0 : index
    %8 = vector.load %arg9[%c0_22, %c0_23, %c0_24, %c0_25] : memref<1x18x18x32xf32, #tpu.memory_space<vmem>>, vector<1x18x16x32xf32>
    %c0_26 = arith.constant 0 : index
    %c0_27 = arith.constant 0 : index
    %c1_28 = arith.constant 1 : index
    %c0_29 = arith.constant 0 : index
    %9 = vector.load %arg9[%c0_26, %c0_27, %c1_28, %c0_29] : memref<1x18x18x32xf32, #tpu.memory_space<vmem>>, vector<1x18x16x32xf32>
    %c0_30 = arith.constant 0 : index
    %c0_31 = arith.constant 0 : index
    %c2 = arith.constant 2 : index
    %c0_32 = arith.constant 0 : index
    %10 = vector.load %arg9[%c0_30, %c0_31, %c2, %c0_32] : memref<1x18x18x32xf32, #tpu.memory_space<vmem>>, vector<1x18x16x32xf32>
    %11 = vector.extract_strided_slice %8 {offsets = [0, 0, 0, 0], sizes = [1, 16, 16, 32], strides = [1, 1, 1, 1]} : vector<1x18x16x32xf32> to vector<1x16x16x32xf32>
    %12 = vector.extract_strided_slice %9 {offsets = [0, 0, 0, 0], sizes = [1, 16, 16, 32], strides = [1, 1, 1, 1]} : vector<1x18x16x32xf32> to vector<1x16x16x32xf32>
    %13 = vector.extract_strided_slice %10 {offsets = [0, 0, 0, 0], sizes = [1, 16, 16, 32], strides = [1, 1, 1, 1]} : vector<1x18x16x32xf32> to vector<1x16x16x32xf32>
    %14 = vector.extract_strided_slice %8 {offsets = [0, 1, 0, 0], sizes = [1, 16, 16, 32], strides = [1, 1, 1, 1]} : vector<1x18x16x32xf32> to vector<1x16x16x32xf32>
    %15 = vector.extract_strided_slice %9 {offsets = [0, 1, 0, 0], sizes = [1, 16, 16, 32], strides = [1, 1, 1, 1]} : vector<1x18x16x32xf32> to vector<1x16x16x32xf32>
    %16 = vector.extract_strided_slice %10 {offsets = [0, 1, 0, 0], sizes = [1, 16, 16, 32], strides = [1, 1, 1, 1]} : vector<1x18x16x32xf32> to vector<1x16x16x32xf32>
    %17 = vector.extract_strided_slice %8 {offsets = [0, 2, 0, 0], sizes = [1, 16, 16, 32], strides = [1, 1, 1, 1]} : vector<1x18x16x32xf32> to vector<1x16x16x32xf32>
    %18 = vector.extract_strided_slice %9 {offsets = [0, 2, 0, 0], sizes = [1, 16, 16, 32], strides = [1, 1, 1, 1]} : vector<1x18x16x32xf32> to vector<1x16x16x32xf32>
    %19 = vector.extract_strided_slice %10 {offsets = [0, 2, 0, 0], sizes = [1, 16, 16, 32], strides = [1, 1, 1, 1]} : vector<1x18x16x32xf32> to vector<1x16x16x32xf32>
    %20 = tpu.concatenate %11, %12, %13, %14, %15, %16, %17, %18, %19 in 3 : vector<1x16x16x32xf32>, vector<1x16x16x32xf32>, vector<1x16x16x32xf32>, vector<1x16x16x32xf32>, vector<1x16x16x32xf32>, vector<1x16x16x32xf32>, vector<1x16x16x32xf32>, vector<1x16x16x32xf32>, vector<1x16x16x32xf32> -> vector<1x16x16x288xf32>
    %21 = vector.shape_cast %20 : vector<1x16x16x288xf32> to vector<256x288xf32>
    %22 = arith.truncf %21 : vector<256x288xf32> to vector<256x288xbf16>
    %c0_33 = arith.constant 0 : index
    %c0_34 = arith.constant 0 : index
    %23 = vector.load %arg2[%c0_33, %c0_34] : memref<288x32xbf16, #tpu.memory_space<vmem>>, vector<288x32xbf16>
    %cst_35 = arith.constant dense<0.000000e+00> : vector<256x32xf32>
    %24 = tpu.matmul %22, %23, %cst_35 {dimension_numbers = #tpu.dot_dimension_numbers<[1], [0], [0], [1], [0, 0, 1, 1], [], []>} : vector<256x288xbf16>, vector<288x32xbf16>, vector<256x32xf32> -> vector<256x32xf32>
    %c0_36 = arith.constant 0 : index
    %c0_37 = arith.constant 0 : index
    %25 = vector.load %arg4[%c0_36, %c0_37] : memref<1x32xf32, #tpu.memory_space<vmem>>, vector<1x32xf32>
    %26 = vector.broadcast %25 : vector<1x32xf32> to vector<256x32xf32>
    %27 = arith.mulf %24, %26 : vector<256x32xf32>
    %c0_38 = arith.constant 0 : index
    %c0_39 = arith.constant 0 : index
    %28 = vector.load %arg5[%c0_38, %c0_39] : memref<1x32xf32, #tpu.memory_space<vmem>>, vector<1x32xf32>
    %29 = vector.broadcast %28 : vector<1x32xf32> to vector<256x32xf32>
    %30 = arith.addf %27, %29 : vector<256x32xf32>
    %cst_40 = arith.constant 0.000000e+00 : f32
    %31 = vector.broadcast %cst_40 : f32 to vector<256x32xf32>
    %32 = arith.cmpf oge, %30, %31 : vector<256x32xf32>
    %cst_41 = arith.constant 0.00999999977 : f32
    %33 = vector.broadcast %cst_41 : f32 to vector<256x32xf32>
    %34 = arith.mulf %33, %30 : vector<256x32xf32>
    %35 = arith.select %32, %30, %34 : vector<256x32xi1>, vector<256x32xf32>
    %36 = vector.shape_cast %35 : vector<256x32xf32> to vector<1x16x16x32xf32>
    %c0_42 = arith.constant 0 : index
    %c1_43 = arith.constant 1 : index
    %c1_44 = arith.constant 1 : index
    %c0_45 = arith.constant 0 : index
    %37 = vector.load %arg9[%c0_42, %c1_43, %c1_44, %c0_45] : memref<1x18x18x32xf32, #tpu.memory_space<vmem>>, vector<1x16x16x32xf32>
    tpu.vector_store %arg9[%c0_42, %c1_43, %c1_44, %c0_45], %36 {strides = array<i32>} : memref<1x18x18x32xf32, #tpu.memory_space<vmem>>, vector<1x16x16x32xf32>,
    %c0_46 = arith.constant 0 : index
    %c0_47 = arith.constant 0 : index
    %c0_48 = arith.constant 0 : index
    %c0_49 = arith.constant 0 : index
    %38 = vector.load %arg9[%c0_46, %c0_47, %c0_48, %c0_49] : memref<1x18x18x32xf32, #tpu.memory_space<vmem>>, vector<1x18x16x32xf32>
    %c0_50 = arith.constant 0 : index
    %c0_51 = arith.constant 0 : index
    %c1_52 = arith.constant 1 : index
    %c0_53 = arith.constant 0 : index
    %39 = vector.load %arg9[%c0_50, %c0_51, %c1_52, %c0_53] : memref<1x18x18x32xf32, #tpu.memory_space<vmem>>, vector<1x18x16x32xf32>
    %c0_54 = arith.constant 0 : index
    %c0_55 = arith.constant 0 : index
    %c2_56 = arith.constant 2 : index
    %c0_57 = arith.constant 0 : index
    %40 = vector.load %arg9[%c0_54, %c0_55, %c2_56, %c0_57] : memref<1x18x18x32xf32, #tpu.memory_space<vmem>>, vector<1x18x16x32xf32>
    %41 = vector.extract_strided_slice %38 {offsets = [0, 0, 0, 0], sizes = [1, 16, 16, 32], strides = [1, 1, 1, 1]} : vector<1x18x16x32xf32> to vector<1x16x16x32xf32>
    %42 = vector.extract_strided_slice %39 {offsets = [0, 0, 0, 0], sizes = [1, 16, 16, 32], strides = [1, 1, 1, 1]} : vector<1x18x16x32xf32> to vector<1x16x16x32xf32>
    %43 = vector.extract_strided_slice %40 {offsets = [0, 0, 0, 0], sizes = [1, 16, 16, 32], strides = [1, 1, 1, 1]} : vector<1x18x16x32xf32> to vector<1x16x16x32xf32>
    %44 = vector.extract_strided_slice %38 {offsets = [0, 1, 0, 0], sizes = [1, 16, 16, 32], strides = [1, 1, 1, 1]} : vector<1x18x16x32xf32> to vector<1x16x16x32xf32>
    %45 = vector.extract_strided_slice %39 {offsets = [0, 1, 0, 0], sizes = [1, 16, 16, 32], strides = [1, 1, 1, 1]} : vector<1x18x16x32xf32> to vector<1x16x16x32xf32>
    %46 = vector.extract_strided_slice %40 {offsets = [0, 1, 0, 0], sizes = [1, 16, 16, 32], strides = [1, 1, 1, 1]} : vector<1x18x16x32xf32> to vector<1x16x16x32xf32>
    %47 = vector.extract_strided_slice %38 {offsets = [0, 2, 0, 0], sizes = [1, 16, 16, 32], strides = [1, 1, 1, 1]} : vector<1x18x16x32xf32> to vector<1x16x16x32xf32>
    %48 = vector.extract_strided_slice %39 {offsets = [0, 2, 0, 0], sizes = [1, 16, 16, 32], strides = [1, 1, 1, 1]} : vector<1x18x16x32xf32> to vector<1x16x16x32xf32>
    %49 = vector.extract_strided_slice %40 {offsets = [0, 2, 0, 0], sizes = [1, 16, 16, 32], strides = [1, 1, 1, 1]} : vector<1x18x16x32xf32> to vector<1x16x16x32xf32>
    %50 = tpu.concatenate %41, %42, %43, %44, %45, %46, %47, %48, %49 in 3 : vector<1x16x16x32xf32>, vector<1x16x16x32xf32>, vector<1x16x16x32xf32>, vector<1x16x16x32xf32>, vector<1x16x16x32xf32>, vector<1x16x16x32xf32>, vector<1x16x16x32xf32>, vector<1x16x16x32xf32>, vector<1x16x16x32xf32> -> vector<1x16x16x288xf32>
    %51 = vector.shape_cast %50 : vector<1x16x16x288xf32> to vector<256x288xf32>
    %52 = arith.truncf %51 : vector<256x288xf32> to vector<256x288xbf16>
    %c0_58 = arith.constant 0 : index
    %c0_59 = arith.constant 0 : index
    %53 = vector.load %arg3[%c0_58, %c0_59] : memref<288x32xbf16, #tpu.memory_space<vmem>>, vector<288x32xbf16>
    %cst_60 = arith.constant dense<0.000000e+00> : vector<256x32xf32>
    %54 = tpu.matmul %52, %53, %cst_60 {dimension_numbers = #tpu.dot_dimension_numbers<[1], [0], [0], [1], [0, 0, 1, 1], [], []>} : vector<256x288xbf16>, vector<288x32xbf16>, vector<256x32xf32> -> vector<256x32xf32>
    %c0_61 = arith.constant 0 : index
    %c0_62 = arith.constant 0 : index
    %55 = vector.load %arg6[%c0_61, %c0_62] : memref<1x32xf32, #tpu.memory_space<vmem>>, vector<1x32xf32>
    %56 = vector.broadcast %55 : vector<1x32xf32> to vector<256x32xf32>
    %57 = arith.mulf %54, %56 : vector<256x32xf32>
    %c0_63 = arith.constant 0 : index
    %c0_64 = arith.constant 0 : index
    %58 = vector.load %arg7[%c0_63, %c0_64] : memref<1x32xf32, #tpu.memory_space<vmem>>, vector<1x32xf32>
    %59 = vector.broadcast %58 : vector<1x32xf32> to vector<256x32xf32>
    %60 = arith.addf %57, %59 : vector<256x32xf32>
    %c0_65 = arith.constant 0 : index
    %c0_66 = arith.constant 0 : index
    %c0_67 = arith.constant 0 : index
    %c0_68 = arith.constant 0 : index
    %61 = vector.load %arg1[%c0_65, %c0_66, %c0_67, %c0_68] : memref<1x16x16x32xf32, #tpu.memory_space<vmem>>, vector<1x16x16x32xf32>
    %62 = vector.shape_cast %61 : vector<1x16x16x32xf32> to vector<256x32xf32>
    %63 = arith.addf %60, %62 : vector<256x32xf32>
    %64 = vector.shape_cast %63 : vector<256x32xf32> to vector<1x16x16x32xf32>
    %c0_69 = arith.constant 0 : index
    %c0_70 = arith.constant 0 : index
    %c0_71 = arith.constant 0 : index
    %c0_72 = arith.constant 0 : index
    %65 = vector.load %arg8[%c0_69, %c0_70, %c0_71, %c0_72] : memref<1x16x16x32xf32, #tpu.memory_space<vmem>>, vector<1x16x16x32xf32>
    tpu.vector_store %arg8[%c0_69, %c0_70, %c0_71, %c0_72], %64 {strides = array<i32>} : memref<1x16x16x32xf32, #tpu.memory_space<vmem>>, vector<1x16x16x32xf32>,
    return
  }
  func.func @transform_0(%arg0: i32) -> (i32, i32, i32, i32) {
    %c0_i32 = arith.constant 0 : i32
    %c0_i32_0 = arith.constant 0 : i32
    %c0_i32_1 = arith.constant 0 : i32
    %c0_i32_2 = arith.constant 0 : i32
    return %arg0, %c0_i32, %c0_i32_0, %c0_i32_1 : i32, i32, i32, i32
  }
  func.func @transform_1(%arg0: i32) -> (i32, i32) {
    %c0_i32 = arith.constant 0 : i32
    %c0_i32_0 = arith.constant 0 : i32
    %c0_i32_1 = arith.constant 0 : i32
    return %c0_i32, %c0_i32_0 : i32, i32
  }
  func.func @transform_2(%arg0: i32) -> (i32, i32) {
    %c0_i32 = arith.constant 0 : i32
    %c0_i32_0 = arith.constant 0 : i32
    %c0_i32_1 = arith.constant 0 : i32
    return %c0_i32, %c0_i32_0 : i32, i32
  }
  func.func @transform_3(%arg0: i32) -> (i32, i32) {
    %c0_i32 = arith.constant 0 : i32
    %c0_i32_0 = arith.constant 0 : i32
    %c0_i32_1 = arith.constant 0 : i32
    return %c0_i32, %c0_i32_0 : i32, i32
  }
  func.func @transform_4(%arg0: i32) -> (i32, i32) {
    %c0_i32 = arith.constant 0 : i32
    %c0_i32_0 = arith.constant 0 : i32
    %c0_i32_1 = arith.constant 0 : i32
    return %c0_i32, %c0_i32_0 : i32, i32
  }
  func.func @transform_5(%arg0: i32) -> (i32, i32) {
    %c0_i32 = arith.constant 0 : i32
    %c0_i32_0 = arith.constant 0 : i32
    %c0_i32_1 = arith.constant 0 : i32
    return %c0_i32, %c0_i32_0 : i32, i32
  }
  func.func @transform_6(%arg0: i32) -> (i32, i32) {
    %c0_i32 = arith.constant 0 : i32
    %c0_i32_0 = arith.constant 0 : i32
    %c0_i32_1 = arith.constant 0 : i32
    return %c0_i32, %c0_i32_0 : i32, i32
  }
  func.func @transform_7(%arg0: i32) -> (i32, i32, i32, i32) {
    %c0_i32 = arith.constant 0 : i32
    %c0_i32_0 = arith.constant 0 : i32
    %c0_i32_1 = arith.constant 0 : i32
    %c0_i32_2 = arith.constant 0 : i32
    return %arg0, %c0_i32, %c0_i32_0, %c0_i32_1 : i32, i32, i32, i32
  }
}

</mosaic_0001>

<bundles_post_ra>
// kernel: tpu_custom_call.1
= control target key start
LH: loop header
LB: loop body
LE: loop exit
PB: predicated region body
PF: predicated region fallthrough
CT: control target
= control target key end

     0   :  { %12 = vsyncpa [#allocation4], 0  ;;  %s7512_s0 = inlined_call_operand.hbm [shape: f32[2,16,16,32], index: 0, kind: input, shape index: {}]   ;;  %s7513_s1 = inlined_call_operand.vmem [shape: bf16[288,32], index: 1, kind: input, shape index: {}]   ;;  %s7514_s2 = inlined_call_operand.vmem [shape: bf16[288,32], index: 2, kind: input, shape index: {}]   ;;  %s7515_s3 = inlined_call_operand.vmem [shape: f32[1,32], index: 3, kind: input, shape index: {}]   ;;  %s7516_s4 = inlined_call_operand.vmem [shape: f32[1,32], index: 4, kind: input, shape index: {}]   ;;  %s7517_s5 = inlined_call_operand.vmem [shape: f32[1,32], index: 5, kind: input, shape index: {}]   ;;  %s7518_s6 = inlined_call_operand.vmem [shape: f32[1,32], index: 6, kind: input, shape index: {}]   ;;  %s7519_s7 = inlined_call_operand.hbm [shape: f32[2,16,16,32], index: 7, kind: output, shape index: {}]  }
   0x1   :  { %14 = vsyncpa [#allocation4 + $0x1], 0 }
   0x2   :  { %15 = vsyncpa [#allocation5], 0 }
   0x3   :  { %17 = vsyncpa [#allocation5 + $0x1], 0  ;;  %s5662_s24 = smov 0   ;;  %s5664_s25 = smov 0  }
   0x4   :  { %s5666_s26 = smov 0   ;;  %s5668_s27 = smov 0  }
   0x5 LB: > { %s5683_s28 = sadd.s32 4294967295, %s5610_s27   ;;  %s3962_s29 = sadd.s32 4294967294, %s5610_s27   ;;  %s5610_s27 = sphi %s5668_s27, %s7561_s27   ;;  %s5606_s26 = sphi %s5666_s26, %s7560_s26   ;;  %s5602_s25 = sphi %s5664_s25, %s7559_s25   ;;  %s5598_s24 = sphi %s5662_s24, %s7558_s24  }
   0x6   : > { %s5687_s30 = sadd.s32 1, %s5610_s27   ;;  %s30_s8 = sadd.s32 1, %s5606_s26 }
   0x7   : > { %s27_s9 = ssub.s32 %s5610_s27, %s5687_s30  ;;  %p37_p0 = scmp.ne.s32.totalorder %s5606_s26, %s5602_s25 }
   0x8   : > { %p28_p1 = scmp.eq.s32.totalorder %s27_s9, 0  ;;  %p38_p2 = scmp.eq.s32.totalorder %s5610_s27, 0 }
   0x9   : > { %p43_p3 = scmp.ne.s32.totalorder %s5602_s25, %s5598_s24  ;;  %p44_p4 = scmp.eq.s32.totalorder %s5683_s28, 0 }
   0xa   : > { %s5699_s10 = scalar_select %p28_p1, %s5606_s26, %s30_s8  }
   0xb   : > { %p5701_p5 = por %p38_p2, %p37_p0  ;;  %p5705_p6 = por %p44_p4, %p43_p3 }
   0xc   : > { %p193_p7 = scmp.eq.s32.totalorder %s5683_s28, 1  ;;  %p199_p8 = scmp.eq.s32.totalorder %s3962_s29, 1 }
   0xd   : > { %s7532_s12 = scalar_select %p5705_p6, 1, 0 }
   0xe   : > { %p4398_p10 = scmp.lt.s32.totalorder %s5610_s27, 2  ;;  %p5712_p11 = por %p193_p7, %p37_p0 }
   0xf   : > { %p5716_p12 = por %p199_p8, %p43_p3  ;;  %s237_s15 = sand.u32 1, %s5606_s26  }
  0x10   : > { %s7533_s13 = scalar_select %p5712_p11, 1, 0 }
  0x11   : > { %s7534_s14 = scalar_select %p5716_p12, 1, 0 }
  0x12   : > { %s4048_s16 = sshll.u32 %s5610_s27, 12  ;;  %s3965_s17 = sshll.u32 %s237_s15, 8 }
  0x13   : > { %s5725_s20 = scalar_lea.hbm %s7512_s0, %s4048_s16  ;;  %s241_s21 = scalar_lea.vmem [#allocation3], %s3965_s17 }
  0x14   : > { %s248_s22 = sshll.u32 %s241_s21, 4  ;;  %p5729_p13 = pnand %p4398_p10, %p5701_p5  ;;  %s5733_s22 = int_to_ptr.vmem [resolvable:$true] %s248_s22 }
  0x15   : > { %s5735_s29 = scalar_lea.sflag [#allocation4], %s237_s15  ;;  %s5518_s8 = scalar_lea.hbm %s5725_s20, 4096 }
  0x16   : > { %p5519_p0 = scmp.ne.s32.totalorder %s5725_s20, %s5518_s8  ;;  %p5520_p1 = pneg %p5729_p13 }
  0x17   : > { %s5523_s17 = scalar_lea.hbm %s7512_s0, 8192  ;;  %p5524_p4 = scmp.lt.s32.totalorder %s5725_s20, %s7512_s0 }
  0x18   : > { %p5521_p2 = pnand %p5520_p1, %p5519_p0  ;;  %p5525_p5 = scmp.lt.s32.totalorder %s5523_s17, %s5518_s8 }
  0x1a   : > { %p5522_p3 = pneg %p5521_p2  ;;  %p5526_p7 = por %p5525_p5, %p5524_p4 }
  0x1c   : > { %p5527_p8 = pnand %p5526_p7, %p5522_p3 }
  0x1e   : > { %5530 = shalt.err (!%p5527_p8)
}
  0x1f   : > { %s5531_s15 = scalar_lea.vmem %s5733_s22, 4096  ;;  %s5612_s19 = smov [#allocation3]  }
  0x20   : > { %p5532_p10 = scmp.ne.s32.totalorder %s5733_s22, %s5531_s15  ;;  %s5536_s21 = sshll.u32 %s5612_s19, 4  ;;  %s5537_s21 = int_to_ptr.vmem [resolvable:$false] %s5536_s21 }
  0x21   : > { %s5538_s9 = scalar_lea.vmem %s5537_s21, 8192  ;;  %p5539_p2 = scmp.lt.s32.totalorder %s5733_s22, %s5537_s21 }
  0x22   : > { %p5534_p9 = pnand %p5532_p10, %p5520_p1  ;;  %p5540_p12 = scmp.lt.s32.totalorder %s5538_s9, %s5531_s15 }
  0x24   : > { %p5535_p0 = pneg %p5534_p9  ;;  %p5541_p11 = por %p5540_p12, %p5539_p2 }
  0x26   : > { %p5542_p6 = pnand %p5541_p11, %p5535_p0 }
  0x28   : > { %5545 = shalt.err (!%p5542_p6)
}
  0x29   : > { %s5613_s8 = smov 128   ;;  %s5614_s16 = smov 8  }
  0x2a   : > { %4393 = dma.hbm_to_vmem [thread:$0]  (!%p5729_p13), %s5725_s20, 4096, %s5733_s22, %s5735_s29, %s5613_s8, %s5613_s8, %s5614_s16  }
  0x2b   : > { %p3968_p9 = scmp.ge.s32.totalorder %s5610_s27, 1  ;;  %p256_p1 = scmp.lt.s32.totalorder %s5610_s27, 3 }
  0x2d   : > { %p257_p3 = pnand %p3968_p9, %p256_p1 }
  0x2f   : > { %260 = sbr.rel (%p257_p3) target bundleno = 1011 (0x3f3), region = 48 }
  0x34   : > { %s5759_s17 = sand.u32 1, %s5602_s25   ;;  %p7536_p6 = scmp.ne.s32.totalorder %s7532_s12, 0 }
  0x35   : > { %s3969_s11 = sshll.u32 %s5759_s17, 8  ;;  %s263_s18 = scalar_lea.sflag [#allocation4], %s5759_s17 }
  0x36   : > { %s5765_s15 = scalar_lea.vmem [#allocation3], %s3969_s11 }
  0x37   : > { %5589 = dma.done.wait (%p7536_p6), %s263_s18, 4096  }
  0x38   : > { %5591 = vsyncadd (%p7536_p6), %s263_s18, 4294963200  ;;  %vm298_vm0 = vcmask 261120   ;;  %vm301_vm1 = vcmask 254976   ;;  %vm307_vm2 = vcmask 253952   ;;  %v5615_v0 = vmov 0.0   ;;  %v346_v1 = vld [vmem:[%s5765_s15 + $0x10] sm:$0xff] }
  0x39   : > { %299 = vst.msk [vmem:[#allocation2] sm:$0xff] %vm298_vm0, %v5615_v0  ;;  %300 = vst.msk [vmem:[#allocation2 + $0x8] sm:$0xff] %vm298_vm0, %v5615_v0  ;;  %v347_v2 = vld [vmem:[%s5765_s15 + $0x18] sm:$0xff]  ;;  %v344_v3 = vld [vmem:[%s5765_s15] sm:$0xff]  ;;  %s5616_s12 = smov 32   ;;  %s5617_s19 = smov 64  }
  0x3a   : > { %302 = vst.msk [vmem:[#allocation2 + $0x10] sm:$0x3] %vm301_vm1, %v5615_v0  ;;  %306 = vst.msk [vmem:[#allocation2 + $0x1a8] sm:$0x3] %vm301_vm1, %v5615_v0  ;;  %v345_v6 = vld [vmem:[%s5765_s15 + $0x8] sm:$0xff]  ;;  %v348_v8 = vld [vmem:[%s5765_s15 + $0x20] sm:$0xff] }
  0x3b   : > { %304 = vst.msk [vmem:[#allocation2 + $0x198] sm:$0xff] %vm298_vm0, %v5615_v0  ;;  %305 = vst.msk [vmem:[#allocation2 + $0x1a0] sm:$0xff] %vm298_vm0, %v5615_v0  ;;  %v349_v9 = vld [vmem:[%s5765_s15 + $0x28] sm:$0xff]  ;;  %v350_v10 = vld [vmem:[%s5765_s15 + $0x30] sm:$0xff]  ;;  %s5618_s20 = smov 96   ;;  %vm1229_vm3 = vcmask 523264  }
  0x3c   : > { %309 = vst.msk [vmem:[#allocation2 + $0x18] sm:$0x1] %vm307_vm2, %v5615_v0  ;;  %310 = vst.msk [vmem:[#allocation2 + $0x30] sm:$0x1] %vm307_vm2, %v5615_v0  ;;  %v351_v11 = vld [vmem:[%s5765_s15 + $0x38] sm:$0xff]  ;;  %v352_v12 = vld [vmem:[%s5765_s15 + $0x40] sm:$0xff] }
  0x3d   : > { %311 = vst.msk [vmem:[#allocation2 + $0x48] sm:$0x1] %vm307_vm2, %v5615_v0  ;;  %312 = vst.msk [vmem:[#allocation2 + $0x60] sm:$0x1] %vm307_vm2, %v5615_v0  ;;  %v353_v13 = vld [vmem:[%s5765_s15 + $0x48] sm:$0xff]  ;;  %v354_v14 = vld [vmem:[%s5765_s15 + $0x50] sm:$0xff] }
  0x3e   : > { %313 = vst.msk [vmem:[#allocation2 + $0x78] sm:$0x1] %vm307_vm2, %v5615_v0  ;;  %314 = vst.msk [vmem:[#allocation2 + $0x90] sm:$0x1] %vm307_vm2, %v5615_v0  ;;  %v355_v15 = vld [vmem:[%s5765_s15 + $0x58] sm:$0xff]  ;;  %v356_v16 = vld [vmem:[%s5765_s15 + $0x60] sm:$0xff] }
  0x3f   : > { %315 = vst.msk [vmem:[#allocation2 + $0xa8] sm:$0x1] %vm307_vm2, %v5615_v0  ;;  %316 = vst.msk [vmem:[#allocation2 + $0xc0] sm:$0x1] %vm307_vm2, %v5615_v0  ;;  %v357_v17 = vld [vmem:[%s5765_s15 + $0x68] sm:$0xff]  ;;  %v358_v18 = vld [vmem:[%s5765_s15 + $0x70] sm:$0xff] }
  0x40   : > { %317 = vst.msk [vmem:[#allocation2 + $0xd8] sm:$0x1] %vm307_vm2, %v5615_v0  ;;  %318 = vst.msk [vmem:[#allocation2 + $0xf0] sm:$0x1] %vm307_vm2, %v5615_v0  ;;  %v445_v4 = vld [vmem:[#allocation2 + $0x1] sm:$0xff]  ;;  %v360_v20 = vld [vmem:[%s5765_s15 + $0x80] sm:$0xff] }
  0x41   : > { %319 = vst.msk [vmem:[#allocation2 + $0x108] sm:$0x1] %vm307_vm2, %v5615_v0  ;;  %320 = vst.msk [vmem:[#allocation2 + $0x120] sm:$0x1] %vm307_vm2, %v5615_v0  ;;  %v446_v5 = vld [vmem:[#allocation2 + $0x9] sm:$0xff]  ;;  %v361_v21 = vld [vmem:[%s5765_s15 + $0x88] sm:$0xff] }
  0x42   : > { %321 = vst.msk [vmem:[#allocation2 + $0x138] sm:$0x1] %vm307_vm2, %v5615_v0  ;;  %322 = vst.msk [vmem:[#allocation2 + $0x150] sm:$0x1] %vm307_vm2, %v5615_v0  ;;  %v4440_v7 = vpack.i.bf16 %v446_v5, %v445_v4  ;;  %v359_v19 = vld [vmem:[%s5765_s15 + $0x78] sm:$0xff]  ;;  %v362_v22 = vld [vmem:[%s5765_s15 + $0x90] sm:$0xff] }
  0x43   : > { %323 = vst.msk [vmem:[#allocation2 + $0x168] sm:$0x1] %vm307_vm2, %v5615_v0  ;;  %324 = vst.msk [vmem:[#allocation2 + $0x180] sm:$0x1] %vm307_vm2, %v5615_v0  ;;  %v363_v23 = vld [vmem:[%s5765_s15 + $0x98] sm:$0xff]  ;;  %v364_v24 = vld [vmem:[%s5765_s15 + $0xa0] sm:$0xff] }
  0x44   : > { %327 = vst.msk [vmem:[#allocation2 + $0x29] sm:$0x1] %vm307_vm2, %v5615_v0  ;;  %328 = vst.msk [vmem:[#allocation2 + $0x41] sm:$0x1] %vm307_vm2, %v5615_v0  ;;  %4441 = vrot.lane.b32.xlu0 %v4440_v7, %s5616_s12  ;;  %v365_v25 = vld [vmem:[%s5765_s15 + $0xa8] sm:$0xff]  ;;  %v366_v31 = vld [vmem:[%s5765_s15 + $0xb0] sm:$0xff] }
  0x45   : > { %329 = vst.msk [vmem:[#allocation2 + $0x59] sm:$0x1] %vm307_vm2, %v5615_v0  ;;  %330 = vst.msk [vmem:[#allocation2 + $0x71] sm:$0x1] %vm307_vm2, %v5615_v0  ;;  %v367_v32 = vld [vmem:[%s5765_s15 + $0xb8] sm:$0xff]  ;;  %v368_v48 = vld [vmem:[%s5765_s15 + $0xc0] sm:$0xff] }
  0x46   : > { %331 = vst.msk [vmem:[#allocation2 + $0x89] sm:$0x1] %vm307_vm2, %v5615_v0  ;;  %332 = vst.msk [vmem:[#allocation2 + $0xa1] sm:$0x1] %vm307_vm2, %v5615_v0  ;;  %v369_v49 = vld [vmem:[%s5765_s15 + $0xc8] sm:$0xff]  ;;  %v370_v50 = vld [vmem:[%s5765_s15 + $0xd0] sm:$0xff] }
  0x47   : > { %333 = vst.msk [vmem:[#allocation2 + $0xb9] sm:$0x1] %vm307_vm2, %v5615_v0  ;;  %334 = vst.msk [vmem:[#allocation2 + $0xd1] sm:$0x1] %vm307_vm2, %v5615_v0  ;;  %v371_v53 = vld [vmem:[%s5765_s15 + $0xd8] sm:$0xff]  ;;  %v372_v54 = vld [vmem:[%s5765_s15 + $0xe0] sm:$0xff] }
  0x48   : > { %335 = vst.msk [vmem:[#allocation2 + $0xe9] sm:$0x1] %vm307_vm2, %v5615_v0  ;;  %336 = vst.msk [vmem:[#allocation2 + $0x101] sm:$0x1] %vm307_vm2, %v5615_v0  ;;  %v373_v55 = vld [vmem:[%s5765_s15 + $0xe8] sm:$0xff]  ;;  %vm1262_vm4 = vcmask 785408  }
  0x49   : > { %337 = vst.msk [vmem:[#allocation2 + $0x119] sm:$0x1] %vm307_vm2, %v5615_v0  ;;  %338 = vst.msk [vmem:[#allocation2 + $0x131] sm:$0x1] %vm307_vm2, %v5615_v0  ;;  %s7305_s21 = scalar_lea.vmem [#allocation6], %s3969_s11  ;;  %s4049_s11 = sshll.u32 %s5683_s28, 12 }
  0x4a   : > { %339 = vst.msk [vmem:[#allocation2 + $0x149] sm:$0x1] %vm307_vm2, %v5615_v0  ;;  %340 = vst.msk [vmem:[#allocation2 + $0x161] sm:$0x1] %vm307_vm2, %v5615_v0  ;;  %s3889_s9 = sshll.u32 %s7305_s21, 4  ;;  %s7463_s18 = scalar_lea.hbm %s7519_s7, %s4049_s11  ;;  %s7465_s9 = int_to_ptr.vmem [resolvable:$true] %s3889_s9 }
  0x4b   : > { %341 = vst.msk [vmem:[#allocation2 + $0x179] sm:$0x1] %vm307_vm2, %v5615_v0  ;;  %342 = vst.msk [vmem:[#allocation2 + $0x191] sm:$0x1] %vm307_vm2, %v5615_v0  ;;  %s3876_s28 = scalar_lea.sflag [#allocation5], %s5759_s17  ;;  %p7555_p12 = scmp.ne.s32.totalorder %s7533_s13, 0 }
  0x4c   : > { %326 = vst.msk [vmem:[#allocation2 + $0x11] sm:$0x1] %vm307_vm2, %v5615_v0  ;;  %308 = vst.msk [vmem:[#allocation2] sm:$0x1] %vm307_vm2, %v5615_v0  ;;  %s5619_s22 = smov [#allocation6]  }
  0x4d   : > { %325 = vst.msk [vmem:[#allocation2 + $0x198] sm:$0x1] %vm307_vm2, %v5615_v0  ;;  %343 = vst.msk [vmem:[#allocation2 + $0x1a9] sm:$0x1] %vm307_vm2, %v5615_v0  ;;  %s5550_s23 = sshll.u32 %s5619_s22, 4  ;;  %s5551_s23 = int_to_ptr.vmem [resolvable:$false] %s5550_s23 }
  0x4e   : > { %379 = vst.msk [vmem:[#allocation2 + $0x31] sm:$0xff] %vm298_vm0, %v346_v1  ;;  %380 = vst.msk [vmem:[#allocation2 + $0x39] sm:$0xff] %vm298_vm0, %v347_v2  ;;  %p5553_p5 = scmp.lt.s32.totalorder %s7465_s9, %s5551_s23 }
  0x4f   : > { %377 = vst.msk [vmem:[#allocation2 + $0x19] sm:$0xff] %vm298_vm0, %v344_v3  ;;  %378 = vst.msk [vmem:[#allocation2 + $0x21] sm:$0xff] %vm298_vm0, %v345_v6 }
  0x50   : > { %381 = vst.msk [vmem:[#allocation2 + $0x49] sm:$0xff] %vm298_vm0, %v348_v8  ;;  %382 = vst.msk [vmem:[#allocation2 + $0x51] sm:$0xff] %vm298_vm0, %v349_v9 }
  0x51   : > { %383 = vst.msk [vmem:[#allocation2 + $0x61] sm:$0xff] %vm298_vm0, %v350_v10  ;;  %384 = vst.msk [vmem:[#allocation2 + $0x69] sm:$0xff] %vm298_vm0, %v351_v11 }
  0x52   : > { %385 = vst.msk [vmem:[#allocation2 + $0x79] sm:$0xff] %vm298_vm0, %v352_v12  ;;  %386 = vst.msk [vmem:[#allocation2 + $0x81] sm:$0xff] %vm298_vm0, %v353_v13 }
  0x53   : > { %387 = vst.msk [vmem:[#allocation2 + $0x91] sm:$0xff] %vm298_vm0, %v354_v14  ;;  %388 = vst.msk [vmem:[#allocation2 + $0x99] sm:$0xff] %vm298_vm0, %v355_v15  ;;  %v481_v14 = vld [vmem:[#allocation2 + $0x2] sm:$0xff]  ;;  %v482_v15 = vld [vmem:[#allocation2 + $0xa] sm:$0xff] }
  0x54   : > { %389 = vst.msk [vmem:[#allocation2 + $0xa9] sm:$0xff] %vm298_vm0, %v356_v16  ;;  %390 = vst.msk [vmem:[#allocation2 + $0xb1] sm:$0xff] %vm298_vm0, %v357_v17 }
  0x55   : > { %391 = vst.msk [vmem:[#allocation2 + $0xc1] sm:$0xff] %vm298_vm0, %v358_v18  ;;  %392 = vst.msk [vmem:[#allocation2 + $0xc9] sm:$0xff] %vm298_vm0, %v359_v19  ;;  %v5853_v26 = vld [vmem:[#allocation2 + $0x31] sm:$0xff]  ;;  %v5855_v27 = vld [vmem:[#allocation2 + $0x39] sm:$0xff]  ;;  %v4520_v18 = vpack.i.bf16 %v482_v15, %v481_v14 }
  0x56   : > { %393 = vst.msk [vmem:[#allocation2 + $0xd9] sm:$0xff] %vm298_vm0, %v360_v20  ;;  %394 = vst.msk [vmem:[#allocation2 + $0xe1] sm:$0xff] %vm298_vm0, %v361_v21  ;;  %v5857_v28 = vld [vmem:[#allocation2 + $0x19] sm:$0xff]  ;;  %v5864_v29 = vpack.i.bf16 %v5855_v27, %v5853_v26  ;;  %v5866_v30 = vld [vmem:[#allocation2 + $0x21] sm:$0xff] }
  0x57   : > { %395 = vst.msk [vmem:[#allocation2 + $0xf1] sm:$0xff] %vm298_vm0, %v362_v22  ;;  %396 = vst.msk [vmem:[#allocation2 + $0xf9] sm:$0xff] %vm298_vm0, %v363_v23  ;;  %v4445_v33 = vpack.i.bf16 %v5866_v30, %v5857_v28  ;;  %v451_v34 = vld [vmem:[#allocation2 + $0x49] sm:$0xff]  ;;  %v452_v35 = vld [vmem:[#allocation2 + $0x51] sm:$0xff] }
  0x58   : > { %397 = vst.msk [vmem:[#allocation2 + $0x109] sm:$0xff] %vm298_vm0, %v364_v24  ;;  %398 = vst.msk [vmem:[#allocation2 + $0x111] sm:$0xff] %vm298_vm0, %v365_v25  ;;  %v453_v36 = vld [vmem:[#allocation2 + $0x61] sm:$0xff]  ;;  %4451 = vrot.lane.b32.xlu1 %v5864_v29, %s5616_s12  ;;  %v5876_v37 = vpack.i.bf16 %v452_v35, %v451_v34  ;;  %v454_v38 = vld [vmem:[#allocation2 + $0x69] sm:$0xff] }
  0x59   : > { %399 = vst.msk [vmem:[#allocation2 + $0x121] sm:$0xff] %vm298_vm0, %v366_v31  ;;  %400 = vst.msk [vmem:[#allocation2 + $0x129] sm:$0xff] %vm298_vm0, %v367_v32  ;;  %4446 = vrot.lane.b32.xlu0 %v4445_v33, %s5616_s12  ;;  %v5879_v39 = vpack.i.bf16 %v454_v38, %v453_v36  ;;  %v455_v40 = vld [vmem:[#allocation2 + $0x79] sm:$0xff]  ;;  %v456_v41 = vld [vmem:[#allocation2 + $0x81] sm:$0xff] }
  0x5a   : > { %v457_v42 = vld [vmem:[#allocation2 + $0x91] sm:$0xff]  ;;  %v458_v43 = vld [vmem:[#allocation2 + $0x99] sm:$0xff]  ;;  %v5883_v44 = vpack.i.bf16 %v456_v41, %v455_v40  ;;  %401 = vst.msk [vmem:[#allocation2 + $0x139] sm:$0xff] %vm298_vm0, %v368_v48  ;;  %402 = vst.msk [vmem:[#allocation2 + $0x141] sm:$0xff] %vm298_vm0, %v369_v49 }
  0x5b   : > { %v459_v45 = vld [vmem:[#allocation2 + $0xa9] sm:$0xff]  ;;  %v460_v46 = vld [vmem:[#allocation2 + $0xb1] sm:$0xff]  ;;  %v5887_v47 = vpack.i.bf16 %v458_v43, %v457_v42  ;;  %403 = vst.msk [vmem:[#allocation2 + $0x151] sm:$0xff] %vm298_vm0, %v370_v50  ;;  %404 = vst.msk [vmem:[#allocation2 + $0x159] sm:$0xff] %vm298_vm0, %v371_v53 }
  0x5c   : > { %4456 = vrot.lane.b32.xlu1 %v5876_v37, %s5616_s12  ;;  %v461_v51 = vld [vmem:[#allocation2 + $0xc1] sm:$0xff]  ;;  %v462_v52 = vld [vmem:[#allocation2 + $0xc9] sm:$0xff]  ;;  %v5901_v56 = vpack.i.bf16 %v460_v46, %v459_v45  ;;  %405 = vst.msk [vmem:[#allocation2 + $0x169] sm:$0xff] %vm298_vm0, %v372_v54  ;;  %406 = vst.msk [vmem:[#allocation2 + $0x171] sm:$0xff] %vm298_vm0, %v373_v55 }
  0x5d   : > { %4461 = vrot.lane.b32.xlu0 %v5879_v39, %s5616_s12  ;;  %v5907_v57 = vpack.i.bf16 %v462_v52, %v461_v51  ;;  %v463_v58 = vld [vmem:[#allocation2 + $0xd9] sm:$0xff]  ;;  %v464_v59 = vld [vmem:[#allocation2 + $0xe1] sm:$0xff]  ;;  %v5942_v23 = vld [vmem:[#allocation2 + $0x4a] sm:$0xff] }
  0x5e   : > { %v465_v60 = vld [vmem:[#allocation2 + $0xf1] sm:$0xff]  ;;  %v466_v61 = vld [vmem:[#allocation2 + $0xf9] sm:$0xff]  ;;  %v5911_v62 = vpack.i.bf16 %v464_v59, %v463_v58  ;;  %v484_v19 = vld [vmem:[#allocation2 + $0x22] sm:$0xff] }
  0x5f   : > { %v5915_v63 = vpack.i.bf16 %v466_v61, %v465_v60  ;;  %v467_v0 = vld [vmem:[#allocation2 + $0x109] sm:$0xff]  ;;  %v468_v1 = vld [vmem:[#allocation2 + $0x111] sm:$0xff]  ;;  %v483_v17 = vld [vmem:[#allocation2 + $0x1a] sm:$0xff] }
  0x60   : > { %4466 = vrot.lane.b32.xlu1 %v5883_v44, %s5616_s12  ;;  %v469_v2 = vld [vmem:[#allocation2 + $0x121] sm:$0xff]  ;;  %v470_v3 = vld [vmem:[#allocation2 + $0x129] sm:$0xff]  ;;  %v5919_v4 = vpack.i.bf16 %v468_v1, %v467_v0  ;;  %v485_v20 = vld [vmem:[#allocation2 + $0x32] sm:$0xff]  ;;  %v4525_v25 = vpack.i.bf16 %v484_v19, %v483_v17 }
  0x61   : > { %4471 = vrot.lane.b32.xlu0 %v5887_v47, %s5616_s12  ;;  %v5923_v5 = vpack.i.bf16 %v470_v3, %v469_v2  ;;  %v471_v6 = vld [vmem:[#allocation2 + $0x139] sm:$0xff]  ;;  %v472_v7 = vld [vmem:[#allocation2 + $0x141] sm:$0xff]  ;;  %v5402_v33 = vld [vmem:[%s7513_s1 + $0x70] sm:$0xff]  }
  0x62   : > { %v473_v8 = vld [vmem:[#allocation2 + $0x151] sm:$0xff]  ;;  %v474_v9 = vld [vmem:[#allocation2 + $0x159] sm:$0xff]  ;;  %v5927_v10 = vpack.i.bf16 %v472_v7, %v471_v6  ;;  %v5404_v38 = vld [vmem:[%s7513_s1 + $0x68] sm:$0xff]  }
  0x63   : > { %v5931_v11 = vpack.i.bf16 %v474_v9, %v473_v8  ;;  %v475_v12 = vld [vmem:[#allocation2 + $0x169] sm:$0xff]  ;;  %v476_v13 = vld [vmem:[#allocation2 + $0x171] sm:$0xff]  ;;  %v486_v21 = vld [vmem:[#allocation2 + $0x3a] sm:$0xff] }
  0x64   : > { %4476 = vrot.lane.b32.xlu1 %v5901_v56, %s5616_s12  ;;  %v5935_v16 = vpack.i.bf16 %v476_v13, %v475_v12  ;;  %v5400_v22 = vld [vmem:[%s7513_s1 + $0x78] sm:$0xff]   ;;  %v4530_v32 = vpack.i.bf16 %v486_v21, %v485_v20  ;;  %v5403_v34 = vld [vmem:[%s7513_s1 + $0x30] sm:$0xff]   ;;  %v5405_v41 = vld [vmem:[%s7513_s1 + $0x28] sm:$0xff]   ;;  %v1393_v42 = vpack.c.bf16 %v486_v21, %v485_v20 }
  0x65   : > { %4481 = vrot.lane.b32.xlu0 %v5907_v57, %s5616_s12  ;;  %v5944_v24 = vld [vmem:[#allocation2 + $0x52] sm:$0xff]  ;;  %4050 = vmatprep.subr.bf16.mxu0 %v5400_v22  ;;  %v5406_v43 = vld [vmem:[%s7513_s1 + $0x60] sm:$0xff]   ;;  %v5987_v50 = vld [vmem:[#allocation2 + $0x48] sm:$0xff] }
  0x66   : > { %v5401_v31 = vld [vmem:[%s7513_s1 + $0x38] sm:$0xff]   ;;  %v4535_v35 = vpack.i.bf16 %v5944_v24, %v5942_v23  ;;  %v5961_v36 = vld [vmem:[#allocation2 + $0x30] sm:$0xff]  ;;  %4314 = vmatprep.mubr.msk.bf16.mxu1 %vm298_vm0, %v1393_v42  ;;  %v5982_v48 = vld [vmem:[#allocation2 + $0x20] sm:$0xff]  ;;  %v1396_v8 = vpack.c.bf16 %v5944_v24, %v5942_v23 }
  0x67   : > { %4051 = vmatpush3.bf16.msra.mxu0 %v5401_v31  ;;  %v5967_v40 = vld [vmem:[#allocation2 + $0x38] sm:$0xff]  ;;  %v5407_v49 = vld [vmem:[%s7513_s1 + $0x20] sm:$0xff]   ;;  %v5995_v53 = vld [vmem:[#allocation2 + $0x50] sm:$0xff] }
  0x68   : > { %4486 = vrot.lane.b32.xlu1 %v5911_v62, %s5616_s12  ;;  %4052 = vmatprep.subr.bf16.mxu0 %v5402_v33  ;;  %v4545_v45 = vpack.i.bf16 %v5967_v40, %v5961_v36  ;;  %v5978_v46 = vld [vmem:[#allocation2 + $0x18] sm:$0xff]  ;;  %v5410_v55 = vld [vmem:[%s7513_s1 + $0x50] sm:$0xff]   ;;  %v5413_v58 = vld [vmem:[%s7513_s1 + $0x88] sm:$0xff]   ;;  %v4565_v59 = vpack.i.bf16 %v5995_v53, %v5987_v50 }
  0x69   : > { %4491 = vrot.lane.b32.xlu0 %v5915_v63, %s5616_s12  ;;  %v5408_v51 = vld [vmem:[%s7513_s1 + $0x58] sm:$0xff]   ;;  %v4555_v52 = vpack.i.bf16 %v5982_v48, %v5978_v46  ;;  %4310 = vmatprep.subr.bf16.mxu1 %v5413_v58  ;;  %v5416_v60 = vld [vmem:[%s7513_s1 + $0x80] sm:$0xff]   ;;  %v6020_v0 = vld [vmem:[#allocation2 + $0x68] sm:$0xff] }
  0x6a   : > { %v5409_v54 = vld [vmem:[%s7513_s1 + $0x18] sm:$0xff]   ;;  %4311 = vmatpush3.bf16.msra.mxu1 %v5413_v58  ;;  %v6018_v61 = vld [vmem:[#allocation2 + $0x60] sm:$0xff]  ;;  %v5412_v1 = vld [vmem:[%s7513_s1 + $0x48] sm:$0xff]  }
  0x6b   : > { %4053 = vmatpush3.bf16.msra.mxu0 %v5403_v34  ;;  %v489_v2 = vld [vmem:[#allocation2 + $0x62] sm:$0xff]  ;;  %v490_v3 = vld [vmem:[#allocation2 + $0x6a] sm:$0xff]  ;;  %4312 = vmatprep.subr.bf16.mxu1 %v5416_v60  ;;  %v491_v15 = vld [vmem:[#allocation2 + $0x7a] sm:$0xff] }
  0x6c   : > { %4496 = vrot.lane.b32.xlu1 %v5919_v4, %s5616_s12  ;;  %4054 = vmatprep.subr.bf16.mxu0 %v5404_v38  ;;  %v5414_v6 = vld [vmem:[%s7513_s1 + $0x8] sm:$0xff]   ;;  %v5415_v7 = vld [vmem:[%s7513_s1 + $0x40] sm:$0xff]   ;;  %v1399_v13 = vpack.c.bf16 %v490_v3, %v489_v2  ;;  %v6052_v19 = vld [vmem:[#allocation2 + $0x78] sm:$0xff] }
  0x6d   : > { %4501 = vrot.lane.b32.xlu0 %v5923_v5, %s5616_s12  ;;  %v374_v9 = vld [vmem:[%s5765_s15 + $0xf0] sm:$0xff]  ;;  %v375_v12 = vld [vmem:[%s5765_s15 + $0xf8] sm:$0xff]  ;;  %v6064_v23 = vld [vmem:[#allocation2 + $0x90] sm:$0xff] }
  0x6e   : > { %4313 = vmatpush3.bf16.msra.mxu1 %v5416_v60  ;;  %407 = vst.msk [vmem:[#allocation2 + $0x181] sm:$0xff] %vm298_vm0, %v374_v9  ;;  %408 = vst.msk [vmem:[#allocation2 + $0x189] sm:$0xff] %vm298_vm0, %v375_v12  ;;  %v5417_v14 = vld [vmem:[%s7513_s1] sm:$0xff]   ;;  %v6066_v24 = vld [vmem:[#allocation2 + $0x98] sm:$0xff] }
  0x6f   : > { %4055 = vmatpush3.bf16.msra.mxu0 %v5405_v41  ;;  %v492_v17 = vld [vmem:[#allocation2 + $0x82] sm:$0xff]  ;;  %v493_v31 = vld [vmem:[#allocation2 + $0x92] sm:$0xff]  ;;  %v495_v33 = vld [vmem:[#allocation2 + $0xaa] sm:$0xff] }
  0x70   : > { %4506 = vrot.lane.b32.xlu1 %v5927_v10, %s5616_s12  ;;  %4056 = vmatprep.subr.bf16.mxu0 %v5406_v43  ;;  %v6054_v20 = vld [vmem:[#allocation2 + $0x80] sm:$0xff]  ;;  %v1402_v21 = vpack.c.bf16 %v492_v17, %v491_v15  ;;  %v496_v34 = vld [vmem:[#allocation2 + $0xb2] sm:$0xff] }
  0x71   : > { %4511 = vrot.lane.b32.xlu0 %v5931_v11, %s5616_s12  ;;  %4315 = vmatmul.mubr.msk.bf16.vlgmr.msra.gmra.mxu1 %vm298_vm0, %v1396_v8  ;;  %v4605_v22 = vpack.i.bf16 %v6054_v20, %v6052_v19  ;;  %v1408_v38 = vpack.c.bf16 %v496_v34, %v495_v33  ;;  %v6078_v41 = vld [vmem:[#allocation2 + $0xb0] sm:$0xff]  ;;  %v500_v58 = vld [vmem:[#allocation2 + $0xe2] sm:$0xff]  ;;  %v502_v9 = vld [vmem:[#allocation2 + $0xfa] sm:$0xff] }
  0x72   : > { %4318 = vmatprep.mubr.msk.bf16.mxu1 %vm298_vm0, %v1399_v13  ;;  %v6104_v60 = vld [vmem:[#allocation2 + $0xe0] sm:$0xff]  ;;  %v501_v8 = vld [vmem:[#allocation2 + $0xf2] sm:$0xff]  ;;  %v503_v13 = vld [vmem:[#allocation2 + $0x10a] sm:$0xff] }
  0x73   : > { %4057 = vmatpush3.bf16.msra.mxu0 %v5407_v49  ;;  %v6090_v49 = vld [vmem:[#allocation2 + $0xc0] sm:$0xff] }
  0x74   : > { %4516 = vrot.lane.b32.xlu1 %v5935_v16, %s5616_s12  ;;  %4058 = vmatprep.subr.bf16.mxu0 %v5408_v51  ;;  %v6092_v51 = vld [vmem:[#allocation2 + $0xc8] sm:$0xff] }
  0x75   : > { %4521 = vrot.lane.b32.xlu0 %v4520_v18, %s5617_s19  ;;  %v4600_v18 = vpack.i.bf16 %v490_v3, %v489_v2 }
  0x77   : > { %4059 = vmatpush3.bf16.msra.mxu0 %v5409_v54  ;;  %v498_v54 = vld [vmem:[#allocation2 + $0xca] sm:$0xff] }
  0x78   : > { %4526 = vrot.lane.b32.xlu1 %v4525_v25, %s5617_s19  ;;  %4060 = vmatprep.subr.bf16.mxu0 %v5410_v55  ;;  %v499_v55 = vld [vmem:[#allocation2 + $0xda] sm:$0xff] }
  0x79   : > { %4531 = vrot.lane.b32.xlu0 %v4530_v32, %s5617_s19  ;;  %4319 = vmatmul.mubr.msk.bf16.gmra.mxu1 %vm298_vm0, %v1402_v21  ;;  %v4720_v3 = vpack.i.bf16 %v500_v58, %v499_v55 }
  0x7c   : > { %4536 = vrot.lane.b32.xlu1 %v4535_v35, %s5617_s19 }
  0x7d   : > { %4541 = vrot.lane.b32.xlu0 %v4525_v25, %s5616_s12  ;;  %v4625_v25 = vpack.i.bf16 %v6066_v24, %v6064_v23 }
  0x80   : > { %4546 = vrot.lane.b32.xlu1 %v4545_v45, %s5617_s19 }
  0x81   : > { %4551 = vrot.lane.b32.xlu0 %v5864_v29, %s5618_s20  ;;  %v5411_v29 = vld [vmem:[%s7513_s1 + $0x10] sm:$0xff]  }
  0x82   : > { %4061 = vmatpush3.bf16.msra.mxu0 %v5411_v29  ;;  %v1414_v29 = vpack.c.bf16 %v500_v58, %v499_v55 }
  0x83   : > { %4062 = vmatprep.subr.bf16.mxu0 %v5412_v1 }
  0x84   : > { %4556 = vrot.lane.b32.xlu1 %v4555_v52, %s5618_s20  ;;  %v497_v52 = vld [vmem:[#allocation2 + $0xc2] sm:$0xff] }
  0x85   : > { %4561 = vrot.lane.b32.xlu0 %v4530_v32, %s5616_s12  ;;  %v494_v32 = vld [vmem:[#allocation2 + $0x9a] sm:$0xff]  ;;  %v4695_v1 = vpack.i.bf16 %v498_v54, %v497_v52 }
  0x86   : > { %4063 = vmatpush3.bf16.msra.mxu0 %v5414_v6  ;;  %v4645_v42 = vpack.i.bf16 %v494_v32, %v493_v31  ;;  %v6116_v6 = vld [vmem:[#allocation2 + $0xf0] sm:$0xff] }
  0x87   : > { %4064 = vmatprep.subr.bf16.mxu0 %v5415_v7  ;;  %7538 = vst [vmem:[#allocation10_spill] sm:$0xff] %v6116_v6  ;;  %v6118_v7 = vld [vmem:[#allocation2 + $0xf8] sm:$0xff] }
  0x88   : > { %4566 = vrot.lane.b32.xlu1 %v4565_v59, %s5617_s19  ;;  %7539 = vst [vmem:[#allocation11_spill] sm:$0xff] %v6118_v7 }
  0x89   : > { %4571 = vrot.lane.b32.xlu0 %v5876_v37, %s5618_s20  ;;  %v4585_v37 = vpack.i.bf16 %v6020_v0, %v6018_v61 }
  0x8a   : > { %4065 = vmatpush3.bf16.msra.mxu0 %v5417_v14  ;;  %v1417_v14 = vpack.c.bf16 %v502_v9, %v501_v8 }
  0x8c   : > { %4576 = vrot.lane.b32.xlu1 %v4545_v45, %s5618_s20  ;;  %v4670_v45 = vpack.i.bf16 %v496_v34, %v495_v33  ;;  %v433_v34 = vld [vmem:[#allocation2 + $0x120] sm:$0xff] }
  0x8d   : > { %4581 = vrot.lane.b32.xlu0 %v4535_v35, %s5616_s12  ;;  %v1405_v35 = vpack.c.bf16 %v494_v32, %v493_v31 }
  0x8f   : > { %4322 = vmatprep.mubr.msk.bf16.mxu1 %vm298_vm0, %v1405_v35  ;;  %v434_v35 = vld [vmem:[#allocation2 + $0x128] sm:$0xff] }
  0x90   : > { %4586 = vrot.lane.b32.xlu1 %v4585_v37, %s5617_s19  ;;  %4323 = vmatmul.mubr.msk.bf16.gmra.mxu1 %vm298_vm0, %v1408_v38 }
  0x91   : > { %4591 = vrot.lane.b32.xlu0 %v5879_v39, %s5618_s20  ;;  %v4620_v39 = vpack.i.bf16 %v492_v17, %v491_v15  ;;  %v431_v17 = vld [vmem:[#allocation2 + $0x108] sm:$0xff] }
  0x94   : > { %4596 = vrot.lane.b32.xlu1 %v4565_v59, %s5618_s20  ;;  %v1411_v59 = vpack.c.bf16 %v498_v54, %v497_v52  ;;  %v507_v52 = vld [vmem:[#allocation2 + $0x13a] sm:$0xff]  ;;  %v508_v54 = vld [vmem:[#allocation2 + $0x142] sm:$0xff] }
  0x95   : > { %4601 = vrot.lane.b32.xlu0 %v4600_v18, %s5616_s12 }
  0x96   : > { %4326 = vmatprep.mubr.msk.bf16.mxu1 %vm298_vm0, %v1411_v59 }
  0x98   : > { %4606 = vrot.lane.b32.xlu1 %v4605_v22, %s5617_s19  ;;  %4327 = vmatmul.mubr.msk.bf16.gmra.mxu1 %vm298_vm0, %v1414_v29 }
  0x99   : > { %4611 = vrot.lane.b32.xlu0 %v5883_v44, %s5618_s20  ;;  %v6076_v44 = vld [vmem:[#allocation2 + $0xa8] sm:$0xff]  ;;  %4330 = vmatprep.mubr.msk.bf16.mxu1 %vm298_vm0, %v1417_v14 }
  0x9a   : > { %v4650_v43 = vpack.i.bf16 %v6078_v41, %v6076_v44 }
  0x9c   : > { %4616 = vrot.lane.b32.xlu1 %v4585_v37, %s5618_s20  ;;  %v504_v37 = vld [vmem:[#allocation2 + $0x112] sm:$0xff] }
  0x9d   : > { %4621 = vrot.lane.b32.xlu0 %v4620_v39, %s5616_s12 }
  0xa0   : > { %4626 = vrot.lane.b32.xlu1 %v4625_v25, %s5617_s19 }
  0xa1   : > { %4631 = vrot.lane.b32.xlu0 %v4600_v18, %s5617_s19  ;;  %v432_v18 = vld [vmem:[#allocation2 + $0x110] sm:$0xff] }
  0xa4   : > { %4636 = vrot.lane.b32.xlu1 %v5887_v47, %s5618_s20  ;;  %v4675_v47 = vpack.i.bf16 %v6092_v51, %v6090_v49 }
  0xa5   : > { %4641 = vrot.lane.b32.xlu0 %v4605_v22, %s5618_s20  ;;  %v4745_v22 = vpack.i.bf16 %v502_v9, %v501_v8 }
  0xa8   : > { %4646 = vrot.lane.b32.xlu1 %v4645_v42, %s5616_s12 }
  0xa9   : > { %4651 = vrot.lane.b32.xlu0 %v4650_v43, %s5617_s19 }
  0xac   : > { %4656 = vrot.lane.b32.xlu1 %v4620_v39, %s5617_s19  ;;  %v4750_v39 = vpack.i.bf16 %v432_v18, %v431_v17  ;;  %v437_v17 = vld [vmem:[#allocation2 + $0x150] sm:$0xff]  ;;  %v438_v18 = vld [vmem:[#allocation2 + $0x158] sm:$0xff] }
  0xad   : > { %4661 = vrot.lane.b32.xlu0 %v5901_v56, %s5618_s20  ;;  %v6102_v56 = vld [vmem:[#allocation2 + $0xd8] sm:$0xff] }
  0xae   : > { %7537 = vst [vmem:[#allocation9_spill] sm:$0xff] %v6102_v56  ;;  %v4700_v2 = vpack.i.bf16 %v6104_v60, %v6102_v56 }
  0xb0   : > { %4666 = vrot.lane.b32.xlu1 %v4625_v25, %s5618_s20 }
  0xb1   : > { %4671 = vrot.lane.b32.xlu0 %v4670_v45, %s5616_s12 }
  0xb4   : > { %4676 = vrot.lane.b32.xlu1 %v4675_v47, %s5617_s19 }
  0xb5   : > { %4681 = vrot.lane.b32.xlu0 %v4645_v42, %s5617_s19 }
  0xb6   : > { %v6124_v12 = vpop.permute.xlu0 %4441 }
  0xb8   : > { %4686 = vrot.lane.b32.xlu1 %v5907_v57, %s5618_s20  ;;  %v4725_v57 = vpack.i.bf16 %v6118_v7, %v6116_v6 }
  0xb9   : > { %4691 = vrot.lane.b32.xlu0 %v4650_v43, %s5618_s20  ;;  %v4775_v43 = vpack.i.bf16 %v434_v35, %v433_v34  ;;  %v509_v34 = vld [vmem:[#allocation2 + $0x152] sm:$0xff]  ;;  %v510_v35 = vld [vmem:[#allocation2 + $0x15a] sm:$0xff] }
  0xbc   : > { %4696 = vrot.lane.b32.xlu1 %v4695_v1, %s5616_s12 }
  0xbd   : > { %4701 = vrot.lane.b32.xlu0 %v4700_v2, %s5617_s19 }
  0xc0   : > { %4706 = vrot.lane.b32.xlu1 %v4670_v45, %s5617_s19  ;;  %v505_v45 = vld [vmem:[#allocation2 + $0x122] sm:$0xff] }
  0xc1   : > { %4711 = vrot.lane.b32.xlu0 %v5911_v62, %s5618_s20  ;;  %v1420_v62 = vpack.c.bf16 %v504_v37, %v503_v13 }
  0xc3   : > { %4331 = vmatmul.mubr.msk.bf16.gmra.mxu1 %vm298_vm0, %v1420_v62 }
  0xc4   : > { %4716 = vrot.lane.b32.xlu1 %v4675_v47, %s5618_s20  ;;  %v506_v47 = vld [vmem:[#allocation2 + $0x12a] sm:$0xff] }
  0xc5   : > { %4721 = vrot.lane.b32.xlu0 %v4720_v3, %s5616_s12  ;;  %v1423_v55 = vpack.c.bf16 %v506_v47, %v505_v45 }
  0xc7   : > { %4334 = vmatprep.mubr.msk.bf16.mxu1 %vm298_vm0, %v1423_v55 }
  0xc8   : > { %4726 = vrot.lane.b32.xlu1 %v4725_v57, %s5617_s19 }
  0xc9   : > { %4731 = vrot.lane.b32.xlu0 %v4695_v1, %s5617_s19  ;;  %v436_v1 = vld [vmem:[#allocation2 + $0x140] sm:$0xff] }
  0xca   : > { %v6130_v15 = vpop.permute.xlu1 %4451 }
  0xcb   : > { %v6132_v21 = vpop.permute.xlu0 %4446 }
  0xcc   : > { %4736 = vrot.lane.b32.xlu1 %v5915_v63, %s5618_s20  ;;  %v4770_v63 = vpack.i.bf16 %v504_v37, %v503_v13 }
  0xcd   : > { %4741 = vrot.lane.b32.xlu0 %v4700_v2, %s5618_s20  ;;  %v435_v2 = vld [vmem:[#allocation2 + $0x138] sm:$0xff] }
  0xce   : > { %v6137_v25 = vpop.permute.xlu1 %4456  ;;  %v4800_v8 = vpack.i.bf16 %v436_v1, %v435_v2 }
  0xcf   : > { %v6139_v31 = vpop.permute.xlu0 %4461 }
  0xd0   : > { %4746 = vrot.lane.b32.xlu1 %v4745_v22, %s5616_s12 }
  0xd1   : > { %4751 = vrot.lane.b32.xlu0 %v4750_v39, %s5617_s19 }
  0xd2   : > { %v6143_v32 = vpop.permute.xlu1 %4466 }
  0xd3   : > { %v6145_v33 = vpop.permute.xlu0 %4471 }
  0xd4   : > { %4756 = vrot.lane.b32.xlu1 %v4720_v3, %s5617_s19 }
  0xd5   : > { %4761 = vrot.lane.b32.xlu0 %v5919_v4, %s5618_s20  ;;  %v1426_v4 = vpack.c.bf16 %v508_v54, %v507_v52 }
  0xd6   : > { %v6150_v38 = vpop.permute.xlu1 %4476 }
  0xd7   : > { %v6152_v42 = vpop.permute.xlu0 %4481  ;;  %4335 = vmatmul.mubr.msk.bf16.gmra.mxu1 %vm298_vm0, %v1426_v4  ;;  %v4444_v4 = vunpack.i.h.bf16 %v6124_v12 }
  0xd8   : > { %4766 = vrot.lane.b32.xlu1 %v4725_v57, %s5618_s20  ;;  %v4795_v57 = vpack.i.bf16 %v506_v47, %v505_v45  ;;  %v1429_v45 = vpack.c.bf16 %v510_v35, %v509_v34 }
  0xd9   : > { %4771 = vrot.lane.b32.xlu0 %v4770_v63, %s5616_s12 }
  0xda   : > { %v6156_v58 = vpop.permute.xlu1 %4486  ;;  %4338 = vmatprep.mubr.msk.bf16.mxu1 %vm298_vm0, %v1429_v45  ;;  %v4443_v45 = vunpack.i.l.bf16 %v6124_v12 }
  0xdb   : > { %v6158_v59 = vpop.permute.xlu0 %4491 }
  0xdc   : > { %7540 = vst [vmem:[#allocation12_spill] sm:$0xff] %v6158_v59  ;;  %4776 = vrot.lane.b32.xlu1 %v4775_v43, %s5617_s19 }
  0xdd   : > { %4781 = vrot.lane.b32.xlu0 %v4745_v22, %s5617_s19 }
  0xde   : > { %v6164_v29 = vpop.permute.xlu1 %4496 }
  0xdf   : > { %7541 = vst [vmem:[#allocation13_spill] sm:$0xff] %v6164_v29  ;;  %v6166_v3 = vpop.permute.xlu0 %4501 }
  0xe0   : > { %7542 = vst [vmem:[#allocation14_spill] sm:$0xff] %v6166_v3  ;;  %4786 = vrot.lane.b32.xlu1 %v5923_v5, %s5618_s20  ;;  %v6184_v5 = vpack.i.bf16 %v508_v54, %v507_v52  ;;  %v439_v3 = vld [vmem:[#allocation2 + $0x168] sm:$0xff] }
  0xe1   : > { %4791 = vrot.lane.b32.xlu0 %v4750_v39, %s5618_s20  ;;  %v6191_v39 = vpack.i.bf16 %v438_v18, %v437_v17  ;;  %v410_v18 = vld [vmem:[#allocation2 + $0x8] sm:$0xff] }
  0xe2   : > { %v6171_v9 = vpop.permute.xlu1 %4506 }
  0xe3   : > { %7543 = vst [vmem:[#allocation15_spill] sm:$0xff] %v6171_v9  ;;  %v6173_v13 = vpop.permute.xlu0 %4511  ;;  %v440_v9 = vld [vmem:[#allocation2 + $0x170] sm:$0xff] }
  0xe4   : > { %7544 = vst [vmem:[#allocation16_spill] sm:$0xff] %v6173_v13  ;;  %4796 = vrot.lane.b32.xlu1 %v4795_v57, %s5616_s12 }
  0xe5   : > { %4801 = vrot.lane.b32.xlu0 %v4800_v8, %s5617_s19 }
  0xe6   : > { %v6177_v37 = vpop.permute.xlu1 %4516 }
  0xe7   : > { %7545 = vst [vmem:[#allocation17_spill] sm:$0xff] %v6177_v37  ;;  %v6179_v14 = vpop.permute.xlu0 %4521 }
  0xe8   : > { %4806 = vrot.lane.b32.xlu1 %v4770_v63, %s5617_s19  ;;  %v6195_v63 = vld [vmem:[#allocation2 + $0x16a] sm:$0xff]  ;;  %v4524_v29 = vunpack.i.h.bf16 %v6179_v14  ;;  %v4523_v6 = vunpack.i.l.bf16 %v6179_v14 }
  0xe9   : > { %4811 = vrot.lane.b32.xlu0 %v5927_v10, %s5618_s20  ;;  %v6197_v10 = vld [vmem:[#allocation2 + $0x172] sm:$0xff] }
  0xea   : > { %v6186_v62 = vpop.permute.xlu1 %4526  ;;  %v1432_v52 = vpack.c.bf16 %v6197_v10, %v6195_v63 }
  0xeb   : > { %v6188_v22 = vpop.permute.xlu0 %4531 }
  0xec   : > { %4816 = vrot.lane.b32.xlu1 %v4775_v43, %s5618_s20  ;;  %4339 = vmatmul.mubr.msk.bf16.gmra.mxu1 %vm298_vm0, %v1432_v52  ;;  %v6214_v52 = vpack.i.bf16 %v510_v35, %v509_v34  ;;  %v1198_v35 = vsel %vm298_vm0, %v410_v18, %v4444_v4 }
  0xed   : > { %4821 = vrot.lane.b32.xlu0 %v6184_v5, %s5616_s12 }
  0xee   : > { %v6199_v47 = vpop.permute.xlu1 %4536 }
  0xef   : > { %v4542_v54 = vpop.permute.xlu0 %4541 }
  0xf0   : > { %v4544_v43 = vunpack.i.h.bf16 %v4542_v54  ;;  %v4543_v55 = vunpack.i.l.bf16 %v4542_v54  ;;  %4826 = vrot.lane.b32.xlu1 %v6191_v39, %s5617_s19 }
  0xf1   : > { %4831 = vrot.lane.b32.xlu0 %v4795_v57, %s5617_s19  ;;  %v409_v57 = vld [vmem:[#allocation2] sm:$0xff] }
  0xf2   : > { %v4547_v1 = vpop.permute.xlu1 %4546  ;;  %v1295_v2 = vsel %vm298_vm0, %v5857_v28, %v4543_v55  ;;  %v1296_v17 = vsel %vm298_vm0, %v5866_v30, %v4544_v43  ;;  %v6221_v30 = vpack.i.bf16 %v440_v9, %v439_v3 }
  0xf3   : > { %v4549_v54 = vunpack.i.h.bf16 %v4547_v1  ;;  %v4548_v37 = vunpack.i.l.bf16 %v4547_v1  ;;  %v4552_v13 = vpop.permute.xlu0 %4551 }
  0xf4   : > { %v4554_v7 = vunpack.i.h.bf16 %v4552_v13  ;;  %v4553_v28 = vunpack.i.l.bf16 %v4552_v13  ;;  %4836 = vrot.lane.b32.xlu1 %v5931_v11, %s5618_s20  ;;  %v1197_v13 = vsel %vm298_vm0, %v409_v57, %v4443_v45 }
  0xf5   : > { %4841 = vrot.lane.b32.xlu0 %v4800_v8, %s5618_s20  ;;  %v1327_v12 = vsel %vm1229_vm3, %v1295_v2, %v4548_v37  ;;  %v1328_v34 = vsel %vm1229_vm3, %v1296_v17, %v4549_v54  ;;  %v1230_v9 = vsel %vm1229_vm3, %v1197_v13, %v4523_v6  ;;  %v1231_v37 = vsel %vm1229_vm3, %v1198_v35, %v4524_v29 }
  0xf6   : > { %v4557_v43 = vpop.permute.xlu1 %4556  ;;  %v1359_v55 = vsel %vm1262_vm4, %v1327_v12, %v4553_v28  ;;  %v1360_v14 = vsel %vm1262_vm4, %v1328_v34, %v4554_v7  ;;  %v4449_v2 = vunpack.i.h.bf16 %v6132_v21  ;;  %v4448_v29 = vunpack.i.l.bf16 %v6132_v21  ;;  %v442_v12 = vld [vmem:[#allocation2 + $0x188] sm:$0xff] }
  0xf7   : > { %v4559_v1 = vunpack.i.h.bf16 %v4557_v43  ;;  %v4558_v59 = vunpack.i.l.bf16 %v4557_v43  ;;  %v4562_v11 = vpop.permute.xlu0 %4561  ;;  %v1392_v56 = vpack.c.bf16 %v1360_v14, %v1359_v55  ;;  %v4528_v34 = vunpack.i.l.bf16 %v6186_v62 }
  0xf8   : > { %v4564_v8 = vunpack.i.h.bf16 %v4562_v11  ;;  %v4563_v3 = vunpack.i.l.bf16 %v4562_v11  ;;  %4846 = vrot.lane.b32.xlu1 %v6214_v52, %s5616_s12 }
  0xf9   : > { %4851 = vrot.lane.b32.xlu0 %v6221_v30, %s5617_s19  ;;  %1663 = vmatprep.mubr.bf16.mxu0 %v1392_v56  ;;  %v1263_v7 = vsel %vm1262_vm4, %v1230_v9, %v4558_v59  ;;  %v1264_v4 = vsel %vm1262_vm4, %v1231_v37, %v4559_v1  ;;  %v441_v56 = vld [vmem:[#allocation2 + $0x180] sm:$0xff]  ;;  %v4529_v59 = vunpack.i.h.bf16 %v6186_v62  ;;  %v1200_v62 = vsel %vm298_vm0, %v5982_v48, %v4449_v2 }
  0xfa   : > { %v1298_v17 = vsel %vm298_vm0, %v5855_v27, %v4564_v8  ;;  %v1297_v18 = vsel %vm298_vm0, %v5853_v26, %v4563_v3  ;;  %v4567_v45 = vpop.permute.xlu1 %4566  ;;  %v1391_v6 = vpack.c.bf16 %v1264_v4, %v1263_v7  ;;  %v6251_v26 = vpack.i.bf16 %v6197_v10, %v6195_v63  ;;  %v6263_v8 = vld [vmem:[#allocation2 + $0x181] sm:$0xff]  ;;  %v6269_v7 = vld [vmem:[#allocation2 + $0x189] sm:$0xff] }
  0xfb   : > { %v4569_v54 = vunpack.i.h.bf16 %v4567_v45  ;;  %v4568_v57 = vunpack.i.l.bf16 %v4567_v45  ;;  %v4572_v28 = vpop.permute.xlu0 %4571  ;;  %v6259_v13 = vpack.i.bf16 %v442_v12, %v441_v56  ;;  %v1233_v37 = vsel %vm1229_vm3, %v1200_v62, %v4529_v59  ;;  %v6271_v4 = vld [vmem:[#allocation2 + $0x182] sm:$0xff]  ;;  %v515_v45 = vld [vmem:[#allocation2 + $0x19a] sm:$0xff] }
  0xfc   : > { %v4574_v35 = vunpack.i.h.bf16 %v4572_v28  ;;  %v4573_v43 = vunpack.i.l.bf16 %v4572_v28  ;;  %4856 = vrot.lane.b32.xlu1 %v6184_v5, %s5617_s19  ;;  %1664 = vmatmul.mubr.bf16.vlgmr.msra.gmra.mxu0 %v1391_v6  ;;  %v4453_v2 = vunpack.i.l.bf16 %v6130_v15  ;;  %v516_v6 = vld [vmem:[#allocation2 + $0x1a2] sm:$0xff]  ;;  %v4534_v62 = vunpack.i.h.bf16 %v6188_v22 }
  0xfd   : > { %4861 = vrot.lane.b32.xlu0 %v5935_v16, %s5618_s20  ;;  %v1329_v27 = vsel %vm1229_vm3, %v1297_v18, %v4568_v57  ;;  %v1330_v21 = vsel %vm1229_vm3, %v1298_v17, %v4569_v54  ;;  %v1199_v16 = vsel %vm298_vm0, %v5978_v46, %v4448_v29  ;;  %v6273_v46 = vld [vmem:[#allocation2 + $0x18a] sm:$0xff]  ;;  %v1438_v59 = vpack.c.bf16 %v516_v6, %v515_v45 }
  0xfe   : > { %v4577_v55 = vpop.permute.xlu1 %4576  ;;  %v1361_v14 = vsel %vm1262_vm4, %v1329_v27, %v4573_v43  ;;  %v1362_v5 = vsel %vm1262_vm4, %v1330_v21, %v4574_v35  ;;  %v1232_v48 = vsel %vm1229_vm3, %v1199_v16, %v4528_v34  ;;  %v1435_v18 = vpack.c.bf16 %v6273_v46, %v6271_v4  ;;  %v5436_v29 = vld [vmem:[#allocation2 + $0x51] sm:$0xff]  ;;  %v5437_v57 = vld [vmem:[#allocation2 + $0x49] sm:$0xff] }
  0xff   : > { %v4579_v1 = vunpack.i.h.bf16 %v4577_v55  ;;  %v4578_v63 = vunpack.i.l.bf16 %v4577_v55  ;;  %v4582_v10 = vpop.permute.xlu0 %4581  ;;  %v1395_v11 = vpack.c.bf16 %v1362_v5, %v1361_v14  ;;  %v4454_v34 = vunpack.i.h.bf16 %v6130_v15 }
 0x100   : > { %v4584_v3 = vunpack.i.h.bf16 %v4582_v10  ;;  %v4583_v9 = vunpack.i.l.bf16 %v4582_v10  ;;  %4866 = vrot.lane.b32.xlu1 %v6191_v39, %s5618_s20  ;;  %v4885_v21 = vpack.i.bf16 %v6269_v7, %v6263_v8  ;;  %4342 = vmatprep.mubr.msk.bf16.mxu1 %vm298_vm0, %v1435_v18  ;;  %v4533_v55 = vunpack.i.l.bf16 %v6188_v22 }
 0x101   : > { %4871 = vrot.lane.b32.xlu0 %v6251_v26, %s5616_s12  ;;  %1671 = vmatprep.mubr.bf16.mxu0 %v1395_v11  ;;  %v1265_v17 = vsel %vm1262_vm4, %v1232_v48, %v4578_v63  ;;  %v1266_v39 = vsel %vm1262_vm4, %v1233_v37, %v4579_v1  ;;  %v1201_v1 = vsel %vm298_vm0, %v5961_v36, %v4453_v2  ;;  %v4459_v6 = vunpack.i.h.bf16 %v6137_v25 }
 0x102   : > { %v1300_v54 = vsel %vm298_vm0, %v5436_v29, %v4584_v3  ;;  %v1299_v28 = vsel %vm298_vm0, %v5437_v57, %v4583_v9  ;;  %v4587_v56 = vpop.permute.xlu1 %4586  ;;  %v1394_v12 = vpack.c.bf16 %v1266_v39, %v1265_v17  ;;  %4343 = vmatmul.mubr.msk.bf16.gmra.mxu1 %vm298_vm0, %v1438_v59  ;;  %v4895_v11 = vpack.i.bf16 %v6273_v46, %v6271_v4  ;;  %v443_v3 = vld [vmem:[#allocation2 + $0x198] sm:$0xff]  ;;  %v444_v9 = vld [vmem:[#allocation2 + $0x1a0] sm:$0xff]  ;;  %v5438_v29 = vld [vmem:[#allocation2 + $0x69] sm:$0xff] }
 0x103   : > { %v4589_v35 = vunpack.i.h.bf16 %v4587_v56  ;;  %v4588_v43 = vunpack.i.l.bf16 %v4587_v56  ;;  %v4592_v27 = vpop.permute.xlu0 %4591  ;;  %v1234_v36 = vsel %vm1229_vm3, %v1201_v1, %v4533_v55  ;;  %v4900_v46 = vpack.i.bf16 %v444_v9, %v443_v3  ;;  %v5439_v57 = vld [vmem:[#allocation2 + $0x61] sm:$0xff]  ;;  %v479_v59 = vld [vmem:[#allocation2 + $0x199] sm:$0xff] }
 0x104   : > { %v4594_v14 = vunpack.i.h.bf16 %v4592_v27  ;;  %v4593_v5 = vunpack.i.l.bf16 %v4592_v27  ;;  %4876 = vrot.lane.b32.xlu1 %v6259_v13, %s5617_s19  ;;  %1672 = vmatmul.mubr.bf16.gmra.mxu0 %v1394_v12 }
 0x105   : > { %4881 = vrot.lane.b32.xlu0 %v6214_v52, %s5617_s19  ;;  %v1331_v15 = vsel %vm1229_vm3, %v1299_v28, %v4588_v43  ;;  %v1332_v16 = vsel %vm1229_vm3, %v1300_v54, %v4589_v35  ;;  %v1202_v52 = vsel %vm298_vm0, %v5967_v40, %v4454_v34  ;;  %v480_v34 = vld [vmem:[#allocation2 + $0x1a1] sm:$0xff] }
 0x106   : > { %v4597_v63 = vpop.permute.xlu1 %4596  ;;  %v1363_v22 = vsel %vm1262_vm4, %v1331_v15, %v4593_v5  ;;  %v1364_v10 = vsel %vm1262_vm4, %v1332_v16, %v4594_v14  ;;  %v1235_v2 = vsel %vm1229_vm3, %v1202_v52, %v4534_v62  ;;  %v4538_v62 = vunpack.i.l.bf16 %v6199_v47 }
 0x107   : > { %v4599_v48 = vunpack.i.h.bf16 %v4597_v63  ;;  %v4598_v37 = vunpack.i.l.bf16 %v4597_v63  ;;  %v4602_v17 = vpop.permute.xlu0 %4601  ;;  %v1398_v39 = vpack.c.bf16 %v1364_v10, %v1363_v22  ;;  %v4910_v5 = vpack.i.bf16 %v480_v34, %v479_v59 }
 0x108   : > { %v4604_v18 = vunpack.i.h.bf16 %v4602_v17  ;;  %v4603_v45 = vunpack.i.l.bf16 %v4602_v17  ;;  %4886 = vrot.lane.b32.xlu1 %v4885_v21, %s5618_s20  ;;  %v4539_v21 = vunpack.i.h.bf16 %v6199_v47 }
 0x109   : > { %4891 = vrot.lane.b32.xlu0 %v6221_v30, %s5618_s20  ;;  %1679 = vmatprep.mubr.bf16.mxu0 %v1398_v39  ;;  %v1267_v4 = vsel %vm1262_vm4, %v1234_v36, %v4598_v37  ;;  %v1268_v40 = vsel %vm1262_vm4, %v1235_v2, %v4599_v48  ;;  %v4458_v30 = vunpack.i.l.bf16 %v6137_v25  ;;  %v1204_v25 = vsel %vm298_vm0, %v5995_v53, %v4459_v6  ;;  %v5441_v2 = vld [vmem:[#allocation2 + $0x79] sm:$0xff] }
 0x10a   : > { %v1302_v54 = vsel %vm298_vm0, %v5438_v29, %v4604_v18  ;;  %v1301_v28 = vsel %vm298_vm0, %v5439_v57, %v4603_v45  ;;  %v4607_v56 = vpop.permute.xlu1 %4606  ;;  %v1397_v12 = vpack.c.bf16 %v1268_v40, %v1267_v4  ;;  %v1237_v53 = vsel %vm1229_vm3, %v1204_v25, %v4539_v21  ;;  %v5440_v45 = vld [vmem:[#allocation2 + $0x81] sm:$0xff] }
 0x10b   : > { %v4609_v35 = vunpack.i.h.bf16 %v4607_v56  ;;  %v4608_v43 = vunpack.i.l.bf16 %v4607_v56  ;;  %v4612_v27 = vpop.permute.xlu0 %4611  ;;  %v1203_v22 = vsel %vm298_vm0, %v5987_v50, %v4458_v30  ;;  %v4464_v29 = vunpack.i.h.bf16 %v6139_v31 }
 0x10c   : > { %v4614_v55 = vunpack.i.h.bf16 %v4612_v27  ;;  %v4613_v14 = vunpack.i.l.bf16 %v4612_v27  ;;  %4896 = vrot.lane.b32.xlu1 %v4895_v11, %s5616_s12  ;;  %1680 = vmatmul.mubr.bf16.gmra.mxu0 %v1397_v12  ;;  %v1236_v37 = vsel %vm1229_vm3, %v1203_v22, %v4538_v62  ;;  %v5442_v22 = vld [vmem:[#allocation2 + $0x99] sm:$0xff] }
 0x10d   : > { %4901 = vrot.lane.b32.xlu0 %v4900_v46, %s5617_s19  ;;  %v1333_v15 = vsel %vm1229_vm3, %v1301_v28, %v4608_v43  ;;  %v1334_v16 = vsel %vm1229_vm3, %v1302_v54, %v4609_v35  ;;  %v4463_v54 = vunpack.i.l.bf16 %v6139_v31  ;;  %v1206_v43 = vsel %vm298_vm0, %v6020_v0, %v4464_v29 }
 0x10e   : > { %v4617_v1 = vpop.permute.xlu1 %4616  ;;  %v1365_v63 = vsel %vm1262_vm4, %v1333_v15, %v4613_v14  ;;  %v1366_v47 = vsel %vm1262_vm4, %v1334_v16, %v4614_v55 }
 0x10f   : > { %v4619_v10 = vunpack.i.h.bf16 %v4617_v1  ;;  %v4618_v11 = vunpack.i.l.bf16 %v4617_v1  ;;  %v4622_v3 = vpop.permute.xlu0 %4621  ;;  %v1401_v9 = vpack.c.bf16 %v1366_v47, %v1365_v63  ;;  %v1205_v31 = vsel %vm298_vm0, %v6018_v61, %v4463_v54 }
 0x110   : > { %v4624_v52 = vunpack.i.h.bf16 %v4622_v3  ;;  %v4623_v48 = vunpack.i.l.bf16 %v4622_v3  ;;  %4906 = vrot.lane.b32.xlu1 %v6251_v26, %s5617_s19 }
 0x111   : > { %4911 = vrot.lane.b32.xlu0 %v4910_v5, %s5618_s20  ;;  %1687 = vmatprep.mubr.bf16.mxu0 %v1401_v9  ;;  %v1269_v17 = vsel %vm1262_vm4, %v1236_v37, %v4618_v11  ;;  %v1270_v50 = vsel %vm1262_vm4, %v1237_v53, %v4619_v10  ;;  %v5443_v11 = vld [vmem:[#allocation2 + $0x91] sm:$0xff]  ;;  %v4469_v9 = vunpack.i.h.bf16 %v6143_v32 }
 0x112   : > { %v4627_v39 = vpop.permute.xlu1 %4626  ;;  %v1400_v18 = vpack.c.bf16 %v1270_v50, %v1269_v17  ;;  %v1304_v36 = vsel %vm298_vm0, %v5440_v45, %v4624_v52  ;;  %v1303_v4 = vsel %vm298_vm0, %v5441_v2, %v4623_v48  ;;  %v4468_v48 = vunpack.i.l.bf16 %v6143_v32 }
 0x113   : > { %v4629_v26 = vunpack.i.h.bf16 %v4627_v39  ;;  %v4628_v40 = vunpack.i.l.bf16 %v4627_v39  ;;  %v4632_v6 = vpop.permute.xlu0 %4631 }
 0x114   : > { %4916 = vrot.lane.b32.xlu1 %v6259_v13, %s5618_s20  ;;  %1688 = vmatmul.mubr.bf16.gmra.mxu0 %v1400_v18  ;;  %v4634_v57 = vunpack.i.h.bf16 %v4632_v6  ;;  %v4633_v28 = vunpack.i.l.bf16 %v4632_v6  ;;  %v1207_v32 = vsel %vm298_vm0, %v6052_v19, %v4468_v48 }
 0x115   : > { %4931 = vrot.lane.b32.xlu0 %v4900_v46, %s5617_s19  ;;  %v1335_v12 = vsel %vm1229_vm3, %v1303_v4, %v4628_v40  ;;  %v1336_v59 = vsel %vm1229_vm3, %v1304_v36, %v4629_v26  ;;  %v1208_v36 = vsel %vm298_vm0, %v6054_v20, %v4469_v9 }
 0x116   : > { %v4637_v56 = vpop.permute.xlu1 %4636  ;;  %v1238_v62 = vsel %vm1229_vm3, %v1205_v31, %v4633_v28  ;;  %v1239_v55 = vsel %vm1229_vm3, %v1206_v43, %v4634_v57  ;;  %v5445_v43 = vld [vmem:[#allocation2 + $0xa9] sm:$0xff] }
 0x117   : > { %v4639_v34 = vunpack.i.h.bf16 %v4637_v56  ;;  %v4638_v30 = vunpack.i.l.bf16 %v4637_v56  ;;  %v4642_v35 = vpop.permute.xlu0 %4641 }
 0x118   : > { %v4644_v13 = vunpack.i.h.bf16 %v4642_v35  ;;  %v4643_v27 = vunpack.i.l.bf16 %v4642_v35  ;;  %v5444_v35 = vld [vmem:[#allocation2 + $0xb1] sm:$0xff] }
 0x119   : > { %v1367_v21 = vsel %vm1262_vm4, %v1335_v12, %v4638_v30  ;;  %v1368_v46 = vsel %vm1262_vm4, %v1336_v59, %v4639_v34 }
 0x11a   : > { %v4647_v14 = vpop.permute.xlu1 %4646  ;;  %v1404_v5 = vpack.c.bf16 %v1368_v46, %v1367_v21  ;;  %v1271_v15 = vsel %vm1262_vm4, %v1238_v62, %v4643_v27  ;;  %v1272_v16 = vsel %vm1262_vm4, %v1239_v55, %v4644_v13  ;;  %v4474_v46 = vunpack.i.h.bf16 %v6145_v33 }
 0x11b   : > { %v4649_v0 = vunpack.i.h.bf16 %v4647_v14  ;;  %v4648_v25 = vunpack.i.l.bf16 %v4647_v14  ;;  %v4652_v1 = vpop.permute.xlu0 %4651  ;;  %v1403_v61 = vpack.c.bf16 %v1272_v16, %v1271_v15  ;;  %v4473_v62 = vunpack.i.l.bf16 %v6145_v33 }
 0x11c   : > { %v4654_v63 = vunpack.i.h.bf16 %v4652_v1  ;;  %v4653_v47 = vunpack.i.l.bf16 %v4652_v1  ;;  %1695 = vmatprep.mubr.bf16.mxu0 %v1404_v5 }
 0x11d   : > { %v1306_v10 = vsel %vm298_vm0, %v5442_v22, %v4649_v0  ;;  %v1305_v3 = vsel %vm298_vm0, %v5443_v11, %v4648_v25  ;;  %1696 = vmatmul.mubr.bf16.gmra.mxu0 %v1403_v61  ;;  %v1210_v61 = vsel %vm298_vm0, %v6066_v24, %v4474_v46 }
 0x11e   : > { %v4657_v52 = vpop.permute.xlu1 %4656  ;;  %v1337_v53 = vsel %vm1229_vm3, %v1305_v3, %v4653_v47  ;;  %v1338_v17 = vsel %vm1229_vm3, %v1306_v10, %v4654_v63  ;;  %v1209_v63 = vsel %vm298_vm0, %v6064_v23, %v4473_v62 }
 0x11f   : > { %v4662_v37 = vpop.permute.xlu0 %4661  ;;  %v4659_v50 = vunpack.i.h.bf16 %v4657_v52  ;;  %v4658_v39 = vunpack.i.l.bf16 %v4657_v52 }
 0x120   : > { %v4664_v18 = vunpack.i.h.bf16 %v4662_v37  ;;  %v4663_v45 = vunpack.i.l.bf16 %v4662_v37 }
 0x121   : > { %v1240_v56 = vsel %vm1229_vm3, %v1207_v32, %v4658_v39  ;;  %v1241_v12 = vsel %vm1229_vm3, %v1208_v36, %v4659_v50  ;;  %v5447_v36 = vld [vmem:[#allocation2 + $0xc1] sm:$0xff]  ;;  %v4478_v32 = vunpack.i.l.bf16 %v6150_v38 }
 0x122   : > { %v4667_v2 = vpop.permute.xlu1 %4666  ;;  %v1369_v4 = vsel %vm1262_vm4, %v1337_v53, %v4663_v45  ;;  %v1370_v26 = vsel %vm1262_vm4, %v1338_v17, %v4664_v18  ;;  %v5446_v18 = vld [vmem:[#allocation2 + $0xc9] sm:$0xff] }
 0x123   : > { %v4669_v40 = vunpack.i.h.bf16 %v4667_v2  ;;  %v4668_v6 = vunpack.i.l.bf16 %v4667_v2  ;;  %v4672_v29 = vpop.permute.xlu0 %4671  ;;  %v1407_v54 = vpack.c.bf16 %v1370_v26, %v1369_v4  ;;  %v4479_v4 = vunpack.i.h.bf16 %v6150_v38 }
 0x124   : > { %v4674_v57 = vunpack.i.h.bf16 %v4672_v29  ;;  %v4673_v28 = vunpack.i.l.bf16 %v4672_v29  ;;  %v1211_v38 = vsel %vm298_vm0, %v6076_v44, %v4478_v32  ;;  %v5450_v32 = vld [vmem:[#allocation2 + $0xf9] sm:$0xff] }
 0x125   : > { %1703 = vmatprep.mubr.bf16.mxu0 %v1407_v54  ;;  %v1273_v20 = vsel %vm1262_vm4, %v1240_v56, %v4668_v6  ;;  %v1274_v59 = vsel %vm1262_vm4, %v1241_v12, %v4669_v40  ;;  %v1212_v12 = vsel %vm298_vm0, %v6078_v41, %v4479_v4 }
 0x126   : > { %v4677_v34 = vpop.permute.xlu1 %4676  ;;  %v1406_v30 = vpack.c.bf16 %v1274_v59, %v1273_v20  ;;  %v1308_v19 = vsel %vm298_vm0, %v5444_v35, %v4674_v57  ;;  %v1307_v31 = vsel %vm298_vm0, %v5445_v43, %v4673_v28 }
 0x127   : > { %v4679_v13 = vunpack.i.h.bf16 %v4677_v34  ;;  %v4678_v27 = vunpack.i.l.bf16 %v4677_v34  ;;  %v4682_v21 = vpop.permute.xlu0 %4681 }
 0x128   : > { %1704 = vmatmul.mubr.bf16.gmra.mxu0 %v1406_v30  ;;  %v4684_v55 = vunpack.i.h.bf16 %v4682_v21  ;;  %v4683_v14 = vunpack.i.l.bf16 %v4682_v21 }
 0x129   : > { %v1339_v15 = vsel %vm1229_vm3, %v1307_v31, %v4678_v27  ;;  %v1340_v16 = vsel %vm1229_vm3, %v1308_v19, %v4679_v13 }
 0x12a   : > { %v4687_v5 = vpop.permute.xlu1 %4686  ;;  %v1242_v11 = vsel %vm1229_vm3, %v1209_v63, %v4683_v14  ;;  %v1243_v3 = vsel %vm1229_vm3, %v1210_v61, %v4684_v55  ;;  %v5448_v14 = vld [vmem:[#allocation2 + $0xe1] sm:$0xff]  ;;  %v4483_v61 = vunpack.i.l.bf16 %v6152_v42 }
 0x12b   : > { %v4689_v0 = vunpack.i.h.bf16 %v4687_v5  ;;  %v4688_v25 = vunpack.i.l.bf16 %v4687_v5  ;;  %v4692_v1 = vpop.permute.xlu0 %4691  ;;  %v5449_v5 = vld [vmem:[#allocation2 + $0xd9] sm:$0xff] }
 0x12c   : > { %v4694_v47 = vunpack.i.h.bf16 %v4692_v1  ;;  %v4693_v22 = vunpack.i.l.bf16 %v4692_v1  ;;  %v4484_v1 = vunpack.i.h.bf16 %v6152_v42 }
 0x12d   : > { %v1371_v33 = vsel %vm1262_vm4, %v1339_v15, %v4688_v25  ;;  %v1372_v10 = vsel %vm1262_vm4, %v1340_v16, %v4689_v0 }
 0x12e   : > { %v4697_v9 = vpop.permute.xlu1 %4696  ;;  %v1410_v52 = vpack.c.bf16 %v1372_v10, %v1371_v33  ;;  %v1275_v48 = vsel %vm1262_vm4, %v1242_v11, %v4693_v22  ;;  %v1276_v37 = vsel %vm1262_vm4, %v1243_v3, %v4694_v47 }
 0x12f   : > { %v4699_v24 = vunpack.i.h.bf16 %v4697_v9  ;;  %v4698_v53 = vunpack.i.l.bf16 %v4697_v9  ;;  %v4702_v17 = vpop.permute.xlu0 %4701  ;;  %v1409_v23 = vpack.c.bf16 %v1276_v37, %v1275_v48  ;;  %v1213_v48 = vsel %vm298_vm0, %v6090_v49, %v4483_v61  ;;  %v2196_v61 = vld [vmem:[#allocation2 + $0x9] sm:$0xff] }
 0x130   : > { %v4704_v50 = vunpack.i.h.bf16 %v4702_v17  ;;  %v4703_v39 = vunpack.i.l.bf16 %v4702_v17  ;;  %1711 = vmatprep.mubr.bf16.mxu0 %v1410_v52  ;;  %v1214_v52 = vsel %vm298_vm0, %v6092_v51, %v4484_v1  ;;  %v2195_v1 = vld [vmem:[#allocation2 + $0x1] sm:$0xff] }
 0x131   : > { %v1310_v45 = vsel %vm298_vm0, %v5446_v18, %v4699_v24  ;;  %v1309_v2 = vsel %vm298_vm0, %v5447_v36, %v4698_v53  ;;  %1712 = vmatmul.mubr.bf16.gmra.mxu0 %v1409_v23 }
 0x132   : > { %v4707_v26 = vpop.permute.xlu1 %4706  ;;  %v1341_v6 = vsel %vm1229_vm3, %v1309_v2, %v4703_v39  ;;  %v1342_v29 = vsel %vm1229_vm3, %v1310_v45, %v4704_v50 }
 0x133   : > { %v4712_v40 = vpop.permute.xlu0 %4711  ;;  %v4709_v54 = vunpack.i.h.bf16 %v4707_v26  ;;  %v4708_v57 = vunpack.i.l.bf16 %v4707_v26 }
 0x134   : > { %v4714_v28 = vunpack.i.h.bf16 %v4712_v40  ;;  %v4713_v56 = vunpack.i.l.bf16 %v4712_v40 }
 0x135   : > { %v1244_v27 = vsel %vm1229_vm3, %v1211_v38, %v4708_v57  ;;  %v1245_v21 = vsel %vm1229_vm3, %v1212_v12, %v4709_v54  ;;  %v4489_v54 = vunpack.i.h.bf16 %v6156_v58 }
 0x136   : > { %v4717_v20 = vpop.permute.xlu1 %4716  ;;  %v1373_v59 = vsel %vm1262_vm4, %v1341_v6, %v4713_v56  ;;  %v1374_v34 = vsel %vm1262_vm4, %v1342_v29, %v4714_v28  ;;  %v5451_v6 = vld [vmem:[#allocation2 + $0xf1] sm:$0xff]  ;;  %v4488_v28 = vunpack.i.l.bf16 %v6156_v58 }
 0x137   : > { %v4719_v30 = vunpack.i.h.bf16 %v4717_v20  ;;  %v4718_v35 = vunpack.i.l.bf16 %v4717_v20  ;;  %v4722_v19 = vpop.permute.xlu0 %4721  ;;  %v1413_v43 = vpack.c.bf16 %v1374_v34, %v1373_v59 }
 0x138   : > { %v4724_v31 = vunpack.i.h.bf16 %v4722_v19  ;;  %v4723_v13 = vunpack.i.l.bf16 %v4722_v19 }
 0x139   : > { %1719 = vmatprep.mubr.bf16.mxu0 %v1413_v43  ;;  %v1277_v41 = vsel %vm1262_vm4, %v1244_v27, %v4718_v35  ;;  %v1278_v46 = vsel %vm1262_vm4, %v1245_v21, %v4719_v30  ;;  %v1216_v35 = vsel %vm298_vm0, %v6104_v60, %v4489_v54 }
 0x13a   : > { %v4727_v62 = vpop.permute.xlu1 %4726  ;;  %v1412_v55 = vpack.c.bf16 %v1278_v46, %v1277_v41  ;;  %v1312_v44 = vsel %vm298_vm0, %v5448_v14, %v4724_v31  ;;  %v1311_v15 = vsel %vm298_vm0, %v5449_v5, %v4723_v13  ;;  %v7546_v13 = vld [vmem:[#allocation9_spill] sm:$0xff] }
 0x13b   : > { %v4729_v16 = vunpack.i.h.bf16 %v4727_v62  ;;  %v4728_v0 = vunpack.i.l.bf16 %v4727_v62  ;;  %v4732_v25 = vpop.permute.xlu0 %4731  ;;  %v1215_v58 = vsel %vm298_vm0, %v7546_v13, %v4488_v28  ;;  %v7550_v13 = vld [vmem:[#allocation13_spill] sm:$0xff] }
 0x13c   : > { %1720 = vmatmul.mubr.bf16.gmra.mxu0 %v1412_v55  ;;  %v4734_v63 = vunpack.i.h.bf16 %v4732_v25  ;;  %v4733_v47 = vunpack.i.l.bf16 %v4732_v25 }
 0x13d   : > { %v1343_v33 = vsel %vm1229_vm3, %v1311_v15, %v4728_v0  ;;  %v1344_v10 = vsel %vm1229_vm3, %v1312_v44, %v4729_v16  ;;  %v5452_v15 = vld [vmem:[#allocation2 + $0x111] sm:$0xff] }
 0x13e   : > { %v4737_v22 = vpop.permute.xlu1 %4736  ;;  %v1246_v17 = vsel %vm1229_vm3, %v1213_v48, %v4733_v47  ;;  %v1247_v23 = vsel %vm1229_vm3, %v1214_v52, %v4734_v63  ;;  %v5453_v63 = vld [vmem:[#allocation2 + $0x109] sm:$0xff] }
 0x13f   : > { %v4739_v11 = vunpack.i.h.bf16 %v4737_v22  ;;  %v4738_v3 = vunpack.i.l.bf16 %v4737_v22  ;;  %v4742_v9 = vpop.permute.xlu0 %4741 }
 0x140   : > { %v4744_v37 = vunpack.i.h.bf16 %v4742_v9  ;;  %v4743_v24 = vunpack.i.l.bf16 %v4742_v9 }
 0x141   : > { %v1375_v42 = vsel %vm1262_vm4, %v1343_v33, %v4738_v3  ;;  %v1376_v53 = vsel %vm1262_vm4, %v1344_v10, %v4739_v11  ;;  %v4920_v11 = vpack.i.bf16 %v2196_v61, %v2195_v1  ;;  %v7547_v3 = vld [vmem:[#allocation12_spill] sm:$0xff] }
 0x142   : > { %v4747_v50 = vpop.permute.xlu1 %4746  ;;  %v1416_v39 = vpack.c.bf16 %v1376_v53, %v1375_v42  ;;  %v1279_v18 = vsel %vm1262_vm4, %v1246_v17, %v4743_v24  ;;  %v1280_v45 = vsel %vm1262_vm4, %v1247_v23, %v4744_v37  ;;  %v4494_v9 = vunpack.i.h.bf16 %v7547_v3  ;;  %v2231_v17 = vld [vmem:[#allocation2 + $0x2] sm:$0xff]  ;;  %v2232_v23 = vld [vmem:[#allocation2 + $0xa] sm:$0xff] }
 0x143   : > { %v4749_v51 = vunpack.i.h.bf16 %v4747_v50  ;;  %v4748_v36 = vunpack.i.l.bf16 %v4747_v50  ;;  %v4752_v2 = vpop.permute.xlu0 %4751  ;;  %v1415_v49 = vpack.c.bf16 %v1280_v45, %v1279_v18  ;;  %v4493_v52 = vunpack.i.l.bf16 %v7547_v3  ;;  %4921 = vrot.lane.b32.xlu1 %v4920_v11, %s5616_s12  ;;  %v5457_v1 = vld [vmem:[#allocation2 + $0x108] sm:$0xff] }
 0x144   : > { %v4754_v4 = vunpack.i.h.bf16 %v4752_v2  ;;  %v4753_v26 = vunpack.i.l.bf16 %v4752_v2  ;;  %1727 = vmatprep.mubr.bf16.mxu0 %v1416_v39  ;;  %v4925_v45 = vpack.i.bf16 %v2232_v23, %v2231_v17  ;;  %v7549_v2 = vld [vmem:[#allocation10_spill] sm:$0xff] }
 0x145   : > { %v1314_v40 = vsel %vm298_vm0, %v5450_v32, %v4749_v51  ;;  %v1313_v29 = vsel %vm298_vm0, %v5451_v6, %v4748_v36  ;;  %1728 = vmatmul.mubr.bf16.gmra.mxu0 %v1415_v49  ;;  %v7548_v51 = vld [vmem:[#allocation11_spill] sm:$0xff]  ;;  %v1217_v49 = vsel %vm298_vm0, %v7549_v2, %v4493_v52  ;;  %v6467_v52 = vld [vmem:[%s7514_s2 + $0x88] sm:$0xff]  }
 0x146   : > { %v4757_v57 = vpop.permute.xlu1 %4756  ;;  %v1345_v12 = vsel %vm1229_vm3, %v1313_v29, %v4753_v26  ;;  %v1346_v20 = vsel %vm1229_vm3, %v1314_v40, %v4754_v4  ;;  %v1218_v36 = vsel %vm298_vm0, %v7548_v51, %v4494_v9  ;;  %4346 = vmatprep.subr.bf16.mxu0 %v6467_v52  ;;  %v5459_v23 = vld [vmem:[#allocation2 + $0x139] sm:$0xff] }
 0x147   : > { %v4762_v56 = vpop.permute.xlu0 %4761  ;;  %v4759_v59 = vunpack.i.h.bf16 %v4757_v57  ;;  %v4758_v34 = vunpack.i.l.bf16 %v4757_v57  ;;  %4926 = vrot.lane.b32.xlu1 %v4925_v45, %s5617_s19  ;;  %4347 = vmatpush3.bf16.msra.mxu0 %v6467_v52  ;;  %v7551_v51 = vld [vmem:[#allocation14_spill] sm:$0xff] }
 0x148   : > { %v4764_v38 = vunpack.i.h.bf16 %v4762_v56  ;;  %v4763_v30 = vunpack.i.l.bf16 %v4762_v56  ;;  %v4503_v2 = vunpack.i.l.bf16 %v7551_v51 }
 0x149   : > { %v1248_v14 = vsel %vm1229_vm3, %v1215_v58, %v4758_v34  ;;  %v1249_v44 = vsel %vm1229_vm3, %v1216_v35, %v4759_v59  ;;  %v5454_v35 = vld [vmem:[#allocation2 + $0x129] sm:$0xff]  ;;  %v4499_v58 = vunpack.i.h.bf16 %v7550_v13 }
 0x14a   : > { %v4767_v19 = vpop.permute.xlu1 %4766  ;;  %v1377_v43 = vsel %vm1262_vm4, %v1345_v12, %v4763_v30  ;;  %v1378_v31 = vsel %vm1262_vm4, %v1346_v20, %v4764_v38 }
 0x14b   : > { %v4769_v27 = vunpack.i.h.bf16 %v4767_v19  ;;  %v4768_v21 = vunpack.i.l.bf16 %v4767_v19  ;;  %v4772_v41 = vpop.permute.xlu0 %4771  ;;  %v1419_v46 = vpack.c.bf16 %v1378_v31, %v1377_v43  ;;  %v5455_v43 = vld [vmem:[#allocation2 + $0x121] sm:$0xff] }
 0x14c   : > { %v4774_v62 = vunpack.i.h.bf16 %v4772_v41  ;;  %v4773_v55 = vunpack.i.l.bf16 %v4772_v41 }
 0x14d   : > { %1735 = vmatprep.mubr.bf16.mxu0 %v1419_v46  ;;  %v1281_v60 = vsel %vm1262_vm4, %v1248_v14, %v4768_v21  ;;  %v1282_v5 = vsel %vm1262_vm4, %v1249_v44, %v4769_v27  ;;  %v4498_v21 = vunpack.i.l.bf16 %v7550_v13 }
 0x14e   : > { %v1316_v16 = vsel %vm298_vm0, %v5452_v15, %v4774_v62  ;;  %v4777_v0 = vpop.permute.xlu1 %4776  ;;  %v1418_v25 = vpack.c.bf16 %v1282_v5, %v1281_v60  ;;  %v1315_v47 = vsel %vm298_vm0, %v5453_v63, %v4773_v55  ;;  %v5456_v5 = vld [vmem:[#allocation2 + $0x110] sm:$0xff] }
 0x14f   : > { %v4779_v22 = vunpack.i.h.bf16 %v4777_v0  ;;  %v4778_v33 = vunpack.i.l.bf16 %v4777_v0  ;;  %v4782_v10 = vpop.permute.xlu0 %4781  ;;  %v1220_v15 = vsel %vm298_vm0, %v5456_v5, %v4499_v58  ;;  %v1219_v61 = vsel %vm298_vm0, %v5457_v1, %v4498_v21 }
 0x150   : > { %1736 = vmatmul.mubr.bf16.gmra.mxu0 %v1418_v25  ;;  %v4784_v48 = vunpack.i.h.bf16 %v4782_v10  ;;  %v4783_v37 = vunpack.i.l.bf16 %v4782_v10 }
 0x151   : > { %v1347_v42 = vsel %vm1229_vm3, %v1315_v47, %v4778_v33  ;;  %v1348_v53 = vsel %vm1229_vm3, %v1316_v16, %v4779_v22 }
 0x152   : > { %v4787_v24 = vpop.permute.xlu1 %4786  ;;  %v1250_v6 = vsel %vm1229_vm3, %v1217_v49, %v4783_v37  ;;  %v1251_v29 = vsel %vm1229_vm3, %v1218_v36, %v4784_v48  ;;  %v4504_v36 = vunpack.i.h.bf16 %v7551_v51  ;;  %v5419_v49 = vld [vmem:[%s7514_s2 + $0x80] sm:$0xff]  }
 0x153   : > { %v4789_v50 = vunpack.i.h.bf16 %v4787_v24  ;;  %v4788_v39 = vunpack.i.l.bf16 %v4787_v24  ;;  %v4792_v18 = vpop.permute.xlu0 %4791  ;;  %4348 = vmatprep.subr.bf16.mxu0 %v5419_v49 }
 0x154   : > { %v4794_v4 = vunpack.i.h.bf16 %v4792_v18  ;;  %v4793_v26 = vunpack.i.l.bf16 %v4792_v18  ;;  %4349 = vmatpush3.bf16.msra.mxu0 %v5419_v49 }
 0x155   : > { %v1379_v32 = vsel %vm1262_vm4, %v1347_v42, %v4788_v39  ;;  %v1380_v40 = vsel %vm1262_vm4, %v1348_v53, %v4789_v50  ;;  %v5458_v53 = vld [vmem:[#allocation2 + $0x141] sm:$0xff] }
 0x156   : > { %v4797_v54 = vpop.permute.xlu1 %4796  ;;  %v1422_v57 = vpack.c.bf16 %v1380_v40, %v1379_v32  ;;  %v1283_v28 = vsel %vm1262_vm4, %v1250_v6, %v4793_v26  ;;  %v1284_v56 = vsel %vm1262_vm4, %v1251_v29, %v4794_v4 }
 0x157   : > { %v4799_v12 = vunpack.i.h.bf16 %v4797_v54  ;;  %v4798_v20 = vunpack.i.l.bf16 %v4797_v54  ;;  %v4802_v59 = vpop.permute.xlu0 %4801  ;;  %v1421_v34 = vpack.c.bf16 %v1284_v56, %v1283_v28  ;;  %v5460_v28 = vld [vmem:[#allocation2 + $0x128] sm:$0xff] }
 0x158   : > { %v4804_v38 = vunpack.i.h.bf16 %v4802_v59  ;;  %v4803_v30 = vunpack.i.l.bf16 %v4802_v59  ;;  %1743 = vmatprep.mubr.bf16.mxu0 %v1422_v57  ;;  %v1222_v56 = vsel %vm298_vm0, %v5460_v28, %v4504_v36  ;;  %v7553_v28 = vld [vmem:[#allocation16_spill] sm:$0xff] }
 0x159   : > { %v1318_v19 = vsel %vm298_vm0, %v5454_v35, %v4799_v12  ;;  %v1317_v31 = vsel %vm298_vm0, %v5455_v43, %v4798_v20  ;;  %1744 = vmatmul.mubr.bf16.gmra.mxu0 %v1421_v34  ;;  %v5461_v12 = vld [vmem:[#allocation2 + $0x120] sm:$0xff] }
 0x15a   : > { %v4807_v27 = vpop.permute.xlu1 %4806  ;;  %v1349_v46 = vsel %vm1229_vm3, %v1317_v31, %v4803_v30  ;;  %v1350_v62 = vsel %vm1229_vm3, %v1318_v19, %v4804_v38  ;;  %v1221_v20 = vsel %vm298_vm0, %v5461_v12, %v4503_v2  ;;  %v4513_v12 = vunpack.i.l.bf16 %v7553_v28 }
 0x15b   : > { %v4812_v41 = vpop.permute.xlu0 %4811  ;;  %v4809_v55 = vunpack.i.h.bf16 %v4807_v27  ;;  %v4808_v14 = vunpack.i.l.bf16 %v4807_v27 }
 0x15c   : > { %v4814_v44 = vunpack.i.h.bf16 %v4812_v41  ;;  %v4813_v60 = vunpack.i.l.bf16 %v4812_v41 }
 0x15d   : > { %v1252_v3 = vsel %vm1229_vm3, %v1219_v61, %v4808_v14  ;;  %v1253_v9 = vsel %vm1229_vm3, %v1220_v15, %v4809_v55  ;;  %v5462_v14 = vld [vmem:[#allocation2 + $0x159] sm:$0xff] }
 0x15e   : > { %v4817_v16 = vpop.permute.xlu1 %4816  ;;  %v1381_v0 = vsel %vm1262_vm4, %v1349_v46, %v4813_v60  ;;  %v1382_v25 = vsel %vm1262_vm4, %v1350_v62, %v4814_v44  ;;  %v5463_v60 = vld [vmem:[#allocation2 + $0x151] sm:$0xff]  ;;  %v7552_v15 = vld [vmem:[#allocation15_spill] sm:$0xff] }
 0x15f   : > { %v4819_v63 = vunpack.i.h.bf16 %v4817_v16  ;;  %v4818_v47 = vunpack.i.l.bf16 %v4817_v16  ;;  %v4822_v22 = vpop.permute.xlu0 %4821  ;;  %v1425_v33 = vpack.c.bf16 %v1382_v25, %v1381_v0  ;;  %v4509_v16 = vunpack.i.h.bf16 %v7552_v15 }
 0x160   : > { %v4824_v10 = vunpack.i.h.bf16 %v4822_v22  ;;  %v4823_v11 = vunpack.i.l.bf16 %v4822_v22  ;;  %v4508_v25 = vunpack.i.l.bf16 %v7552_v15 }
 0x161   : > { %1751 = vmatprep.mubr.bf16.mxu0 %v1425_v33  ;;  %v1285_v48 = vsel %vm1262_vm4, %v1252_v3, %v4818_v47  ;;  %v1286_v37 = vsel %vm1262_vm4, %v1253_v9, %v4819_v63 }
 0x162   : > { %v4827_v24 = vpop.permute.xlu1 %4826  ;;  %v1424_v42 = vpack.c.bf16 %v1286_v37, %v1285_v48  ;;  %v1320_v17 = vsel %vm298_vm0, %v5458_v53, %v4824_v10  ;;  %v1319_v50 = vsel %vm298_vm0, %v5459_v23, %v4823_v11  ;;  %v5464_v11 = vld [vmem:[#allocation2 + $0x140] sm:$0xff] }
 0x163   : > { %v4829_v39 = vunpack.i.h.bf16 %v4827_v24  ;;  %v4828_v18 = vunpack.i.l.bf16 %v4827_v24  ;;  %v4832_v45 = vpop.permute.xlu0 %4831  ;;  %v1224_v3 = vsel %vm298_vm0, %v5464_v11, %v4509_v16  ;;  %v5465_v24 = vld [vmem:[#allocation2 + $0x138] sm:$0xff] }
 0x164   : > { %1752 = vmatmul.mubr.bf16.gmra.mxu0 %v1424_v42  ;;  %v4834_v4 = vunpack.i.h.bf16 %v4832_v45  ;;  %v4833_v26 = vunpack.i.l.bf16 %v4832_v45  ;;  %v1223_v42 = vsel %vm298_vm0, %v5465_v24, %v4508_v25 }
 0x165   : > { %v1351_v40 = vsel %vm1229_vm3, %v1319_v50, %v4828_v18  ;;  %v1352_v6 = vsel %vm1229_vm3, %v1320_v17, %v4829_v39 }
 0x166   : > { %v4837_v32 = vpop.permute.xlu1 %4836  ;;  %v1254_v35 = vsel %vm1229_vm3, %v1221_v20, %v4833_v26  ;;  %v1255_v19 = vsel %vm1229_vm3, %v1222_v56, %v4834_v4  ;;  %v5466_v26 = vld [vmem:[#allocation2 + $0x171] sm:$0xff]  ;;  %v4514_v56 = vunpack.i.h.bf16 %v7553_v28 }
 0x167   : > { %v4839_v29 = vunpack.i.h.bf16 %v4837_v32  ;;  %v4838_v54 = vunpack.i.l.bf16 %v4837_v32  ;;  %v4842_v57 = vpop.permute.xlu0 %4841  ;;  %v5420_v28 = vld [vmem:[%s7514_s2 + $0x78] sm:$0xff]  }
 0x168   : > { %v4844_v59 = vunpack.i.h.bf16 %v4842_v57  ;;  %v4843_v34 = vunpack.i.l.bf16 %v4842_v57  ;;  %4180 = vmatprep.subr.bf16.mxu1 %v5420_v28 }
 0x169   : > { %v1383_v38 = vsel %vm1262_vm4, %v1351_v40, %v4838_v54  ;;  %v1384_v30 = vsel %vm1262_vm4, %v1352_v6, %v4839_v29  ;;  %v5467_v40 = vld [vmem:[#allocation2 + $0x169] sm:$0xff] }
 0x16a   : > { %v4847_v43 = vpop.permute.xlu1 %4846  ;;  %v1428_v31 = vpack.c.bf16 %v1384_v30, %v1383_v38  ;;  %v1287_v13 = vsel %vm1262_vm4, %v1254_v35, %v4843_v34  ;;  %v1288_v58 = vsel %vm1262_vm4, %v1255_v19, %v4844_v59 }
 0x16b   : > { %v4849_v27 = vunpack.i.h.bf16 %v4847_v43  ;;  %v4848_v21 = vunpack.i.l.bf16 %v4847_v43  ;;  %v4852_v41 = vpop.permute.xlu0 %4851  ;;  %v1427_v46 = vpack.c.bf16 %v1288_v58, %v1287_v13  ;;  %v5469_v58 = vld [vmem:[#allocation2 + $0x150] sm:$0xff] }
 0x16c   : > { %v4854_v62 = vunpack.i.h.bf16 %v4852_v41  ;;  %v4853_v55 = vunpack.i.l.bf16 %v4852_v41  ;;  %1759 = vmatprep.mubr.bf16.mxu0 %v1428_v31  ;;  %v5468_v31 = vld [vmem:[#allocation2 + $0x158] sm:$0xff] }
 0x16d   : > { %v1322_v44 = vsel %vm298_vm0, %v5462_v14, %v4849_v27  ;;  %v1321_v5 = vsel %vm298_vm0, %v5463_v60, %v4848_v21  ;;  %1760 = vmatmul.mubr.bf16.gmra.mxu0 %v1427_v46  ;;  %v1226_v13 = vsel %vm298_vm0, %v5468_v31, %v4514_v56  ;;  %v1225_v27 = vsel %vm298_vm0, %v5469_v58, %v4513_v12  ;;  %v5421_v12 = vld [vmem:[%s7514_s2 + $0x38] sm:$0xff]  }
 0x16e   : > { %v4857_v0 = vpop.permute.xlu1 %4856  ;;  %v1353_v61 = vsel %vm1229_vm3, %v1321_v5, %v4853_v55  ;;  %v1354_v63 = vsel %vm1229_vm3, %v1322_v44, %v4854_v62  ;;  %4181 = vmatpush3.bf16.msra.mxu1 %v5421_v12 }
 0x16f   : > { %v4862_v1 = vpop.permute.xlu0 %4861  ;;  %v4859_v47 = vunpack.i.h.bf16 %v4857_v0  ;;  %v4858_v22 = vunpack.i.l.bf16 %v4857_v0 }
 0x170   : > { %v4864_v33 = vunpack.i.h.bf16 %v4862_v1  ;;  %v4863_v10 = vunpack.i.l.bf16 %v4862_v1 }
 0x171   : > { %v1256_v45 = vsel %vm1229_vm3, %v1223_v42, %v4858_v22  ;;  %v1257_v51 = vsel %vm1229_vm3, %v1224_v3, %v4859_v47 }
 0x172   : > { %v4867_v9 = vpop.permute.xlu1 %4866  ;;  %v1385_v48 = vsel %vm1262_vm4, %v1353_v61, %v4863_v10  ;;  %v1386_v37 = vsel %vm1262_vm4, %v1354_v63, %v4864_v33  ;;  %v7554_v33 = vld [vmem:[#allocation17_spill] sm:$0xff] }
 0x173   : > { %v4869_v53 = vunpack.i.h.bf16 %v4867_v9  ;;  %v4868_v17 = vunpack.i.l.bf16 %v4867_v9  ;;  %v4872_v23 = vpop.permute.xlu0 %4871  ;;  %v1431_v50 = vpack.c.bf16 %v1386_v37, %v1385_v48  ;;  %v4519_v10 = vunpack.i.h.bf16 %v7554_v33 }
 0x174   : > { %v4874_v39 = vunpack.i.h.bf16 %v4872_v23  ;;  %v4873_v18 = vunpack.i.l.bf16 %v4872_v23  ;;  %v4518_v3 = vunpack.i.l.bf16 %v7554_v33  ;;  %v5470_v23 = vld [vmem:[#allocation2 + $0x170] sm:$0xff]  ;;  %v5427_v33 = vld [vmem:[%s7514_s2 + $0x20] sm:$0xff]  }
 0x175   : > { %1767 = vmatprep.mubr.bf16.mxu0 %v1431_v50  ;;  %v1289_v36 = vsel %vm1262_vm4, %v1256_v45, %v4868_v17  ;;  %v1290_v2 = vsel %vm1262_vm4, %v1257_v51, %v4869_v53 }
 0x176   : > { %v4877_v49 = vpop.permute.xlu1 %4876  ;;  %v1430_v4 = vpack.c.bf16 %v1290_v2, %v1289_v36  ;;  %v1324_v32 = vsel %vm298_vm0, %v5466_v26, %v4874_v39  ;;  %v1323_v6 = vsel %vm298_vm0, %v5467_v40, %v4873_v18  ;;  %v5471_v18 = vld [vmem:[#allocation2 + $0x168] sm:$0xff] }
 0x177   : > { %v4879_v29 = vunpack.i.h.bf16 %v4877_v49  ;;  %v4878_v54 = vunpack.i.l.bf16 %v4877_v49  ;;  %v4882_v57 = vpop.permute.xlu0 %4881  ;;  %v1227_v45 = vsel %vm298_vm0, %v5471_v18, %v4518_v3 }
 0x178   : > { %1768 = vmatmul.mubr.bf16.gmra.mxu0 %v1430_v4  ;;  %v4884_v20 = vunpack.i.h.bf16 %v4882_v57  ;;  %v4883_v59 = vunpack.i.l.bf16 %v4882_v57 }
 0x179   : > { %v1355_v38 = vsel %vm1229_vm3, %v1323_v6, %v4878_v54  ;;  %v1356_v30 = vsel %vm1229_vm3, %v1324_v32, %v4879_v29  ;;  %v4316_v6 = vpop.f32.mrf.mxu1 }
 0x17a   : > { %v4887_v34 = vpop.permute.xlu1 %4886  ;;  %v1258_v55 = vsel %vm1229_vm3, %v1225_v27, %v4883_v59  ;;  %v1259_v14 = vsel %vm1229_vm3, %v1226_v13, %v4884_v20  ;;  %v6543_v20 = vld [vmem:[%s7515_s3] ss:$0 sm:$0xff]  ;;  %v5423_v13 = vld [vmem:[%s7514_s2 + $0x30] sm:$0xff]  }
 0x17b   : > { %v4889_v35 = vunpack.i.h.bf16 %v4887_v34  ;;  %v4888_v19 = vunpack.i.l.bf16 %v4887_v34  ;;  %v4892_v43 = vpop.permute.xlu0 %4891  ;;  %v1826_v54 = vpop.f32.mrf.mxu1 }
 0x17c   : > { %v4894_v21 = vunpack.i.h.bf16 %v4892_v43  ;;  %v4893_v41 = vunpack.i.l.bf16 %v4892_v43 }
 0x17d   : > { %v1387_v46 = vsel %vm1262_vm4, %v1355_v38, %v4888_v19  ;;  %v1388_v62 = vsel %vm1262_vm4, %v1356_v30, %v4889_v35  ;;  %v4317_v34 = vpop.f32.mrf.mxu1  ;;  %v6548_v30 = vld [vmem:[%s7516_s4] ss:$0 sm:$0xff]  ;;  %v5422_v19 = vld [vmem:[%s7514_s2 + $0x70] sm:$0xff]  }
 0x17e   : > { %v4897_v44 = vpop.permute.xlu1 %4896  ;;  %v1434_v60 = vpack.c.bf16 %v1388_v62, %v1387_v46  ;;  %v1291_v5 = vsel %vm1262_vm4, %v1258_v55, %v4893_v41  ;;  %v1292_v15 = vsel %vm1262_vm4, %v1259_v14, %v4894_v21  ;;  %4182 = vmatprep.subr.bf16.mxu1 %v5422_v19  ;;  %v5424_v62 = vld [vmem:[%s7514_s2 + $0x68] sm:$0xff]  }
 0x17f   : > { %v4899_v16 = vunpack.i.h.bf16 %v4897_v44  ;;  %v4898_v0 = vunpack.i.l.bf16 %v4897_v44  ;;  %v4902_v25 = vpop.permute.xlu0 %4901  ;;  %v1433_v1 = vpack.c.bf16 %v1292_v15, %v1291_v5  ;;  %v1829_v58 = vpop.f32.mrf.mxu1  ;;  %4183 = vmatpush3.bf16.msra.mxu1 %v5423_v13 }
 0x180   : > { %1775 = vmatprep.mubr.bf16.mxu0 %v1434_v60  ;;  %v4904_v61 = vunpack.i.h.bf16 %v4902_v25  ;;  %v4903_v63 = vunpack.i.l.bf16 %v4902_v25  ;;  %v5425_v60 = vld [vmem:[%s7514_s2 + $0x28] sm:$0xff]   ;;  %4184 = vmatprep.subr.bf16.mxu1 %v5424_v62 }
 0x181   : > { %v1326_v47 = vsel %vm298_vm0, %v6269_v7, %v4899_v16  ;;  %v1325_v22 = vsel %vm298_vm0, %v6263_v8, %v4898_v0  ;;  %1776 = vmatmul.mubr.bf16.gmra.mxu0 %v1433_v1  ;;  %v1228_v7 = vsel %vm298_vm0, %v5470_v23, %v4519_v10  ;;  %v6565_v15 = vpop.f32.mrf.mxu1  ;;  %v5429_v23 = vld [vmem:[%s7514_s2 + $0x18] sm:$0xff]  }
 0x182   : > { %v4907_v11 = vpop.permute.xlu1 %4906  ;;  %v1357_v48 = vsel %vm1229_vm3, %v1325_v22, %v4903_v63  ;;  %v1358_v37 = vsel %vm1229_vm3, %v1326_v47, %v4904_v61  ;;  %v5426_v61 = vld [vmem:[%s7514_s2 + $0x60] sm:$0xff]  }
 0x183   : > { %v4912_v9 = vpop.permute.xlu0 %4911  ;;  %v4909_v24 = vunpack.i.h.bf16 %v4907_v11  ;;  %v4908_v42 = vunpack.i.l.bf16 %v4907_v11  ;;  %4185 = vmatpush3.bf16.msra.mxu1 %v5425_v60  ;;  %v1842_v11 = vpop.f32.mrf.mxu1 }
 0x184   : > { %v4914_v53 = vunpack.i.h.bf16 %v4912_v9  ;;  %v4913_v17 = vunpack.i.l.bf16 %v4912_v9  ;;  %4186 = vmatprep.subr.bf16.mxu1 %v5426_v61 }
 0x185   : > { %v1260_v49 = vsel %vm1229_vm3, %v1227_v45, %v4908_v42  ;;  %v1261_v4 = vsel %vm1229_vm3, %v1228_v7, %v4909_v24  ;;  %v5428_v24 = vld [vmem:[%s7514_s2 + $0x58] sm:$0xff]   ;;  %v4321_v7 = vpop.f32.mrf.mxu1 }
 0x186   : > { %v4917_v50 = vpop.permute.xlu1 %4916  ;;  %v1389_v8 = vsel %vm1262_vm4, %v1357_v48, %v4913_v17  ;;  %v1390_v39 = vsel %vm1262_vm4, %v1358_v37, %v4914_v53 }
 0x187   : > { %v4919_v51 = vunpack.i.h.bf16 %v4917_v50  ;;  %v4918_v36 = vunpack.i.l.bf16 %v4917_v50  ;;  %v1437_v2 = vpack.c.bf16 %v1390_v39, %v1389_v8  ;;  %4187 = vmatpush3.bf16.msra.mxu1 %v5427_v33 }
 0x188   : > { %4188 = vmatprep.subr.bf16.mxu1 %v5428_v24 }
 0x189   : > { %1783 = vmatprep.mubr.bf16.mxu0 %v1437_v2  ;;  %v1293_v26 = vsel %vm1262_vm4, %v1260_v49, %v4918_v36  ;;  %v1294_v32 = vsel %vm1262_vm4, %v1261_v4, %v4919_v51  ;;  %v5430_v51 = vld [vmem:[%s7514_s2 + $0x50] sm:$0xff]  }
 0x18a   : > { %v1436_v40 = vpack.c.bf16 %v1294_v32, %v1293_v26  ;;  %v5431_v4 = vld [vmem:[%s7514_s2 + $0x10] sm:$0xff]   ;;  %v1845_v26 = vpop.f32.mrf.mxu1 }
 0x18b   : > { %4189 = vmatpush3.bf16.msra.mxu1 %v5429_v23 }
 0x18c   : > { %1784 = vmatmul.mubr.bf16.gmra.mxu0 %v1436_v40  ;;  %4190 = vmatprep.subr.bf16.mxu1 %v5430_v51  ;;  %v6600_v13 = vpop.f32.mrf.mxu1 }
 0x18f   : > { %4191 = vmatpush3.bf16.msra.mxu1 %v5431_v4 }
 0x1bc   : > { %v4066_v29 = vpop.f32.mrf.mxu0 }
 0x1be   : > { %v4067_v57 = vpop.f32.mrf.mxu0 }
 0x1bf   : > { %v4068_v56 = vadd.f32 %v4067_v57, %v4066_v29 }
 0x1c0   : > { %v4069_v59 = vpop.f32.mrf.mxu0 }
 0x1c1   : > { %v1827_v38 = vadd.f32 %v4068_v56, %v1826_v54 }
 0x1c2   : > { %v4070_v35 = vpop.f32.mrf.mxu0 }
 0x1c3   : > { %v1960_v43 = vmul.f32 %v6543_v20, %v1827_v38  ;;  %v4071_v31 = vadd.f32 %v4070_v35, %v4069_v59  ;;  %v5432_v38 = vld [vmem:[%s7514_s2 + $0x48] sm:$0xff]  }
 0x1c4   : > { %v4072_v27 = vpop.f32.mrf.mxu0  ;;  %4192 = vmatprep.subr.bf16.mxu1 %v5432_v38 }
 0x1c5   : > { %v1999_v21 = vadd.f32 %v6548_v30, %v1960_v43  ;;  %v1830_v41 = vadd.f32 %v4071_v31, %v1829_v58  ;;  %v5433_v58 = vld [vmem:[%s7514_s2 + $0x8] sm:$0xff]  }
 0x1c6   : > { %v4073_v46 = vpop.f32.mrf.mxu0  ;;  %4193 = vmatpush3.bf16.msra.mxu1 %v5433_v58 }
 0x1c7   : > { %vm2031_vm5 = vcmp.ge.f32.partialorder %v1999_v21, 0.0  ;;  %v2063_v55 = vmul.f32 0.01, %v1999_v21  ;;  %v1961_v14 = vmul.f32 %v6543_v20, %v1830_v41  ;;  %v4074_v44 = vadd.f32 %v4073_v46, %v4072_v27 }
 0x1c8   : > { %v4075_v5 = vpop.f32.mrf.mxu0 }
 0x1c9   : > { %v2095_v16 = vsel %vm2031_vm5, %v1999_v21, %v2063_v55  ;;  %v2000_v0 = vadd.f32 %v6548_v30, %v1961_v14  ;;  %v1835_v25 = vadd.f32 %v4316_v6, %v4074_v44  ;;  %v5434_v44 = vld [vmem:[%s7514_s2 + $0x40] sm:$0xff]  }
 0x1ca   : > { %2127 = vst.msk [vmem:[#allocation2 + $0x19] sm:$0xff] %vm298_vm0, %v2095_v16  ;;  %v4076_v1 = vpop.f32.mrf.mxu0  ;;  %4194 = vmatprep.subr.bf16.mxu1 %v5434_v44 }
 0x1cb   : > { %vm2032_vm6 = vcmp.ge.f32.partialorder %v2000_v0, 0.0  ;;  %v2064_v63 = vmul.f32 0.01, %v2000_v0  ;;  %v1962_v47 = vmul.f32 %v6543_v20, %v1835_v25  ;;  %v4077_v22 = vadd.f32 %v4076_v1, %v4075_v5 }
 0x1cc   : > { %v4078_v10 = vpop.f32.mrf.mxu0 }
 0x1cd   : > { %v2096_v3 = vsel %vm2032_vm6, %v2000_v0, %v2064_v63  ;;  %v2001_v9 = vadd.f32 %v6548_v30, %v1962_v47  ;;  %v1838_v48 = vadd.f32 %v4317_v34, %v4077_v22  ;;  %v1858_v0 = vpop.f32.mrf.mxu1 }
 0x1ce   : > { %2128 = vst.msk [vmem:[#allocation2 + $0x21] sm:$0xff] %vm298_vm0, %v2096_v3  ;;  %v4079_v37 = vpop.f32.mrf.mxu0 }
 0x1cf   : > { %vm2033_vm7 = vcmp.ge.f32.partialorder %v2001_v9, 0.0  ;;  %v2065_v42 = vmul.f32 0.01, %v2001_v9  ;;  %v1963_v53 = vmul.f32 %v6543_v20, %v1838_v48  ;;  %v4080_v17 = vadd.f32 %v4079_v37, %v4078_v10  ;;  %v6621_v24 = vpop.f32.mrf.mxu1 }
 0x1d0   : > { %v4081_v50 = vpop.f32.mrf.mxu0 }
 0x1d1   : > { %v2097_v8 = vsel %vm2033_vm7, %v2001_v9, %v2065_v42  ;;  %v2002_v39 = vadd.f32 %v6548_v30, %v1963_v53  ;;  %v1843_v18 = vadd.f32 %v4080_v17, %v1842_v11  ;;  %v2161_v40 = vld [vmem:[#allocation2 + $0x18] sm:$0xff] }
 0x1d2   : > { %2129 = vst.msk [vmem:[#allocation2 + $0x31] sm:$0xff] %vm298_vm0, %v2097_v8  ;;  %v4082_v45 = vpop.f32.mrf.mxu0  ;;  %v2197_v62 = vld [vmem:[#allocation2 + $0x19] sm:$0xff] }
 0x1d3   : > { %vm2034_vm8 = vcmp.ge.f32.partialorder %v2002_v39, 0.0  ;;  %v2066_v36 = vmul.f32 0.01, %v2002_v39  ;;  %v1964_v2 = vmul.f32 %v6543_v20, %v1843_v18  ;;  %v4083_v49 = vadd.f32 %v4082_v45, %v4081_v50 }
 0x1d4   : > { %v4084_v32 = vpop.f32.mrf.mxu0 }
 0x1d5   : > { %v2098_v6 = vsel %vm2034_vm8, %v2002_v39, %v2066_v36  ;;  %v2003_v29 = vadd.f32 %v6548_v30, %v1964_v2  ;;  %v1846_v54 = vadd.f32 %v4083_v49, %v1845_v26  ;;  %v2233_v57 = vld [vmem:[#allocation2 + $0x1a] sm:$0xff]  ;;  %v2234_v28 = vld [vmem:[#allocation2 + $0x22] sm:$0xff] }
 0x1d6   : > { %v2162_v56 = vld [vmem:[#allocation2 + $0x20] sm:$0xff]  ;;  %2130 = vst.msk [vmem:[#allocation2 + $0x39] sm:$0xff] %vm298_vm0, %v2098_v6  ;;  %v4085_v12 = vpop.f32.mrf.mxu0  ;;  %v4935_v59 = vpack.i.bf16 %v2234_v28, %v2233_v57 }
 0x1d7   : > { %v4940_v34 = vpack.i.bf16 %v2162_v56, %v2161_v40  ;;  %vm2035_vm9 = vcmp.ge.f32.partialorder %v2003_v29, 0.0  ;;  %v2067_v35 = vmul.f32 0.01, %v2003_v29  ;;  %v1965_v19 = vmul.f32 %v6543_v20, %v1846_v54  ;;  %v2198_v31 = vld [vmem:[#allocation2 + $0x21] sm:$0xff] }
 0x1d8   : > { %v4086_v43 = vadd.f32 %v4085_v12, %v4084_v32  ;;  %v4087_v27 = vpop.f32.mrf.mxu0  ;;  %4936 = vrot.lane.b32.xlu0 %v4935_v59, %s5616_s12  ;;  %v4945_v14 = vpack.i.bf16 %v2198_v31, %v2197_v62 }
 0x1d9   : > { %4941 = vrot.lane.b32.xlu1 %v4940_v34, %s5618_s20  ;;  %v2099_v21 = vsel %vm2035_vm9, %v2003_v29, %v2067_v35  ;;  %v2004_v41 = vadd.f32 %v6548_v30, %v1965_v19  ;;  %v2163_v25 = vld [vmem:[#allocation2 + $0x30] sm:$0xff] }
 0x1da   : > { %v1851_v46 = vadd.f32 %v6565_v15, %v4086_v43  ;;  %2131 = vst.msk [vmem:[#allocation2 + $0x49] sm:$0xff] %vm298_vm0, %v2099_v21  ;;  %v4088_v55 = vpop.f32.mrf.mxu0  ;;  %v5435_v15 = vld [vmem:[%s7514_s2] sm:$0xff]   ;;  %v2199_v50 = vld [vmem:[#allocation2 + $0x31] sm:$0xff] }
 0x1db   : > { %vm2036_vm10 = vcmp.ge.f32.partialorder %v2004_v41, 0.0  ;;  %v2068_v60 = vmul.f32 0.01, %v2004_v41  ;;  %v4089_v16 = vadd.f32 %v4088_v55, %v4087_v27  ;;  %4195 = vmatpush3.bf16.msra.mxu1 %v5435_v15 }
 0x1dc   : > { %v1966_v5 = vmul.f32 %v6543_v20, %v1851_v46  ;;  %4382 = vmatprep.subr.bf16.mxu1 %v6467_v52  ;;  %v1861_v52 = vpop.f32.mrf.mxu1 }
 0x1dd   : > { %4946 = vrot.lane.b32.xlu1 %v4945_v14, %s5616_s12  ;;  %v2100_v1 = vsel %vm2036_vm10, %v2004_v41, %v2068_v60  ;;  %v1854_v63 = vadd.f32 %v4321_v7, %v4089_v16  ;;  %v4090_v47 = vpop.f32.mrf.mxu0  ;;  %v2235_v22 = vld [vmem:[#allocation2 + $0x32] sm:$0xff]  ;;  %v2236_v33 = vld [vmem:[#allocation2 + $0x3a] sm:$0xff] }
 0x1de   : > { %v2005_v61 = vadd.f32 %v6548_v30, %v1966_v5  ;;  %v2164_v10 = vld [vmem:[#allocation2 + $0x38] sm:$0xff]  ;;  %2132 = vst.msk [vmem:[#allocation2 + $0x51] sm:$0xff] %vm298_vm0, %v2100_v1  ;;  %v3141_v11 = vpack.c.bf16 %v2236_v33, %v2235_v22  ;;  %v4965_v6 = vpack.i.bf16 %v2236_v33, %v2235_v22  ;;  %v6640_v43 = vpop.f32.mrf.mxu1 }
 0x1df   : > { %v4955_v3 = vpack.i.bf16 %v2164_v10, %v2163_v25  ;;  %v1967_v48 = vmul.f32 %v6543_v20, %v1854_v63  ;;  %v4091_v37 = vpop.f32.mrf.mxu0  ;;  %v2200_v42 = vld [vmem:[#allocation2 + $0x39] sm:$0xff] }
 0x1e0   : > { %vm2037_vm11 = vcmp.ge.f32.partialorder %v2005_v61, 0.0  ;;  %v2069_v9 = vmul.f32 0.01, %v2005_v61  ;;  %v4092_v53 = vadd.f32 %v4091_v37, %v4090_v47  ;;  %4350 = vmatprep.mubr.msk.bf16.mxu0 %vm298_vm0, %v3141_v11  ;;  %v4960_v39 = vpack.i.bf16 %v2200_v42, %v2199_v50  ;;  %v1874_v16 = vpop.f32.mrf.mxu1 }
 0x1e1   : > { %4956 = vrot.lane.b32.xlu0 %v4955_v3, %s5617_s19  ;;  %v2006_v23 = vadd.f32 %v6548_v30, %v1967_v48  ;;  %4951 = vrot.lane.b32.xlu1 %v4935_v59, %s5617_s19  ;;  %v4093_v7 = vpop.f32.mrf.mxu0  ;;  %v2165_v56 = vld [vmem:[#allocation2 + $0x48] sm:$0xff] }
 0x1e2   : > { %v2101_v17 = vsel %vm2037_vm11, %v2005_v61, %v2069_v9  ;;  %v1859_v8 = vadd.f32 %v4092_v53, %v1858_v0  ;;  %v2201_v46 = vld [vmem:[#allocation2 + $0x49] sm:$0xff]  ;;  %v6653_v47 = vpop.f32.mrf.mxu1 }
 0x1e3   : > { %2133 = vst.msk [vmem:[#allocation2 + $0x61] sm:$0xff] %vm298_vm0, %v2101_v17  ;;  %vm2038_vm12 = vcmp.ge.f32.partialorder %v2006_v23, 0.0  ;;  %v2070_v18 = vmul.f32 0.01, %v2006_v23  ;;  %v4094_v45 = vpop.f32.mrf.mxu0 }
 0x1e4   : > { %v1968_v51 = vmul.f32 %v6543_v20, %v1859_v8  ;;  %v4095_v36 = vadd.f32 %v4094_v45, %v4093_v7 }
 0x1e5   : > { %4961 = vrot.lane.b32.xlu0 %v4960_v39, %s5618_s20  ;;  %v2102_v2 = vsel %vm2038_vm12, %v2006_v23, %v2070_v18  ;;  %4971 = vrot.lane.b32.xlu1 %v4955_v3, %s5618_s20  ;;  %v2237_v49 = vld [vmem:[#allocation2 + $0x4a] sm:$0xff]  ;;  %v2238_v4 = vld [vmem:[#allocation2 + $0x52] sm:$0xff]  ;;  %v1877_v23 = vpop.f32.mrf.mxu1 }
 0x1e6   : > { %2134 = vst.msk [vmem:[#allocation2 + $0x69] sm:$0xff] %vm298_vm0, %v2102_v2  ;;  %v2007_v26 = vadd.f32 %v6548_v30, %v1968_v51  ;;  %v1862_v32 = vadd.f32 %v4095_v36, %v1861_v52  ;;  %v3144_v40 = vpack.c.bf16 %v2238_v4, %v2237_v49  ;;  %v2166_v29 = vld [vmem:[#allocation2 + $0x50] sm:$0xff]  ;;  %v4995_v25 = vpack.i.bf16 %v2238_v4, %v2237_v49 }
 0x1e7   : > { %v4985_v38 = vpack.i.bf16 %v2166_v29, %v2165_v56  ;;  %v2202_v19 = vld [vmem:[#allocation2 + $0x51] sm:$0xff] }
 0x1e8   : > { %vm2039_vm13 = vcmp.ge.f32.partialorder %v2007_v26, 0.0  ;;  %v2071_v54 = vmul.f32 0.01, %v2007_v26  ;;  %v1969_v57 = vmul.f32 %v6543_v20, %v1862_v32  ;;  %v4096_v28 = vpop.f32.mrf.mxu0  ;;  %4351 = vmatmul.mubr.msk.bf16.vlgmr.msra.gmra.mxu0 %vm298_vm0, %v3144_v40  ;;  %v4990_v44 = vpack.i.bf16 %v2202_v19, %v2201_v46 }
 0x1e9   : > { %4966 = vrot.lane.b32.xlu0 %v4965_v6, %s5616_s12  ;;  %4976 = vrot.lane.b32.xlu1 %v4960_v39, %s5616_s12 }
 0x1ea   : > { %v2103_v12 = vsel %vm2039_vm13, %v2007_v26, %v2071_v54  ;;  %v2008_v59 = vadd.f32 %v6548_v30, %v1969_v57  ;;  %v4097_v34 = vpop.f32.mrf.mxu0  ;;  %v2167_v9 = vld [vmem:[#allocation2 + $0x60] sm:$0xff]  ;;  %v6676_v57 = vpop.f32.mrf.mxu1 }
 0x1eb   : > { %2135 = vst.msk [vmem:[#allocation2 + $0x79] sm:$0xff] %vm298_vm0, %v2103_v12  ;;  %v4098_v35 = vadd.f32 %v4097_v34, %v4096_v28  ;;  %v2203_v45 = vld [vmem:[#allocation2 + $0x61] sm:$0xff] }
 0x1ec   : > { %vm2040_vm14 = vcmp.ge.f32.partialorder %v2008_v59, 0.0  ;;  %v2072_v31 = vmul.f32 0.01, %v2008_v59  ;;  %v4099_v58 = vpop.f32.mrf.mxu0 }
 0x1ed   : > { %4986 = vrot.lane.b32.xlu0 %v4985_v38, %s5617_s19  ;;  %v1867_v27 = vadd.f32 %v6600_v13, %v4098_v35  ;;  %4981 = vrot.lane.b32.xlu1 %v4965_v6, %s5617_s19  ;;  %v2239_v21 = vld [vmem:[#allocation2 + $0x62] sm:$0xff]  ;;  %v2240_v41 = vld [vmem:[#allocation2 + $0x6a] sm:$0xff] }
 0x1ee   : > { %v2104_v62 = vsel %vm2040_vm14, %v2008_v59, %v2072_v31  ;;  %v4100_v55 = vpop.f32.mrf.mxu0  ;;  %v3147_v14 = vpack.c.bf16 %v2240_v41, %v2239_v21  ;;  %v2168_v22 = vld [vmem:[#allocation2 + $0x68] sm:$0xff]  ;;  %v5025_v6 = vpack.i.bf16 %v2240_v41, %v2239_v21 }
 0x1ef   : > { %2136 = vst.msk [vmem:[#allocation2 + $0x81] sm:$0xff] %vm298_vm0, %v2104_v62  ;;  %v1970_v60 = vmul.f32 %v6543_v20, %v1867_v27  ;;  %v4101_v5 = vadd.f32 %v4100_v55, %v4099_v58  ;;  %v5015_v37 = vpack.i.bf16 %v2168_v22, %v2167_v9  ;;  %v2204_v50 = vld [vmem:[#allocation2 + $0x69] sm:$0xff] }
 0x1f0   : > { %4354 = vmatprep.mubr.msk.bf16.mxu0 %vm298_vm0, %v3147_v14  ;;  %v5020_v36 = vpack.i.bf16 %v2204_v50, %v2203_v45 }
 0x1f1   : > { %4991 = vrot.lane.b32.xlu0 %v4990_v44, %s5618_s20  ;;  %v2009_v13 = vadd.f32 %v6548_v30, %v1970_v60  ;;  %v1870_v0 = vadd.f32 %v6621_v24, %v4101_v5  ;;  %5001 = vrot.lane.b32.xlu1 %v4985_v38, %s5618_s20  ;;  %v4102_v15 = vpop.f32.mrf.mxu0 }
 0x1f2   : > { %v2169_v38 = vld [vmem:[#allocation2 + $0x78] sm:$0xff] }
 0x1f3   : > { %vm2041_vm15 = vcmp.ge.f32.partialorder %v2009_v13, 0.0  ;;  %v2073_v1 = vmul.f32 0.01, %v2009_v13  ;;  %v1971_v61 = vmul.f32 %v6543_v20, %v1870_v0  ;;  %v4103_v63 = vpop.f32.mrf.mxu0  ;;  %v2205_v14 = vld [vmem:[#allocation2 + $0x79] sm:$0xff] }
 0x1f4   : > { %v4104_v33 = vadd.f32 %v4103_v63, %v4102_v15 }
 0x1f5   : > { %4996 = vrot.lane.b32.xlu0 %v4995_v25, %s5616_s12  ;;  %v2105_v10 = vsel %vm2041_vm15, %v2009_v13, %v2073_v1  ;;  %v2010_v11 = vadd.f32 %v6548_v30, %v1971_v61  ;;  %5006 = vrot.lane.b32.xlu1 %v4990_v44, %s5616_s12  ;;  %v4105_v3 = vpop.f32.mrf.mxu0 }
 0x1f6   : > { %2137 = vst.msk [vmem:[#allocation2 + $0x91] sm:$0xff] %vm298_vm0, %v2105_v10  ;;  %v1875_v48 = vadd.f32 %v4104_v33, %v1874_v16  ;;  %v6659_v24 = vld [vmem:[#allocation2 + $0x7a] sm:$0xff]  ;;  %v6661_v42 = vld [vmem:[#allocation2 + $0x82] sm:$0xff] }
 0x1f7   : > { %vm2042_vm1 = vcmp.ge.f32.partialorder %v2010_v11, 0.0  ;;  %v2074_v53 = vmul.f32 0.01, %v2010_v11  ;;  %v4106_v17 = vpop.f32.mrf.mxu0  ;;  %v3150_v7 = vpack.c.bf16 %v6661_v42, %v6659_v24  ;;  %v2170_v54 = vld [vmem:[#allocation2 + $0x80] sm:$0xff]  ;;  %v5055_v63 = vpack.i.bf16 %v6661_v42, %v6659_v24 }
 0x1f8   : > { %v1972_v8 = vmul.f32 %v6543_v20, %v1875_v48  ;;  %v4107_v39 = vadd.f32 %v4106_v17, %v4105_v3  ;;  %v5045_v58 = vpack.i.bf16 %v2170_v54, %v2169_v38  ;;  %v2206_v41 = vld [vmem:[#allocation2 + $0x81] sm:$0xff] }
 0x1f9   : > { %5016 = vrot.lane.b32.xlu0 %v5015_v37, %s5617_s19  ;;  %v2106_v18 = vsel %vm2042_vm1, %v2010_v11, %v2074_v53  ;;  %5011 = vrot.lane.b32.xlu1 %v4995_v25, %s5617_s19  ;;  %v5050_v44 = vpack.i.bf16 %v2206_v41, %v2205_v14 }
 0x1fa   : > { %4355 = vmatmul.mubr.msk.bf16.gmra.mxu0 %vm298_vm0, %v3150_v7  ;;  %2138 = vst.msk [vmem:[#allocation2 + $0x99] sm:$0xff] %vm298_vm0, %v2106_v18  ;;  %v2011_v52 = vadd.f32 %v6548_v30, %v1972_v8  ;;  %v1878_v51 = vadd.f32 %v4107_v39, %v1877_v23 }
 0x1fc   : > { %vm2043_vm2 = vcmp.ge.f32.partialorder %v2011_v52, 0.0  ;;  %v2075_v2 = vmul.f32 0.01, %v2011_v52  ;;  %v1973_v49 = vmul.f32 %v6543_v20, %v1878_v51  ;;  %v4108_v4 = vpop.f32.mrf.mxu0 }
 0x1fd   : > { %5021 = vrot.lane.b32.xlu0 %v5020_v36, %s5618_s20  ;;  %5031 = vrot.lane.b32.xlu1 %v5015_v37, %s5618_s20  ;;  %v2171_v24 = vld [vmem:[#allocation2 + $0x90] sm:$0xff] }
 0x1fe   : > { %v2107_v26 = vsel %vm2043_vm2, %v2011_v52, %v2075_v2  ;;  %v2012_v32 = vadd.f32 %v6548_v30, %v1973_v49  ;;  %v4109_v40 = vpop.f32.mrf.mxu0  ;;  %v2207_v18 = vld [vmem:[#allocation2 + $0x91] sm:$0xff] }
 0x1ff   : > { %2139 = vst.msk [vmem:[#allocation2 + $0xa9] sm:$0xff] %vm298_vm0, %v2107_v26  ;;  %v4110_v29 = vadd.f32 %v4109_v40, %v4108_v4 }
 0x200   : > { %vm2044_vm5 = vcmp.ge.f32.partialorder %v2012_v32, 0.0  ;;  %v2076_v28 = vmul.f32 0.01, %v2012_v32  ;;  %v4111_v56 = vpop.f32.mrf.mxu0 }
 0x201   : > { %5026 = vrot.lane.b32.xlu0 %v5025_v6, %s5616_s12  ;;  %v1883_v12 = vadd.f32 %v6640_v43, %v4110_v29  ;;  %5036 = vrot.lane.b32.xlu1 %v5020_v36, %s5616_s12  ;;  %v6681_v59 = vld [vmem:[#allocation2 + $0x92] sm:$0xff]  ;;  %v6683_v34 = vld [vmem:[#allocation2 + $0x9a] sm:$0xff]  ;;  %v1890_v43 = vpop.f32.mrf.mxu1 }
 0x202   : > { %v2108_v35 = vsel %vm2044_vm5, %v2012_v32, %v2076_v28  ;;  %v4112_v19 = vpop.f32.mrf.mxu0  ;;  %v3153_v31 = vpack.c.bf16 %v6683_v34, %v6681_v59  ;;  %v2172_v9 = vld [vmem:[#allocation2 + $0x98] sm:$0xff] }
 0x203   : > { %2140 = vst.msk [vmem:[#allocation2 + $0xb1] sm:$0xff] %vm298_vm0, %v2108_v35  ;;  %v1974_v27 = vmul.f32 %v6543_v20, %v1883_v12  ;;  %v4113_v21 = vadd.f32 %v4112_v19, %v4111_v56  ;;  %v6695_v13 = vpop.f32.mrf.mxu1  ;;  %v5075_v23 = vpack.i.bf16 %v2172_v9, %v2171_v24  ;;  %v2208_v7 = vld [vmem:[#allocation2 + $0x99] sm:$0xff]  ;;  %v5085_v56 = vpack.i.bf16 %v6683_v34, %v6681_v59 }
 0x204   : > { %4358 = vmatprep.mubr.msk.bf16.mxu0 %vm298_vm0, %v3153_v31  ;;  %v5080_v36 = vpack.i.bf16 %v2208_v7, %v2207_v18 }
 0x205   : > { %5046 = vrot.lane.b32.xlu0 %v5045_v58, %s5617_s19  ;;  %v2013_v46 = vadd.f32 %v6548_v30, %v1974_v27  ;;  %v1886_v62 = vadd.f32 %v6653_v47, %v4113_v21  ;;  %5041 = vrot.lane.b32.xlu1 %v5025_v6, %s5617_s19  ;;  %v4114_v55 = vpop.f32.mrf.mxu0  ;;  %v1893_v11 = vpop.f32.mrf.mxu1 }
 0x206   : > { %v2173_v27 = vld [vmem:[#allocation2 + $0xa8] sm:$0xff] }
 0x207   : > { %vm2045_vm6 = vcmp.ge.f32.partialorder %v2013_v46, 0.0  ;;  %v2077_v60 = vmul.f32 0.01, %v2013_v46  ;;  %v1975_v5 = vmul.f32 %v6543_v20, %v1886_v62  ;;  %v4115_v16 = vpop.f32.mrf.mxu0  ;;  %v6720_v49 = vpop.f32.mrf.mxu1 }
 0x208   : > { %v4116_v0 = vadd.f32 %v4115_v16, %v4114_v55 }
 0x209   : > { %5051 = vrot.lane.b32.xlu0 %v5050_v44, %s5618_s20  ;;  %v2109_v15 = vsel %vm2045_vm6, %v2013_v46, %v2077_v60  ;;  %v2014_v25 = vadd.f32 %v6548_v30, %v1975_v5  ;;  %5061 = vrot.lane.b32.xlu1 %v5045_v58, %s5618_s20  ;;  %v4117_v1 = vpop.f32.mrf.mxu0  ;;  %v1906_v35 = vpop.f32.mrf.mxu1  ;;  %v2209_v60 = vld [vmem:[#allocation2 + $0xa9] sm:$0xff] }
 0x20a   : > { %2141 = vst.msk [vmem:[#allocation2 + $0xc1] sm:$0xff] %vm298_vm0, %v2109_v15  ;;  %v1891_v61 = vadd.f32 %v4116_v0, %v1890_v43  ;;  %v6703_v47 = vld [vmem:[#allocation2 + $0xaa] sm:$0xff]  ;;  %v6705_v22 = vld [vmem:[#allocation2 + $0xb2] sm:$0xff] }
 0x20b   : > { %vm2046_vm7 = vcmp.ge.f32.partialorder %v2014_v25, 0.0  ;;  %v2078_v33 = vmul.f32 0.01, %v2014_v25  ;;  %v4118_v10 = vpop.f32.mrf.mxu0  ;;  %v3156_v3 = vpack.c.bf16 %v6705_v22, %v6703_v47  ;;  %v6741_v43 = vpop.f32.mrf.mxu1  ;;  %v2210_v46 = vld [vmem:[#allocation2 + $0xb1] sm:$0xff]  ;;  %v5115_v9 = vpack.i.bf16 %v6705_v22, %v6703_v47 }
 0x20c   : > { %v1976_v48 = vmul.f32 %v6543_v20, %v1891_v61  ;;  %v4119_v37 = vadd.f32 %v4118_v10, %v4117_v1  ;;  %v5110_v16 = vpack.i.bf16 %v2210_v46, %v2209_v60 }
 0x20d   : > { %5056 = vrot.lane.b32.xlu0 %v5055_v63, %s5616_s12  ;;  %v2110_v53 = vsel %vm2046_vm7, %v2014_v25, %v2078_v33  ;;  %5066 = vrot.lane.b32.xlu1 %v5050_v44, %s5616_s12  ;;  %v1909_v1 = vpop.f32.mrf.mxu1 }
 0x20e   : > { %4359 = vmatmul.mubr.msk.bf16.gmra.mxu0 %vm298_vm0, %v3156_v3  ;;  %2142 = vst.msk [vmem:[#allocation2 + $0xc9] sm:$0xff] %vm298_vm0, %v2110_v53  ;;  %v2015_v42 = vadd.f32 %v6548_v30, %v1976_v48  ;;  %v1894_v17 = vadd.f32 %v4119_v37, %v1893_v11 }
 0x20f   : > { %v6766_v22 = vpop.f32.mrf.mxu1 }
 0x210   : > { %vm2047_vm8 = vcmp.ge.f32.partialorder %v2015_v42, 0.0  ;;  %v2079_v50 = vmul.f32 0.01, %v2015_v42  ;;  %v1977_v8 = vmul.f32 %v6543_v20, %v1894_v17  ;;  %v4120_v39 = vpop.f32.mrf.mxu0 }
 0x211   : > { %5076 = vrot.lane.b32.xlu0 %v5075_v23, %s5617_s19  ;;  %5071 = vrot.lane.b32.xlu1 %v5055_v63, %s5617_s19 }
 0x212   : > { %v2111_v45 = vsel %vm2047_vm8, %v2015_v42, %v2079_v50  ;;  %v2016_v52 = vadd.f32 %v6548_v30, %v1977_v8  ;;  %v4121_v51 = vpop.f32.mrf.mxu0  ;;  %v2175_v42 = vld [vmem:[#allocation2 + $0xc0] sm:$0xff] }
 0x213   : > { %2143 = vst.msk [vmem:[#allocation2 + $0xd9] sm:$0xff] %vm298_vm0, %v2111_v45  ;;  %v4122_v2 = vadd.f32 %v4121_v51, %v4120_v39 }
 0x214   : > { %vm2048_vm9 = vcmp.ge.f32.partialorder %v2016_v52, 0.0  ;;  %v2080_v4 = vmul.f32 0.01, %v2016_v52  ;;  %v4123_v26 = vpop.f32.mrf.mxu0 }
 0x215   : > { %5081 = vrot.lane.b32.xlu0 %v5080_v36, %s5618_s20  ;;  %v1899_v32 = vadd.f32 %v6676_v57, %v4122_v2  ;;  %5091 = vrot.lane.b32.xlu1 %v5075_v23, %s5618_s20  ;;  %v6725_v40 = vld [vmem:[#allocation2 + $0xc2] sm:$0xff]  ;;  %v6727_v6 = vld [vmem:[#allocation2 + $0xca] sm:$0xff] }
 0x216   : > { %v2112_v29 = vsel %vm2048_vm9, %v2016_v52, %v2080_v4  ;;  %v4124_v54 = vpop.f32.mrf.mxu0  ;;  %v3159_v28 = vpack.c.bf16 %v6727_v6, %v6725_v40  ;;  %v2174_v57 = vld [vmem:[#allocation2 + $0xb0] sm:$0xff]  ;;  %v2176_v48 = vld [vmem:[#allocation2 + $0xc8] sm:$0xff] }
 0x217   : > { %2144 = vst.msk [vmem:[#allocation2 + $0xe1] sm:$0xff] %vm298_vm0, %v2112_v29  ;;  %v1978_v12 = vmul.f32 %v6543_v20, %v1899_v32  ;;  %v4125_v38 = vadd.f32 %v4124_v54, %v4123_v26  ;;  %v5105_v59 = vpack.i.bf16 %v2174_v57, %v2173_v27  ;;  %v5135_v50 = vpack.i.bf16 %v2176_v48, %v2175_v42  ;;  %v2212_v47 = vld [vmem:[#allocation2 + $0xc9] sm:$0xff] }
 0x218   : > { %4362 = vmatprep.mubr.msk.bf16.mxu0 %vm298_vm0, %v3159_v28  ;;  %v1922_v28 = vpop.f32.mrf.mxu1 }
 0x219   : > { %5086 = vrot.lane.b32.xlu0 %v5085_v56, %s5616_s12  ;;  %v2017_v19 = vadd.f32 %v6548_v30, %v1978_v12  ;;  %v1902_v31 = vadd.f32 %v6695_v13, %v4125_v38  ;;  %5096 = vrot.lane.b32.xlu1 %v5080_v36, %s5616_s12  ;;  %v4126_v58 = vpop.f32.mrf.mxu0  ;;  %v2211_v36 = vld [vmem:[#allocation2 + $0xc1] sm:$0xff]  ;;  %v5145_v38 = vpack.i.bf16 %v6727_v6, %v6725_v40 }
 0x21a   : > { %v5140_v32 = vpack.i.bf16 %v2212_v47, %v2211_v36 }
 0x21b   : > { %vm2049_vm10 = vcmp.ge.f32.partialorder %v2017_v19, 0.0  ;;  %v2081_v34 = vmul.f32 0.01, %v2017_v19  ;;  %v1979_v21 = vmul.f32 %v6543_v20, %v1902_v31  ;;  %v4127_v41 = vpop.f32.mrf.mxu0  ;;  %v6787_v31 = vpop.f32.mrf.mxu1 }
 0x21c   : > { %v4128_v62 = vadd.f32 %v4127_v41, %v4126_v58  ;;  %v2177_v41 = vld [vmem:[#allocation2 + $0xd8] sm:$0xff] }
 0x21d   : > { %5106 = vrot.lane.b32.xlu0 %v5105_v59, %s5617_s19  ;;  %v2113_v55 = vsel %vm2049_vm10, %v2017_v19, %v2081_v34  ;;  %v2018_v14 = vadd.f32 %v6548_v30, %v1979_v21  ;;  %5101 = vrot.lane.b32.xlu1 %v5085_v56, %s5617_s19  ;;  %v4129_v44 = vpop.f32.mrf.mxu0 }
 0x21e   : > { %2145 = vst.msk [vmem:[#allocation2 + $0xf1] sm:$0xff] %vm298_vm0, %v2113_v55  ;;  %v1907_v5 = vadd.f32 %v4128_v62, %v1906_v35  ;;  %v6747_v13 = vld [vmem:[#allocation2 + $0xda] sm:$0xff]  ;;  %v6749_v0 = vld [vmem:[#allocation2 + $0xe2] sm:$0xff] }
 0x21f   : > { %vm2050_vm11 = vcmp.ge.f32.partialorder %v2018_v14, 0.0  ;;  %v2082_v15 = vmul.f32 0.01, %v2018_v14  ;;  %v4130_v25 = vpop.f32.mrf.mxu0  ;;  %v3162_v61 = vpack.c.bf16 %v6749_v0, %v6747_v13  ;;  %v2178_v58 = vld [vmem:[#allocation2 + $0xe0] sm:$0xff] }
 0x220   : > { %v1980_v63 = vmul.f32 %v6543_v20, %v1907_v5  ;;  %v4131_v33 = vadd.f32 %v4130_v25, %v4129_v44  ;;  %v5165_v6 = vpack.i.bf16 %v2178_v58, %v2177_v41  ;;  %v2214_v60 = vld [vmem:[#allocation2 + $0xe1] sm:$0xff]  ;;  %v2213_v25 = vld [vmem:[#allocation2 + $0xd9] sm:$0xff] }
 0x221   : > { %5111 = vrot.lane.b32.xlu0 %v5110_v16, %s5618_s20  ;;  %v2114_v10 = vsel %vm2050_vm11, %v2018_v14, %v2082_v15  ;;  %5121 = vrot.lane.b32.xlu1 %v5105_v59, %s5618_s20  ;;  %v1925_v14 = vpop.f32.mrf.mxu1 }
 0x222   : > { %4363 = vmatmul.mubr.msk.bf16.gmra.mxu0 %vm298_vm0, %v3162_v61  ;;  %2146 = vst.msk [vmem:[#allocation2 + $0xf9] sm:$0xff] %vm298_vm0, %v2114_v10  ;;  %v2019_v11 = vadd.f32 %v6548_v30, %v1980_v63  ;;  %v1910_v3 = vadd.f32 %v4131_v33, %v1909_v1  ;;  %v5170_v63 = vpack.i.bf16 %v2214_v60, %v2213_v25 }
 0x223   : > { %v6812_v42 = vpop.f32.mrf.mxu1 }
 0x224   : > { %vm2051_vm12 = vcmp.ge.f32.partialorder %v2019_v11, 0.0  ;;  %v2083_v37 = vmul.f32 0.01, %v2019_v11  ;;  %v1981_v53 = vmul.f32 %v6543_v20, %v1910_v3  ;;  %v4132_v24 = vpop.f32.mrf.mxu0 }
 0x225   : > { %5116 = vrot.lane.b32.xlu0 %v5115_v9, %s5616_s12  ;;  %5126 = vrot.lane.b32.xlu1 %v5110_v16, %s5616_s12 }
 0x226   : > { %v2115_v17 = vsel %vm2051_vm12, %v2019_v11, %v2083_v37  ;;  %v2020_v23 = vadd.f32 %v6548_v30, %v1981_v53  ;;  %v4133_v7 = vpop.f32.mrf.mxu0  ;;  %v5175_v37 = vpack.i.bf16 %v6749_v0, %v6747_v13  ;;  %v2179_v13 = vld [vmem:[#allocation2 + $0xf0] sm:$0xff] }
 0x227   : > { %2147 = vst.msk [vmem:[#allocation2 + $0x109] sm:$0xff] %vm298_vm0, %v2115_v17  ;;  %v4134_v8 = vadd.f32 %v4133_v7, %v4132_v24 }
 0x228   : > { %vm2052_vm13 = vcmp.ge.f32.partialorder %v2020_v23, 0.0  ;;  %v2084_v39 = vmul.f32 0.01, %v2020_v23  ;;  %v4135_v18 = vpop.f32.mrf.mxu0 }
 0x229   : > { %5136 = vrot.lane.b32.xlu0 %v5135_v50, %s5617_s19  ;;  %v1915_v45 = vadd.f32 %v6720_v49, %v4134_v8  ;;  %5131 = vrot.lane.b32.xlu1 %v5115_v9, %s5617_s19  ;;  %v6771_v52 = vld [vmem:[#allocation2 + $0xf2] sm:$0xff]  ;;  %v6773_v51 = vld [vmem:[#allocation2 + $0xfa] sm:$0xff] }
 0x22a   : > { %v2116_v2 = vsel %vm2052_vm13, %v2020_v23, %v2084_v39  ;;  %v4136_v4 = vpop.f32.mrf.mxu0  ;;  %v3165_v26 = vpack.c.bf16 %v6773_v51, %v6771_v52  ;;  %v2180_v24 = vld [vmem:[#allocation2 + $0xf8] sm:$0xff] }
 0x22b   : > { %2148 = vst.msk [vmem:[#allocation2 + $0x111] sm:$0xff] %vm298_vm0, %v2116_v2  ;;  %v1982_v29 = vmul.f32 %v6543_v20, %v1915_v45  ;;  %v4137_v54 = vadd.f32 %v4136_v4, %v4135_v18  ;;  %v5195_v18 = vpack.i.bf16 %v2180_v24, %v2179_v13  ;;  %v6823_v45 = vpop.permute.xlu1 %4921  ;;  %v2216_v2 = vld [vmem:[#allocation2 + $0xf9] sm:$0xff]  ;;  %v1938_v4 = vpop.f32.mrf.mxu1 }
 0x22c   : > { %4366 = vmatprep.mubr.msk.bf16.mxu0 %vm298_vm0, %v3165_v26 }
 0x22d   : > { %5141 = vrot.lane.b32.xlu0 %v5140_v32, %s5618_s20  ;;  %v2021_v49 = vadd.f32 %v6548_v30, %v1982_v29  ;;  %v1918_v56 = vadd.f32 %v6741_v43, %v4137_v54  ;;  %5151 = vrot.lane.b32.xlu1 %v5135_v50, %s5618_s20  ;;  %v4138_v12 = vpop.f32.mrf.mxu0  ;;  %v6832_v54 = vld [vmem:[#allocation2 + $0xf1] sm:$0xff] }
 0x22f   : > { %vm2053_vm14 = vcmp.ge.f32.partialorder %v2021_v49, 0.0  ;;  %v2085_v57 = vmul.f32 0.01, %v2021_v49  ;;  %v1983_v35 = vmul.f32 %v6543_v20, %v1918_v56  ;;  %v4139_v19 = vpop.f32.mrf.mxu0 }
 0x230   : > { %v4140_v27 = vadd.f32 %v4139_v19, %v4138_v12  ;;  %v6849_v19 = vld [vmem:[%s7516_s4] ss:$0 sm:$0xff] }
 0x231   : > { %5146 = vrot.lane.b32.xlu0 %v5145_v38, %s5616_s12  ;;  %v2117_v59 = vsel %vm2053_vm14, %v2021_v49, %v2085_v57  ;;  %v2022_v34 = vadd.f32 %v6548_v30, %v1983_v35  ;;  %5156 = vrot.lane.b32.xlu1 %v5140_v32, %s5616_s12  ;;  %v4141_v21 = vpop.f32.mrf.mxu0  ;;  %v6838_v49 = vld [vmem:[%s7515_s3] ss:$0 sm:$0xff]  ;;  %v6844_v57 = vpop.permute.xlu1 %4926 }
 0x232   : > { %2149 = vst.msk [vmem:[#allocation2 + $0x121] sm:$0xff] %vm298_vm0, %v2117_v59  ;;  %v1923_v40 = vadd.f32 %v4140_v27, %v1922_v28  ;;  %v6793_v43 = vld [vmem:[#allocation2 + $0x10a] sm:$0xff]  ;;  %v6795_v46 = vld [vmem:[#allocation2 + $0x112] sm:$0xff]  ;;  %v5200_v28 = vpack.i.bf16 %v2216_v2, %v6832_v54  ;;  %v6854_v59 = vpop.permute.xlu0 %4931 }
 0x233   : > { %vm2054_vm15 = vcmp.ge.f32.partialorder %v2022_v34, 0.0  ;;  %v2086_v62 = vmul.f32 0.01, %v2022_v34  ;;  %v4142_v55 = vpop.f32.mrf.mxu0  ;;  %v3168_v44 = vpack.c.bf16 %v6795_v46, %v6793_v43 }
 0x234   : > { %v1984_v5 = vmul.f32 %v6543_v20, %v1923_v40  ;;  %v4143_v16 = vadd.f32 %v4142_v55, %v4141_v21 }
 0x235   : > { %5166 = vrot.lane.b32.xlu0 %v5165_v6, %s5617_s19  ;;  %v2118_v15 = vsel %vm2054_vm15, %v2022_v34, %v2086_v62  ;;  %5161 = vrot.lane.b32.xlu1 %v5145_v38, %s5617_s19  ;;  %v5205_v34 = vpack.i.bf16 %v6773_v51, %v6771_v52  ;;  %v2181_v52 = vld [vmem:[#allocation2 + $0x108] sm:$0xff] }
 0x236   : > { %4367 = vmatmul.mubr.msk.bf16.gmra.mxu0 %vm298_vm0, %v3168_v44  ;;  %2150 = vst.msk [vmem:[#allocation2 + $0x129] sm:$0xff] %vm298_vm0, %v2118_v15  ;;  %v2023_v1 = vadd.f32 %v6548_v30, %v1984_v5  ;;  %v1926_v61 = vadd.f32 %v4143_v16, %v1925_v14  ;;  %v2182_v14 = vld [vmem:[#allocation2 + $0x110] sm:$0xff] }
 0x237   : > { %v5225_v25 = vpack.i.bf16 %v2182_v14, %v2181_v52 }
 0x238   : > { %vm2055_vm1 = vcmp.ge.f32.partialorder %v2023_v1, 0.0  ;;  %v2087_v33 = vmul.f32 0.01, %v2023_v1  ;;  %v1985_v10 = vmul.f32 %v6543_v20, %v1926_v61  ;;  %v4144_v11 = vpop.f32.mrf.mxu0 }
 0x239   : > { %5171 = vrot.lane.b32.xlu0 %v5170_v63, %s5618_s20  ;;  %5181 = vrot.lane.b32.xlu1 %v5165_v6, %s5618_s20 }
 0x23a   : > { %v2119_v3 = vsel %vm2055_vm1, %v2023_v1, %v2087_v33  ;;  %v2024_v9 = vadd.f32 %v6548_v30, %v1985_v10  ;;  %v4145_v48 = vpop.f32.mrf.mxu0  ;;  %v6872_v1 = vld [vmem:[#allocation2 + $0x111] sm:$0xff]  ;;  %v4924_v10 = vunpack.i.h.bf16 %v6823_v45 }
 0x23b   : > { %2151 = vst.msk [vmem:[#allocation2 + $0x139] sm:$0xff] %vm298_vm0, %v2119_v3  ;;  %v4146_v53 = vadd.f32 %v4145_v48, %v4144_v11  ;;  %v4923_v11 = vunpack.i.l.bf16 %v6823_v45  ;;  %v2160_v48 = vld [vmem:[#allocation2 + $0x8] sm:$0xff] }
 0x23c   : > { %vm2056_vm2 = vcmp.ge.f32.partialorder %v2024_v9, 0.0  ;;  %v2088_v17 = vmul.f32 0.01, %v2024_v9  ;;  %v4147_v23 = vpop.f32.mrf.mxu0  ;;  %v2948_v45 = vsel %vm298_vm0, %v2160_v48, %v4924_v10 }
 0x23d   : > { %5176 = vrot.lane.b32.xlu0 %v5175_v37, %s5616_s12  ;;  %v1931_v7 = vadd.f32 %v6766_v22, %v4146_v53  ;;  %5186 = vrot.lane.b32.xlu1 %v5170_v63, %s5616_s12  ;;  %v6817_v50 = vld [vmem:[#allocation2 + $0x122] sm:$0xff]  ;;  %v6819_v8 = vld [vmem:[#allocation2 + $0x12a] sm:$0xff] }
 0x23e   : > { %v2120_v0 = vsel %vm2056_vm2, %v2024_v9, %v2088_v17  ;;  %v4148_v47 = vpop.f32.mrf.mxu0  ;;  %v3171_v39 = vpack.c.bf16 %v6819_v8, %v6817_v50  ;;  %v6879_v9 = vld [vmem:[#allocation2 + $0x109] sm:$0xff] }
 0x23f   : > { %2152 = vst.msk [vmem:[#allocation2 + $0x141] sm:$0xff] %vm298_vm0, %v2120_v0  ;;  %v1986_v36 = vmul.f32 %v6543_v20, %v1931_v7  ;;  %v4149_v22 = vadd.f32 %v4148_v47, %v4147_v23  ;;  %v5230_v7 = vpack.i.bf16 %v6872_v1, %v6879_v9  ;;  %v4929_v0 = vunpack.i.h.bf16 %v6844_v57 }
 0x240   : > { %4370 = vmatprep.mubr.msk.bf16.mxu0 %vm298_vm0, %v3171_v39  ;;  %v4928_v47 = vunpack.i.l.bf16 %v6844_v57  ;;  %v2184_v57 = vld [vmem:[#allocation2 + $0x128] sm:$0xff] }
 0x241   : > { %5196 = vrot.lane.b32.xlu0 %v5195_v18, %s5617_s19  ;;  %v2025_v26 = vadd.f32 %v6548_v30, %v1986_v36  ;;  %v1934_v32 = vadd.f32 %v6787_v31, %v4149_v22  ;;  %5191 = vrot.lane.b32.xlu1 %v5175_v37, %s5617_s19  ;;  %v4150_v29 = vpop.f32.mrf.mxu0  ;;  %v6841_v30 = vpop.f32.mrf.mxu1  ;;  %v2159_v37 = vld [vmem:[#allocation2] sm:$0xff] }
 0x242   : > { %v2947_v36 = vsel %vm298_vm0, %v2159_v37, %v4923_v11 }
 0x243   : > { %vm2057_vm5 = vcmp.ge.f32.partialorder %v2025_v26, 0.0  ;;  %v2089_v20 = vmul.f32 0.01, %v2025_v26  ;;  %v1987_v56 = vmul.f32 %v6838_v49, %v1934_v32  ;;  %v4151_v12 = vpop.f32.mrf.mxu0  ;;  %v1941_v62 = vpop.f32.mrf.mxu1 }
 0x244   : > { %v4152_v38 = vadd.f32 %v4151_v12, %v4150_v29 }
 0x245   : > { %5201 = vrot.lane.b32.xlu0 %v5200_v28, %s5618_s20  ;;  %v2121_v35 = vsel %vm2057_vm5, %v2025_v26, %v2089_v20  ;;  %v2026_v31 = vadd.f32 %v6849_v19, %v1987_v56  ;;  %5211 = vrot.lane.b32.xlu1 %v5195_v18, %s5618_s20  ;;  %v4153_v58 = vpop.f32.mrf.mxu0  ;;  %v5235_v56 = vpack.i.bf16 %v6795_v46, %v6793_v43 }
 0x246   : > { %2153 = vst.msk [vmem:[#allocation2 + $0x151] sm:$0xff] %vm298_vm0, %v2121_v35  ;;  %v1939_v27 = vadd.f32 %v4152_v38, %v1938_v4  ;;  %v6858_v21 = vld [vmem:[#allocation2 + $0x13a] sm:$0xff]  ;;  %v6860_v41 = vld [vmem:[#allocation2 + $0x142] sm:$0xff]  ;;  %v2979_v35 = vsel %vm1229_vm3, %v2947_v36, %v4928_v47 }
 0x247   : > { %vm2058_vm6 = vcmp.ge.f32.partialorder %v2026_v31, 0.0  ;;  %v2090_v40 = vmul.f32 0.01, %v2026_v31  ;;  %v4154_v6 = vpop.f32.mrf.mxu0  ;;  %v3174_v55 = vpack.c.bf16 %v6860_v41, %v6858_v21 }
 0x248   : > { %v1988_v44 = vmul.f32 %v6838_v49, %v1939_v27  ;;  %v4155_v60 = vadd.f32 %v4154_v6, %v4153_v58  ;;  %v5474_v6 = vld [vmem:[#allocation2 + $0x21] sm:$0xff] }
 0x249   : > { %5206 = vrot.lane.b32.xlu0 %v5205_v34, %s5616_s12  ;;  %v2122_v5 = vsel %vm2058_vm6, %v2026_v31, %v2090_v40  ;;  %5216 = vrot.lane.b32.xlu1 %v5200_v28, %s5616_s12  ;;  %v2980_v31 = vsel %vm1229_vm3, %v2948_v45, %v4929_v0  ;;  %v6913_v40 = vld [vmem:[#allocation2 + $0x120] sm:$0xff] }
 0x24a   : > { %4371 = vmatmul.mubr.msk.bf16.gmra.mxu0 %vm298_vm0, %v3174_v55  ;;  %2154 = vst.msk [vmem:[#allocation2 + $0x159] sm:$0xff] %vm298_vm0, %v2122_v5  ;;  %v2027_v51 = vadd.f32 %v6849_v19, %v1988_v44  ;;  %v1942_v16 = vadd.f32 %v4155_v60, %v1941_v62  ;;  %v4937_v3 = vpop.permute.xlu0 %4936  ;;  %v5255_v60 = vpack.i.bf16 %v2184_v57, %v6913_v40  ;;  %v5476_v57 = vld [vmem:[#allocation2 + $0x18] sm:$0xff] }
 0x24b   : > { %v6870_v15 = vpop.permute.xlu1 %4941  ;;  %v4939_v32 = vunpack.i.h.bf16 %v4937_v3  ;;  %v4938_v58 = vunpack.i.l.bf16 %v4937_v3 }
 0x24c   : > { %vm2059_vm7 = vcmp.ge.f32.partialorder %v2027_v51, 0.0  ;;  %v2091_v61 = vmul.f32 0.01, %v2027_v51  ;;  %v1989_v63 = vmul.f32 %v6838_v49, %v1942_v16  ;;  %v4156_v33 = vpop.f32.mrf.mxu0  ;;  %v4944_v55 = vunpack.i.h.bf16 %v6870_v15  ;;  %v6922_v16 = vld [vmem:[#allocation2 + $0x129] sm:$0xff] }
 0x24d   : > { %5226 = vrot.lane.b32.xlu0 %v5225_v25, %s5617_s19  ;;  %5221 = vrot.lane.b32.xlu1 %v5205_v34, %s5617_s19  ;;  %v3044_v62 = vsel %vm298_vm0, %v5474_v6, %v4939_v32  ;;  %v4943_v14 = vunpack.i.l.bf16 %v6870_v15 }
 0x24e   : > { %v2123_v53 = vsel %vm2059_vm7, %v2027_v51, %v2091_v61  ;;  %v2028_v24 = vadd.f32 %v6849_v19, %v1989_v63  ;;  %v4157_v17 = vpop.f32.mrf.mxu0  ;;  %v3012_v48 = vsel %vm1262_vm4, %v2980_v31, %v4944_v55 }
 0x24f   : > { %v6882_v23 = vpop.permute.xlu1 %4946  ;;  %2155 = vst.msk [vmem:[#allocation2 + $0x169] sm:$0xff] %vm298_vm0, %v2123_v53  ;;  %v4158_v13 = vadd.f32 %v4157_v17, %v4156_v33  ;;  %v3011_v37 = vsel %vm1262_vm4, %v2979_v35, %v4943_v14 }
 0x250   : > { %vm2060_vm8 = vcmp.ge.f32.partialorder %v2028_v24, 0.0  ;;  %v2092_v39 = vmul.f32 0.01, %v2028_v24  ;;  %v4159_v18 = vpop.f32.mrf.mxu0  ;;  %v4948_v47 = vunpack.i.l.bf16 %v6882_v23  ;;  %v3139_v45 = vpack.c.bf16 %v3012_v48, %v3011_v37 }
 0x251   : > { %5231 = vrot.lane.b32.xlu0 %v5230_v7, %s5618_s20  ;;  %v1947_v22 = vadd.f32 %v6812_v42, %v4158_v13  ;;  %5241 = vrot.lane.b32.xlu1 %v5225_v25, %s5618_s20  ;;  %v6894_v2 = vld [vmem:[#allocation2 + $0x152] sm:$0xff]  ;;  %v6896_v4 = vld [vmem:[#allocation2 + $0x15a] sm:$0xff]  ;;  %v4949_v36 = vunpack.i.h.bf16 %v6882_v23 }
 0x252   : > { %v2124_v26 = vsel %vm2060_vm8, %v2028_v24, %v2092_v39  ;;  %v4160_v29 = vpop.f32.mrf.mxu0  ;;  %v3177_v20 = vpack.c.bf16 %v6896_v4, %v6894_v2  ;;  %v5475_v25 = vld [vmem:[#allocation2 + $0x19] sm:$0xff]  ;;  %v2949_v35 = vsel %vm298_vm0, %v5476_v57, %v4948_v47 }
 0x253   : > { %v4957_v28 = vpop.permute.xlu0 %4956  ;;  %2156 = vst.msk [vmem:[#allocation2 + $0x171] sm:$0xff] %vm298_vm0, %v2124_v26  ;;  %v1990_v42 = vmul.f32 %v6838_v49, %v1947_v22  ;;  %v4161_v12 = vadd.f32 %v4160_v29, %v4159_v18  ;;  %v6904_v38 = vpop.permute.xlu1 %4951  ;;  %v3043_v61 = vsel %vm298_vm0, %v5475_v25, %v4938_v58 }
 0x254   : > { %v4959_v27 = vunpack.i.h.bf16 %v4957_v28  ;;  %4374 = vmatprep.mubr.msk.bf16.mxu0 %vm298_vm0, %v3177_v20  ;;  %v4958_v34 = vunpack.i.l.bf16 %v4957_v28  ;;  %v4953_v26 = vunpack.i.l.bf16 %v6904_v38  ;;  %v4954_v32 = vunpack.i.h.bf16 %v6904_v38 }
 0x255   : > { %5236 = vrot.lane.b32.xlu0 %v5235_v56, %s5616_s12  ;;  %v2029_v43 = vadd.f32 %v6849_v19, %v1990_v42  ;;  %v1950_v46 = vadd.f32 %v6841_v30, %v4161_v12  ;;  %5246 = vrot.lane.b32.xlu1 %v5230_v7, %s5616_s12  ;;  %v5265_v20 = vpack.i.bf16 %v6819_v8, %v6817_v50  ;;  %v6960_v12 = vld [vmem:[#allocation2 + $0x140] sm:$0xff]  ;;  %v5477_v50 = vld [vmem:[%s7514_s2 + $0x88] sm:$0xff]  }
 0x256   : > { %v3076_v63 = vsel %vm1229_vm3, %v3044_v62, %v4959_v27  ;;  %v3075_v11 = vsel %vm1229_vm3, %v3043_v61, %v4958_v34  ;;  %v5478_v8 = vld [vmem:[#allocation2 + $0x20] sm:$0xff] }
 0x257   : > { %v4962_v44 = vpop.permute.xlu0 %4961  ;;  %vm2061_vm9 = vcmp.ge.f32.partialorder %v2029_v43, 0.0  ;;  %v2093_v5 = vmul.f32 0.01, %v2029_v43  ;;  %v1991_v52 = vmul.f32 %v6838_v49, %v1950_v46  ;;  %v6920_v51 = vpop.permute.xlu1 %4971  ;;  %v6930_v49 = vld [vmem:[#allocation2 + $0x121] sm:$0xff]  ;;  %v2950_v27 = vsel %vm298_vm0, %v5478_v8, %v4949_v36  ;;  %v6971_v46 = vld [vmem:[#allocation2 + $0x138] sm:$0xff] }
 0x258   : > { %v4964_v30 = vunpack.i.h.bf16 %v4962_v44  ;;  %v4963_v33 = vunpack.i.l.bf16 %v4962_v44  ;;  %v5260_v24 = vpack.i.bf16 %v6922_v16, %v6930_v49  ;;  %v4973_v29 = vunpack.i.l.bf16 %v6920_v51  ;;  %v5479_v34 = vld [vmem:[%s7514_s2 + $0x80] sm:$0xff]  }
 0x259   : > { %5256 = vrot.lane.b32.xlu0 %v5255_v60, %s5617_s19  ;;  %v2125_v15 = vsel %vm2061_vm9, %v2029_v43, %v2093_v5  ;;  %v2030_v10 = vadd.f32 %v6849_v19, %v1991_v52  ;;  %5251 = vrot.lane.b32.xlu1 %v5235_v56, %s5617_s19  ;;  %v4974_v38 = vunpack.i.h.bf16 %v6920_v51  ;;  %v2981_v43 = vsel %vm1229_vm3, %v2949_v35, %v4953_v26  ;;  %v5480_v44 = vld [vmem:[#allocation2 + $0x39] sm:$0xff]  ;;  %v5481_v5 = vld [vmem:[#allocation2 + $0x31] sm:$0xff]  ;;  %v6982_v61 = vld [vmem:[#allocation2 + $0x141] sm:$0xff] }
 0x25a   : > { %v3108_v3 = vsel %vm1262_vm4, %v3076_v63, %v4964_v30  ;;  %2157 = vst.msk [vmem:[#allocation2 + $0x181] sm:$0xff] %vm298_vm0, %v2125_v15  ;;  %v3107_v19 = vsel %vm1262_vm4, %v3075_v11, %v4963_v33  ;;  %v6939_v17 = vld [vmem:[#allocation2 + $0x16a] sm:$0xff]  ;;  %v6941_v7 = vld [vmem:[#allocation2 + $0x172] sm:$0xff]  ;;  %v2982_v6 = vsel %vm1229_vm3, %v2950_v27, %v4954_v32  ;;  %v5285_v55 = vpack.i.bf16 %v6960_v12, %v6971_v46 }
 0x25b   : > { %v4967_v53 = vpop.permute.xlu0 %4966  ;;  %vm2062_vm10 = vcmp.ge.f32.partialorder %v2030_v10, 0.0  ;;  %v2094_v13 = vmul.f32 0.01, %v2030_v10  ;;  %v6943_v0 = vpop.permute.xlu1 %4976  ;;  %v3140_v39 = vpack.c.bf16 %v3108_v3, %v3107_v19  ;;  %v3180_v18 = vpack.c.bf16 %v6941_v7, %v6939_v17 }
 0x25c   : > { %v4969_v56 = vunpack.i.h.bf16 %v4967_v53  ;;  %v4968_v23 = vunpack.i.l.bf16 %v4967_v53  ;;  %v3013_v14 = vsel %vm1262_vm4, %v2981_v43, %v4973_v29  ;;  %v3014_v15 = vsel %vm1262_vm4, %v2982_v6, %v4974_v38  ;;  %v5482_v38 = vld [vmem:[#allocation2 + $0x38] sm:$0xff]  ;;  %v5485_v6 = vld [vmem:[#allocation2 + $0x49] sm:$0xff] }
 0x25d   : > { %5261 = vrot.lane.b32.xlu0 %v5260_v24, %s5618_s20  ;;  %v2126_v22 = vsel %vm2062_vm10, %v2030_v10, %v2094_v13  ;;  %5271 = vrot.lane.b32.xlu1 %v5255_v60, %s5618_s20  ;;  %v6989_v10 = vld [vmem:[#allocation2 + $0x139] sm:$0xff]  ;;  %v3142_v47 = vpack.c.bf16 %v3014_v15, %v3013_v14  ;;  %v5295_v32 = vpack.i.bf16 %v6860_v41, %v6858_v21  ;;  %v7019_v21 = vld [vmem:[#allocation2 + $0x150] sm:$0xff] }
 0x25e   : > { %2158 = vst.msk [vmem:[#allocation2 + $0x189] sm:$0xff] %vm298_vm0, %v2126_v22  ;;  %3411 = vmatprep.mubr.bf16.mxu1 %v3140_v39  ;;  %4375 = vmatmul.mubr.msk.bf16.gmra.mxu0 %vm298_vm0, %v3180_v18  ;;  %v3046_v60 = vsel %vm298_vm0, %v5480_v44, %v4969_v56  ;;  %v3045_v52 = vsel %vm298_vm0, %v5481_v5, %v4968_v23  ;;  %v4979_v39 = vunpack.i.h.bf16 %v6943_v0  ;;  %v4978_v18 = vunpack.i.l.bf16 %v6943_v0  ;;  %v7013_v56 = vld [vmem:[#allocation2 + $0x158] sm:$0xff] }
 0x25f   : > { %v4987_v28 = vpop.permute.xlu0 %4986  ;;  %3412 = vmatmul.mubr.bf16.vlgmr.msra.gmra.mxu1 %v3139_v45  ;;  %v6958_v42 = vpop.permute.xlu1 %4981  ;;  %v5290_v37 = vpack.i.bf16 %v6982_v61, %v6989_v10  ;;  %v5315_v27 = vpack.i.bf16 %v7013_v56, %v7019_v21  ;;  %v5484_v43 = vld [vmem:[#allocation2 + $0x51] sm:$0xff] }
 0x260   : > { %v4989_v31 = vunpack.i.h.bf16 %v4987_v28  ;;  %v4988_v58 = vunpack.i.l.bf16 %v4987_v28  ;;  %4384 = vmatpush3.bf16.msra.mxu1 %v5477_v50  ;;  %v4984_v36 = vunpack.i.h.bf16 %v6958_v42  ;;  %v4983_v22 = vunpack.i.l.bf16 %v6958_v42  ;;  %v5483_v42 = vld [vmem:[#allocation2 + $0x30] sm:$0xff] }
 0x261   : > { %5266 = vrot.lane.b32.xlu0 %v5265_v20, %s5616_s12  ;;  %5276 = vrot.lane.b32.xlu1 %v5260_v24, %s5616_s12 }
 0x262   : > { %4383 = vmatprep.subr.bf16.mxu1 %v5479_v34  ;;  %v3077_v63 = vsel %vm1229_vm3, %v3045_v52, %v4988_v58  ;;  %v3078_v33 = vsel %vm1229_vm3, %v3046_v60, %v4989_v31  ;;  %v2952_v31 = vsel %vm298_vm0, %v5482_v38, %v4979_v39  ;;  %v2951_v58 = vsel %vm298_vm0, %v5483_v42, %v4978_v18  ;;  %v7027_v60 = vld [vmem:[#allocation2 + $0x159] sm:$0xff] }
 0x263   : > { %v4992_v62 = vpop.permute.xlu0 %4991  ;;  %v5002_v25 = vpop.permute.xlu1 %5001  ;;  %v2983_v41 = vsel %vm1229_vm3, %v2951_v58, %v4983_v22  ;;  %v2984_v50 = vsel %vm1229_vm3, %v2952_v31, %v4984_v36  ;;  %v5325_v22 = vpack.i.bf16 %v6896_v4, %v6894_v2  ;;  %v7059_v2 = vld [vmem:[#allocation2 + $0x168] sm:$0xff] }
 0x264   : > { %v4994_v30 = vunpack.i.h.bf16 %v4992_v62  ;;  %v4993_v51 = vunpack.i.l.bf16 %v4992_v62  ;;  %4385 = vmatpush3.bf16.msra.mxu1 %v5479_v34  ;;  %v5004_v0 = vunpack.i.h.bf16 %v5002_v25  ;;  %v5003_v23 = vunpack.i.l.bf16 %v5002_v25  ;;  %v7035_v25 = vld [vmem:[#allocation2 + $0x151] sm:$0xff] }
 0x265   : > { %5286 = vrot.lane.b32.xlu0 %v5285_v55, %s5617_s19  ;;  %5281 = vrot.lane.b32.xlu1 %v5265_v20, %s5617_s19  ;;  %v6995_v24 = vld [vmem:[#allocation2 + $0x182] sm:$0xff]  ;;  %v6997_v19 = vld [vmem:[#allocation2 + $0x18a] sm:$0xff] }
 0x266   : > { %v3109_v11 = vsel %vm1262_vm4, %v3077_v63, %v4993_v51  ;;  %v3110_v3 = vsel %vm1262_vm4, %v3078_v33, %v4994_v30  ;;  %v3183_v45 = vpack.c.bf16 %v6997_v19, %v6995_v24  ;;  %v3015_v30 = vsel %vm1262_vm4, %v2983_v41, %v5003_v23 }
 0x267   : > { %v4997_v48 = vpop.permute.xlu0 %4996  ;;  %v3143_v53 = vpack.c.bf16 %v3110_v3, %v3109_v11  ;;  %v6999_v13 = vpop.permute.xlu1 %5006  ;;  %v3016_v51 = vsel %vm1262_vm4, %v2984_v50, %v5004_v0  ;;  %v5320_v11 = vpack.i.bf16 %v7027_v60, %v7035_v25  ;;  %v5488_v50 = vld [vmem:[#allocation2 + $0x69] sm:$0xff] }
 0x268   : > { %v4999_v29 = vunpack.i.h.bf16 %v4997_v48  ;;  %v4998_v28 = vunpack.i.l.bf16 %v4997_v48 }
 0x269   : > { %5291 = vrot.lane.b32.xlu0 %v5290_v37, %s5618_s20  ;;  %3419 = vmatprep.mubr.bf16.mxu1 %v3143_v53  ;;  %v5009_v53 = vunpack.i.h.bf16 %v6999_v13 }
 0x26a   : > { %5301 = vrot.lane.b32.xlu1 %v5285_v55, %s5618_s20  ;;  %3420 = vmatmul.mubr.bf16.gmra.mxu1 %v3142_v47  ;;  %v3048_v34 = vsel %vm298_vm0, %v5484_v43, %v4999_v29  ;;  %v3047_v62 = vsel %vm298_vm0, %v5485_v6, %v4998_v28  ;;  %v5008_v47 = vunpack.i.l.bf16 %v6999_v13  ;;  %v7053_v28 = vld [vmem:[#allocation2 + $0x170] sm:$0xff] }
 0x26b   : > { %v5017_v26 = vpop.permute.xlu0 %5016  ;;  %v7011_v20 = vpop.permute.xlu1 %5011  ;;  %v5345_v41 = vpack.i.bf16 %v7053_v28, %v7059_v2 }
 0x26c   : > { %v5019_v57 = vunpack.i.h.bf16 %v5017_v26  ;;  %v5018_v35 = vunpack.i.l.bf16 %v5017_v26  ;;  %v5014_v39 = vunpack.i.h.bf16 %v7011_v20  ;;  %v5013_v18 = vunpack.i.l.bf16 %v7011_v20  ;;  %v5487_v20 = vld [vmem:[#allocation2 + $0x48] sm:$0xff] }
 0x26d   : > { %5296 = vrot.lane.b32.xlu0 %v5295_v32, %s5616_s12  ;;  %v2953_v31 = vsel %vm298_vm0, %v5487_v20, %v5008_v47 }
 0x26e   : > { %5306 = vrot.lane.b32.xlu1 %v5290_v37, %s5616_s12  ;;  %v3079_v5 = vsel %vm1229_vm3, %v3047_v62, %v5018_v35  ;;  %v3080_v52 = vsel %vm1229_vm3, %v3048_v34, %v5019_v57  ;;  %v3145_v37 = vpack.c.bf16 %v3016_v51, %v3015_v30  ;;  %v5486_v35 = vld [vmem:[#allocation2 + $0x50] sm:$0xff]  ;;  %v2985_v4 = vsel %vm1229_vm3, %v2953_v31, %v5013_v18  ;;  %v5491_v31 = vld [vmem:[#allocation2 + $0x60] sm:$0xff] }
 0x26f   : > { %v5022_v8 = vpop.permute.xlu0 %5021  ;;  %v5032_v44 = vpop.permute.xlu1 %5031  ;;  %v2954_v38 = vsel %vm298_vm0, %v5486_v35, %v5009_v53  ;;  %v7075_v30 = vld [vmem:[#allocation2 + $0x169] sm:$0xff] }
 0x270   : > { %v5024_v55 = vunpack.i.h.bf16 %v5022_v8  ;;  %v5023_v14 = vunpack.i.l.bf16 %v5022_v8  ;;  %v5034_v0 = vunpack.i.h.bf16 %v5032_v44  ;;  %v5033_v23 = vunpack.i.l.bf16 %v5032_v44 }
 0x271   : > { %5316 = vrot.lane.b32.xlu0 %v5315_v27, %s5617_s19  ;;  %v2986_v42 = vsel %vm1229_vm3, %v2954_v38, %v5014_v39  ;;  %v5490_v38 = vld [vmem:[#allocation2 + $0x68] sm:$0xff] }
 0x272   : > { %5311 = vrot.lane.b32.xlu1 %v5295_v32, %s5617_s19  ;;  %v3111_v63 = vsel %vm1262_vm4, %v3079_v5, %v5023_v14  ;;  %v3112_v33 = vsel %vm1262_vm4, %v3080_v52, %v5024_v55  ;;  %v7067_v55 = vld [vmem:[#allocation2 + $0x171] sm:$0xff]  ;;  %v3017_v5 = vsel %vm1262_vm4, %v2985_v4, %v5033_v23  ;;  %v3018_v52 = vsel %vm1262_vm4, %v2986_v42, %v5034_v0  ;;  %v2192_v23 = vld [vmem:[#allocation2 + $0x188] sm:$0xff] }
 0x273   : > { %v5027_v15 = vpop.permute.xlu0 %5026  ;;  %v3146_v3 = vpack.c.bf16 %v3112_v33, %v3111_v63  ;;  %v7041_v48 = vpop.permute.xlu1 %5036 }
 0x274   : > { %v5029_v26 = vunpack.i.h.bf16 %v5027_v15  ;;  %v5028_v32 = vunpack.i.l.bf16 %v5027_v15  ;;  %v5350_v15 = vpack.i.bf16 %v7067_v55, %v7075_v30  ;;  %v5039_v53 = vunpack.i.h.bf16 %v7041_v48 }
 0x275   : > { %5321 = vrot.lane.b32.xlu0 %v5320_v11, %s5618_s20  ;;  %3427 = vmatprep.mubr.bf16.mxu1 %v3146_v3  ;;  %v5038_v47 = vunpack.i.l.bf16 %v7041_v48 }
 0x276   : > { %5331 = vrot.lane.b32.xlu1 %v5315_v27, %s5618_s20  ;;  %3428 = vmatmul.mubr.bf16.gmra.mxu1 %v3145_v37  ;;  %v3050_v8 = vsel %vm298_vm0, %v5488_v50, %v5029_v26  ;;  %v5489_v27 = vld [vmem:[#allocation2 + $0x61] sm:$0xff]  ;;  %v3148_v37 = vpack.c.bf16 %v3018_v52, %v3017_v5  ;;  %v2956_v20 = vsel %vm298_vm0, %v5490_v38, %v5039_v53 }
 0x277   : > { %v5047_v36 = vpop.permute.xlu0 %5046  ;;  %v7051_v29 = vpop.permute.xlu1 %5041  ;;  %v3049_v43 = vsel %vm298_vm0, %v5489_v27, %v5028_v32 }
 0x278   : > { %v5049_v13 = vunpack.i.h.bf16 %v5047_v36  ;;  %v5048_v57 = vunpack.i.l.bf16 %v5047_v36  ;;  %v5044_v39 = vunpack.i.h.bf16 %v7051_v29  ;;  %v5043_v18 = vunpack.i.l.bf16 %v7051_v29 }
 0x279   : > { %5326 = vrot.lane.b32.xlu0 %v5325_v22, %s5616_s12  ;;  %v2955_v29 = vsel %vm298_vm0, %v5491_v31, %v5038_v47 }
 0x27a   : > { %5336 = vrot.lane.b32.xlu1 %v5320_v11, %s5616_s12  ;;  %v3081_v14 = vsel %vm1229_vm3, %v3049_v43, %v5048_v57  ;;  %v3082_v44 = vsel %vm1229_vm3, %v3050_v8, %v5049_v13  ;;  %v2988_v4 = vsel %vm1229_vm3, %v2956_v20, %v5044_v39  ;;  %v5493_v8 = vld [vmem:[#allocation2 + $0x79] sm:$0xff] }
 0x27b   : > { %v5052_v58 = vpop.permute.xlu0 %5051  ;;  %v5062_v62 = vpop.permute.xlu1 %5061  ;;  %v2229_v39 = vld [vmem:[#allocation2 + $0x199] sm:$0xff] }
 0x27c   : > { %v5054_v34 = vunpack.i.h.bf16 %v5052_v58  ;;  %v5053_v6 = vunpack.i.l.bf16 %v5052_v58  ;;  %v5064_v13 = vunpack.i.h.bf16 %v5062_v62  ;;  %v5063_v57 = vunpack.i.l.bf16 %v5062_v62  ;;  %v7101_v62 = vld [vmem:[#allocation2 + $0x189] sm:$0xff] }
 0x27d   : > { %5346 = vrot.lane.b32.xlu0 %v5345_v41, %s5617_s19 }
 0x27e   : > { %5341 = vrot.lane.b32.xlu1 %v5325_v22, %s5617_s19  ;;  %v3113_v51 = vsel %vm1262_vm4, %v3081_v14, %v5053_v6  ;;  %v3114_v63 = vsel %vm1262_vm4, %v3082_v44, %v5054_v34  ;;  %v5355_v22 = vpack.i.bf16 %v6941_v7, %v6939_v17  ;;  %v2191_v17 = vld [vmem:[#allocation2 + $0x180] sm:$0xff]  ;;  %v2987_v7 = vsel %vm1229_vm3, %v2955_v29, %v5043_v18 }
 0x27f   : > { %v5057_v33 = vpop.permute.xlu0 %5056  ;;  %v3149_v11 = vpack.c.bf16 %v3114_v63, %v3113_v51  ;;  %v7081_v3 = vpop.permute.xlu1 %5066  ;;  %v5375_v58 = vpack.i.bf16 %v2192_v23, %v2191_v17  ;;  %v3019_v5 = vsel %vm1262_vm4, %v2987_v7, %v5063_v57  ;;  %v3020_v52 = vsel %vm1262_vm4, %v2988_v4, %v5064_v13  ;;  %v7109_v51 = vld [vmem:[#allocation2 + $0x181] sm:$0xff]  ;;  %v5495_v4 = vld [vmem:[#allocation2 + $0x78] sm:$0xff] }
 0x280   : > { %v5059_v26 = vunpack.i.h.bf16 %v5057_v33  ;;  %v5058_v32 = vunpack.i.l.bf16 %v5057_v33  ;;  %v3151_v47 = vpack.c.bf16 %v3020_v52, %v3019_v5  ;;  %v2230_v18 = vld [vmem:[#allocation2 + $0x1a1] sm:$0xff]  ;;  %v5385_v13 = vpack.i.bf16 %v6997_v19, %v6995_v24 }
 0x281   : > { %5351 = vrot.lane.b32.xlu0 %v5350_v15, %s5618_s20  ;;  %3435 = vmatprep.mubr.bf16.mxu1 %v3149_v11  ;;  %v5380_v11 = vpack.i.bf16 %v7101_v62, %v7109_v51  ;;  %v5390_v38 = vpack.i.bf16 %v2230_v18, %v2229_v39 }
 0x282   : > { %5361 = vrot.lane.b32.xlu1 %v5345_v41, %s5618_s20  ;;  %3436 = vmatmul.mubr.bf16.gmra.mxu1 %v3148_v37  ;;  %v5492_v41 = vld [vmem:[#allocation2 + $0x81] sm:$0xff]  ;;  %v3051_v27 = vsel %vm298_vm0, %v5493_v8, %v5058_v32 }
 0x283   : > { %v5077_v36 = vpop.permute.xlu0 %5076  ;;  %v7091_v0 = vpop.permute.xlu1 %5071  ;;  %v3052_v50 = vsel %vm298_vm0, %v5492_v41, %v5059_v26 }
 0x284   : > { %v5079_v35 = vunpack.i.h.bf16 %v5077_v36  ;;  %v5078_v48 = vunpack.i.l.bf16 %v5077_v36  ;;  %v5069_v36 = vunpack.i.h.bf16 %v7081_v3  ;;  %v5074_v26 = vunpack.i.h.bf16 %v7091_v0 }
 0x285   : > { %5356 = vrot.lane.b32.xlu0 %v5355_v22, %s5616_s12  ;;  %v5073_v32 = vunpack.i.l.bf16 %v7091_v0 }
 0x286   : > { %5366 = vrot.lane.b32.xlu1 %v5350_v15, %s5616_s12  ;;  %v3083_v14 = vsel %vm1229_vm3, %v3051_v27, %v5078_v48  ;;  %v3084_v44 = vsel %vm1229_vm3, %v3052_v50, %v5079_v35  ;;  %v5496_v50 = vld [vmem:[#allocation2 + $0x99] sm:$0xff]  ;;  %v5497_v27 = vld [vmem:[#allocation2 + $0x91] sm:$0xff] }
 0x287   : > { %v5082_v42 = vpop.permute.xlu0 %5081  ;;  %v5092_v6 = vpop.permute.xlu1 %5091 }
 0x288   : > { %v5084_v43 = vunpack.i.h.bf16 %v5082_v42  ;;  %v5083_v34 = vunpack.i.l.bf16 %v5082_v42  ;;  %v5094_v20 = vunpack.i.h.bf16 %v5092_v6  ;;  %v5093_v31 = vunpack.i.l.bf16 %v5092_v6 }
 0x289   : > { %5376 = vrot.lane.b32.xlu0 %v5375_v58, %s5617_s19 }
 0x28a   : > { %5371 = vrot.lane.b32.xlu1 %v5355_v22, %s5617_s19  ;;  %v3115_v63 = vsel %vm1262_vm4, %v3083_v14, %v5083_v34  ;;  %v3116_v33 = vsel %vm1262_vm4, %v3084_v44, %v5084_v43  ;;  %v5068_v22 = vunpack.i.l.bf16 %v7081_v3  ;;  %v5494_v3 = vld [vmem:[#allocation2 + $0x80] sm:$0xff] }
 0x28b   : > { %v5087_v15 = vpop.permute.xlu0 %5086  ;;  %v3152_v37 = vpack.c.bf16 %v3116_v33, %v3115_v63  ;;  %v7115_v53 = vpop.permute.xlu1 %5096  ;;  %v2958_v7 = vsel %vm298_vm0, %v5494_v3, %v5069_v36  ;;  %v5499_v3 = vld [vmem:[#allocation2 + $0x90] sm:$0xff] }
 0x28c   : > { %v5089_v57 = vunpack.i.h.bf16 %v5087_v15  ;;  %v5088_v35 = vunpack.i.l.bf16 %v5087_v15  ;;  %v2957_v0 = vsel %vm298_vm0, %v5495_v4, %v5068_v22  ;;  %v5099_v18 = vunpack.i.h.bf16 %v7115_v53 }
 0x28d   : > { %5381 = vrot.lane.b32.xlu0 %v5380_v11, %s5618_s20  ;;  %3443 = vmatprep.mubr.bf16.mxu1 %v3152_v37  ;;  %v2989_v42 = vsel %vm1229_vm3, %v2957_v0, %v5073_v32  ;;  %v5098_v36 = vunpack.i.l.bf16 %v7115_v53 }
 0x28e   : > { %5396 = vrot.lane.b32.xlu1 %v5375_v58, %s5618_s20  ;;  %3444 = vmatmul.mubr.bf16.gmra.mxu1 %v3151_v47  ;;  %v2990_v58 = vsel %vm1229_vm3, %v2958_v7, %v5074_v26  ;;  %v3054_v8 = vsel %vm298_vm0, %v5496_v50, %v5089_v57  ;;  %v3053_v43 = vsel %vm298_vm0, %v5497_v27, %v5088_v35 }
 0x28f   : > { %v5107_v23 = vpop.permute.xlu0 %5106  ;;  %v5102_v48 = vpop.permute.xlu1 %5101  ;;  %v3021_v52 = vsel %vm1262_vm4, %v2989_v42, %v5093_v31  ;;  %v3022_v63 = vsel %vm1262_vm4, %v2990_v58, %v5094_v20  ;;  %v2959_v7 = vsel %vm298_vm0, %v5499_v3, %v5098_v36  ;;  %v5501_v58 = vld [vmem:[#allocation2 + $0xa9] sm:$0xff] }
 0x290   : > { %v5109_v29 = vunpack.i.h.bf16 %v5107_v23  ;;  %v5108_v17 = vunpack.i.l.bf16 %v5107_v23  ;;  %v3154_v39 = vpack.c.bf16 %v3022_v63, %v3021_v52  ;;  %v5104_v22 = vunpack.i.h.bf16 %v5102_v48 }
 0x291   : > { %5386 = vrot.lane.b32.xlu0 %v5385_v13, %s5616_s12  ;;  %v5103_v26 = vunpack.i.l.bf16 %v5102_v48  ;;  %v5500_v48 = vld [vmem:[#allocation2 + $0xb1] sm:$0xff]  ;;  %s5552_s12 = scalar_lea.vmem %s5551_s23, 8192 }
 0x292   : > { %v3085_v44 = vsel %vm1229_vm3, %v3053_v43, %v5108_v17  ;;  %v3086_v5 = vsel %vm1229_vm3, %v3054_v8, %v5109_v29  ;;  %v5498_v29 = vld [vmem:[#allocation2 + $0x98] sm:$0xff] }
 0x293   : > { %v5112_v41 = vpop.permute.xlu0 %5111  ;;  %v5122_v14 = vpop.permute.xlu1 %5121  ;;  %v2960_v17 = vsel %vm298_vm0, %v5498_v29, %v5099_v18  ;;  %v2991_v4 = vsel %vm1229_vm3, %v2959_v7, %v5103_v26  ;;  %v5503_v29 = vld [vmem:[#allocation2 + $0xa8] sm:$0xff] }
 0x294   : > { %v5114_v34 = vunpack.i.h.bf16 %v5112_v41  ;;  %v5113_v6 = vunpack.i.l.bf16 %v5112_v41  ;;  %v5124_v35 = vunpack.i.h.bf16 %v5122_v14  ;;  %v2992_v53 = vsel %vm1229_vm3, %v2960_v17, %v5104_v22 }
 0x295   : > { %5391 = vrot.lane.b32.xlu0 %v5390_v38, %s5618_s20  ;;  %v5123_v38 = vunpack.i.l.bf16 %v5122_v14 }
 0x296   : > { %v3117_v33 = vsel %vm1262_vm4, %v3085_v44, %v5113_v6  ;;  %v3118_v15 = vsel %vm1262_vm4, %v3086_v5, %v5114_v34  ;;  %v3024_v14 = vsel %vm1262_vm4, %v2992_v53, %v5124_v35  ;;  %v5505_v53 = vld [vmem:[#allocation2 + $0xc1] sm:$0xff] }
 0x297   : > { %v5117_v11 = vpop.permute.xlu0 %5116  ;;  %v3155_v37 = vpack.c.bf16 %v3118_v15, %v3117_v33  ;;  %v5127_v47 = vpop.permute.xlu1 %5126  ;;  %v3023_v6 = vsel %vm1262_vm4, %v2991_v4, %v5123_v38 }
 0x298   : > { %v5119_v23 = vunpack.i.h.bf16 %v5117_v11  ;;  %v5118_v13 = vunpack.i.l.bf16 %v5117_v11  ;;  %v3157_v15 = vpack.c.bf16 %v3024_v14, %v3023_v6  ;;  %v5129_v11 = vunpack.i.h.bf16 %v5127_v47 }
 0x299   : > { %3451 = vmatprep.mubr.bf16.mxu1 %v3155_v37  ;;  %v5128_v37 = vunpack.i.l.bf16 %v5127_v47 }
 0x29a   : > { %3452 = vmatmul.mubr.bf16.gmra.mxu1 %v3154_v39  ;;  %v3056_v42 = vsel %vm298_vm0, %v5500_v48, %v5119_v23  ;;  %v3055_v41 = vsel %vm298_vm0, %v5501_v58, %v5118_v13 }
 0x29b   : > { %v5137_v32 = vpop.permute.xlu0 %5136  ;;  %v5132_v57 = vpop.permute.xlu1 %5131  ;;  %v2961_v17 = vsel %vm298_vm0, %v5503_v29, %v5128_v37 }
 0x29c   : > { %v5139_v20 = vunpack.i.h.bf16 %v5137_v32  ;;  %v5138_v31 = vunpack.i.l.bf16 %v5137_v32  ;;  %v5134_v39 = vunpack.i.h.bf16 %v5132_v57  ;;  %v5133_v18 = vunpack.i.l.bf16 %v5132_v57  ;;  %v5504_v57 = vld [vmem:[#allocation2 + $0xc9] sm:$0xff] }
 0x29e   : > { %v3087_v43 = vsel %vm1229_vm3, %v3055_v41, %v5138_v31  ;;  %v3088_v34 = vsel %vm1229_vm3, %v3056_v42, %v5139_v20  ;;  %v5502_v20 = vld [vmem:[#allocation2 + $0xb0] sm:$0xff]  ;;  %v2993_v3 = vsel %vm1229_vm3, %v2961_v17, %v5133_v18 }
 0x29f   : > { %v5142_v0 = vpop.permute.xlu0 %5141  ;;  %v5152_v27 = vpop.permute.xlu1 %5151  ;;  %v2962_v31 = vsel %vm298_vm0, %v5502_v20, %v5129_v11  ;;  %v5507_v20 = vld [vmem:[#allocation2 + $0xc0] sm:$0xff] }
 0x2a0   : > { %v5144_v50 = vunpack.i.h.bf16 %v5142_v0  ;;  %v5143_v8 = vunpack.i.l.bf16 %v5142_v0  ;;  %v5154_v23 = vunpack.i.h.bf16 %v5152_v27  ;;  %v5153_v13 = vunpack.i.l.bf16 %v5152_v27 }
 0x2a1   : > { %v2994_v47 = vsel %vm1229_vm3, %v2962_v31, %v5134_v39 }
 0x2a2   : > { %v3119_v44 = vsel %vm1262_vm4, %v3087_v43, %v5143_v8  ;;  %v3120_v5 = vsel %vm1262_vm4, %v3088_v34, %v5144_v50  ;;  %v3025_v8 = vsel %vm1262_vm4, %v2993_v3, %v5153_v13  ;;  %v3026_v27 = vsel %vm1262_vm4, %v2994_v47, %v5154_v23  ;;  %v5509_v47 = vld [vmem:[#allocation2 + $0xd9] sm:$0xff] }
 0x2a3   : > { %v5147_v52 = vpop.permute.xlu0 %5146  ;;  %v3158_v63 = vpack.c.bf16 %v3120_v5, %v3119_v44  ;;  %v5157_v33 = vpop.permute.xlu1 %5156  ;;  %v3160_v5 = vpack.c.bf16 %v3026_v27, %v3025_v8 }
 0x2a4   : > { %v5149_v22 = vunpack.i.h.bf16 %v5147_v52  ;;  %v5148_v26 = vunpack.i.l.bf16 %v5147_v52  ;;  %v5159_v52 = vunpack.i.h.bf16 %v5157_v33 }
 0x2a5   : > { %3459 = vmatprep.mubr.bf16.mxu1 %v3158_v63  ;;  %v5158_v63 = vunpack.i.l.bf16 %v5157_v33 }
 0x2a6   : > { %3460 = vmatmul.mubr.bf16.gmra.mxu1 %v3157_v15  ;;  %v3058_v4 = vsel %vm298_vm0, %v5504_v57, %v5149_v22  ;;  %v3057_v0 = vsel %vm298_vm0, %v5505_v53, %v5148_v26 }
 0x2a7   : > { %v5167_v36 = vpop.permute.xlu0 %5166  ;;  %v5162_v32 = vpop.permute.xlu1 %5161  ;;  %v2963_v31 = vsel %vm298_vm0, %v5507_v20, %v5158_v63 }
 0x2a8   : > { %v5169_v35 = vunpack.i.h.bf16 %v5167_v36  ;;  %v5168_v38 = vunpack.i.l.bf16 %v5167_v36  ;;  %v5164_v15 = vunpack.i.h.bf16 %v5162_v32  ;;  %v5163_v11 = vunpack.i.l.bf16 %v5162_v32  ;;  %v5508_v32 = vld [vmem:[#allocation2 + $0xe1] sm:$0xff] }
 0x2aa   : > { %v3089_v41 = vsel %vm1229_vm3, %v3057_v0, %v5168_v38  ;;  %v3090_v50 = vsel %vm1229_vm3, %v3058_v4, %v5169_v35  ;;  %v5506_v35 = vld [vmem:[#allocation2 + $0xc8] sm:$0xff]  ;;  %v2995_v29 = vsel %vm1229_vm3, %v2963_v31, %v5163_v11 }
 0x2ab   : > { %v5172_v7 = vpop.permute.xlu0 %5171  ;;  %v5182_v58 = vpop.permute.xlu1 %5181  ;;  %v2964_v38 = vsel %vm298_vm0, %v5506_v35, %v5159_v52  ;;  %v5511_v35 = vld [vmem:[#allocation2 + $0xd8] sm:$0xff] }
 0x2ac   : > { %v5174_v48 = vunpack.i.h.bf16 %v5172_v7  ;;  %v5173_v42 = vunpack.i.l.bf16 %v5172_v7  ;;  %v5184_v22 = vunpack.i.h.bf16 %v5182_v58  ;;  %v5183_v26 = vunpack.i.l.bf16 %v5182_v58 }
 0x2ad   : > { %v2996_v33 = vsel %vm1229_vm3, %v2964_v38, %v5164_v15 }
 0x2ae   : > { %v3121_v43 = vsel %vm1262_vm4, %v3089_v41, %v5173_v42  ;;  %v3122_v34 = vsel %vm1262_vm4, %v3090_v50, %v5174_v48  ;;  %v3027_v42 = vsel %vm1262_vm4, %v2995_v29, %v5183_v26  ;;  %v3028_v58 = vsel %vm1262_vm4, %v2996_v33, %v5184_v22 }
 0x2af   : > { %v5177_v6 = vpop.permute.xlu0 %5176  ;;  %v3161_v14 = vpack.c.bf16 %v3122_v34, %v3121_v43  ;;  %v5187_v44 = vpop.permute.xlu1 %5186  ;;  %v3163_v34 = vpack.c.bf16 %v3028_v58, %v3027_v42 }
 0x2b0   : > { %v5179_v39 = vunpack.i.h.bf16 %v5177_v6  ;;  %v5178_v18 = vunpack.i.l.bf16 %v5177_v6  ;;  %v5189_v6 = vunpack.i.h.bf16 %v5187_v44 }
 0x2b1   : > { %3467 = vmatprep.mubr.bf16.mxu1 %v3161_v14  ;;  %v5188_v14 = vunpack.i.l.bf16 %v5187_v44 }
 0x2b2   : > { %3468 = vmatmul.mubr.bf16.gmra.mxu1 %v3160_v5  ;;  %v3060_v3 = vsel %vm298_vm0, %v5508_v32, %v5179_v39  ;;  %v3059_v7 = vsel %vm298_vm0, %v5509_v47, %v5178_v18 }
 0x2b3   : > { %v5197_v37 = vpop.permute.xlu0 %5196  ;;  %v5192_v36 = vpop.permute.xlu1 %5191  ;;  %v2965_v38 = vsel %vm298_vm0, %v5511_v35, %v5188_v14 }
 0x2b4   : > { %v5199_v23 = vunpack.i.h.bf16 %v5197_v37  ;;  %v5198_v13 = vunpack.i.l.bf16 %v5197_v37  ;;  %v5194_v5 = vunpack.i.h.bf16 %v5192_v36  ;;  %v5193_v52 = vunpack.i.l.bf16 %v5192_v36  ;;  %v5512_v36 = vld [vmem:[#allocation2 + $0xf9] sm:$0xff] }
 0x2b6   : > { %v3091_v0 = vsel %vm1229_vm3, %v3059_v7, %v5198_v13  ;;  %v3092_v48 = vsel %vm1229_vm3, %v3060_v3, %v5199_v23  ;;  %v5510_v23 = vld [vmem:[#allocation2 + $0xe0] sm:$0xff]  ;;  %v2997_v20 = vsel %vm1229_vm3, %v2965_v38, %v5193_v52 }
 0x2b7   : > { %v5202_v17 = vpop.permute.xlu0 %5201  ;;  %v5212_v53 = vpop.permute.xlu1 %5211  ;;  %v2966_v13 = vsel %vm298_vm0, %v5510_v23, %v5189_v6 }
 0x2b8   : > { %v5204_v57 = vunpack.i.h.bf16 %v5202_v17  ;;  %v5203_v4 = vunpack.i.l.bf16 %v5202_v17  ;;  %v5214_v39 = vunpack.i.h.bf16 %v5212_v53  ;;  %v5213_v18 = vunpack.i.l.bf16 %v5212_v53 }
 0x2b9   : > { %v2998_v44 = vsel %vm1229_vm3, %v2966_v13, %v5194_v5 }
 0x2ba   : > { %v3123_v41 = vsel %vm1262_vm4, %v3091_v0, %v5203_v4  ;;  %v3124_v50 = vsel %vm1262_vm4, %v3092_v48, %v5204_v57  ;;  %v3029_v57 = vsel %vm1262_vm4, %v2997_v20, %v5213_v18  ;;  %v3030_v4 = vsel %vm1262_vm4, %v2998_v44, %v5214_v39  ;;  %v5513_v39 = vld [vmem:[#allocation2 + $0xf8] sm:$0xff] }
 0x2bb   : > { %v5207_v8 = vpop.permute.xlu0 %5206  ;;  %v3164_v27 = vpack.c.bf16 %v3124_v50, %v3123_v41  ;;  %v5217_v43 = vpop.permute.xlu1 %5216  ;;  %v3166_v41 = vpack.c.bf16 %v3030_v4, %v3029_v57 }
 0x2bc   : > { %v5209_v15 = vunpack.i.h.bf16 %v5207_v8  ;;  %v5208_v11 = vunpack.i.l.bf16 %v5207_v8  ;;  %v5218_v50 = vunpack.i.l.bf16 %v5217_v43 }
 0x2bd   : > { %3475 = vmatprep.mubr.bf16.mxu1 %v3164_v27 }
 0x2be   : > { %3476 = vmatmul.mubr.bf16.gmra.mxu1 %v3163_v34  ;;  %v3062_v29 = vsel %vm298_vm0, %v5512_v36, %v5209_v15  ;;  %v3061_v33 = vsel %vm298_vm0, %v6832_v54, %v5208_v11  ;;  %v5219_v54 = vunpack.i.h.bf16 %v5217_v43 }
 0x2bf   : > { %v5227_v63 = vpop.permute.xlu0 %5226  ;;  %v5222_v37 = vpop.permute.xlu1 %5221 }
 0x2c0   : > { %v5229_v22 = vunpack.i.h.bf16 %v5227_v63  ;;  %v5228_v26 = vunpack.i.l.bf16 %v5227_v63  ;;  %v5224_v8 = vunpack.i.h.bf16 %v5222_v37  ;;  %v5223_v27 = vunpack.i.l.bf16 %v5222_v37 }
 0x2c1   : > { %v2968_v18 = vsel %vm298_vm0, %v5513_v39, %v5219_v54 }
 0x2c2   : > { %v3093_v47 = vsel %vm1229_vm3, %v3061_v33, %v5228_v26  ;;  %v3094_v7 = vsel %vm1229_vm3, %v3062_v29, %v5229_v22  ;;  %v5514_v22 = vld [vmem:[#allocation2 + $0xf0] sm:$0xff]  ;;  %v3000_v43 = vsel %vm1229_vm3, %v2968_v18, %v5224_v8 }
 0x2c3   : > { %v5232_v31 = vpop.permute.xlu0 %5231  ;;  %v5242_v3 = vpop.permute.xlu1 %5241  ;;  %v2967_v26 = vsel %vm298_vm0, %v5514_v22, %v5218_v50 }
 0x2c4   : > { %v5234_v17 = vunpack.i.h.bf16 %v5232_v31  ;;  %v5233_v32 = vunpack.i.l.bf16 %v5232_v31  ;;  %v5244_v52 = vunpack.i.h.bf16 %v5242_v3  ;;  %v5243_v63 = vunpack.i.l.bf16 %v5242_v3 }
 0x2c5   : > { %v2999_v23 = vsel %vm1229_vm3, %v2967_v26, %v5223_v27 }
 0x2c6   : > { %v3125_v53 = vsel %vm1262_vm4, %v3093_v47, %v5233_v32  ;;  %v3126_v0 = vsel %vm1262_vm4, %v3094_v7, %v5234_v17  ;;  %v3031_v29 = vsel %vm1262_vm4, %v2999_v23, %v5243_v63  ;;  %v3032_v33 = vsel %vm1262_vm4, %v3000_v43, %v5244_v52 }
 0x2c7   : > { %v5237_v48 = vpop.permute.xlu0 %5236  ;;  %v3167_v42 = vpack.c.bf16 %v3126_v0, %v3125_v53  ;;  %v5247_v58 = vpop.permute.xlu1 %5246  ;;  %v3169_v7 = vpack.c.bf16 %v3032_v33, %v3031_v29 }
 0x2c8   : > { %v5239_v6 = vunpack.i.h.bf16 %v5237_v48  ;;  %v5238_v14 = vunpack.i.l.bf16 %v5237_v48  ;;  %v5248_v57 = vunpack.i.l.bf16 %v5247_v58 }
 0x2c9   : > { %3483 = vmatprep.mubr.bf16.mxu1 %v3167_v42 }
 0x2ca   : > { %3484 = vmatmul.mubr.bf16.gmra.mxu1 %v3166_v41  ;;  %v3064_v37 = vsel %vm298_vm0, %v6872_v1, %v5239_v6  ;;  %v3063_v35 = vsel %vm298_vm0, %v6879_v9, %v5238_v14  ;;  %v5249_v9 = vunpack.i.h.bf16 %v5247_v58  ;;  %v5516_v14 = vld [vmem:[#allocation2 + $0x108] sm:$0xff] }
 0x2cb   : > { %v5257_v34 = vpop.permute.xlu0 %5256  ;;  %v5252_v5 = vpop.permute.xlu1 %5251  ;;  %v2969_v52 = vsel %vm298_vm0, %v5516_v14, %v5248_v57 }
 0x2cc   : > { %v5259_v15 = vunpack.i.h.bf16 %v5257_v34  ;;  %v5258_v11 = vunpack.i.l.bf16 %v5257_v34  ;;  %v5254_v4 = vunpack.i.h.bf16 %v5252_v5  ;;  %v5253_v53 = vunpack.i.l.bf16 %v5252_v5  ;;  %v5515_v34 = vld [vmem:[#allocation2 + $0x110] sm:$0xff] }
 0x2cd   : > { %v2970_v6 = vsel %vm298_vm0, %v5515_v34, %v5249_v9 }
 0x2ce   : > { %v3095_v31 = vsel %vm1229_vm3, %v3063_v35, %v5258_v11  ;;  %v3096_v36 = vsel %vm1229_vm3, %v3064_v37, %v5259_v15  ;;  %v3001_v63 = vsel %vm1229_vm3, %v2969_v52, %v5253_v53  ;;  %v3002_v58 = vsel %vm1229_vm3, %v2970_v6, %v5254_v4  ;;  %v5517_v4 = vld [vmem:[#allocation2 + $0x128] sm:$0xff] }
 0x2cf   : > { %v5262_v13 = vpop.permute.xlu0 %5261  ;;  %v5272_v44 = vpop.permute.xlu1 %5271 }
 0x2d0   : > { %v5264_v38 = vunpack.i.h.bf16 %v5262_v13  ;;  %v5263_v20 = vunpack.i.l.bf16 %v5262_v13  ;;  %v5274_v54 = vunpack.i.h.bf16 %v5272_v44  ;;  %v5273_v50 = vunpack.i.l.bf16 %v5272_v44 }
 0x2d2   : > { %v3127_v17 = vsel %vm1262_vm4, %v3095_v31, %v5263_v20  ;;  %v3128_v32 = vsel %vm1262_vm4, %v3096_v36, %v5264_v38  ;;  %v3033_v43 = vsel %vm1262_vm4, %v3001_v63, %v5273_v50  ;;  %v3034_v13 = vsel %vm1262_vm4, %v3002_v58, %v5274_v54 }
 0x2d3   : > { %v5267_v3 = vpop.permute.xlu0 %5266  ;;  %v3170_v1 = vpack.c.bf16 %v3128_v32, %v3127_v17  ;;  %v5277_v47 = vpop.permute.xlu1 %5276  ;;  %v3172_v44 = vpack.c.bf16 %v3034_v13, %v3033_v43 }
 0x2d4   : > { %v5269_v48 = vunpack.i.h.bf16 %v5267_v3  ;;  %v5268_v42 = vunpack.i.l.bf16 %v5267_v3  ;;  %v5278_v31 = vunpack.i.l.bf16 %v5277_v47 }
 0x2d5   : > { %3491 = vmatprep.mubr.bf16.mxu1 %v3170_v1 }
 0x2d6   : > { %3492 = vmatmul.mubr.bf16.gmra.mxu1 %v3169_v7  ;;  %v3066_v5 = vsel %vm298_vm0, %v6922_v16, %v5269_v48  ;;  %v3065_v11 = vsel %vm298_vm0, %v6930_v49, %v5268_v42  ;;  %v5279_v49 = vunpack.i.h.bf16 %v5277_v47 }
 0x2d7   : > { %v5287_v0 = vpop.permute.xlu0 %5286  ;;  %v5282_v41 = vpop.permute.xlu1 %5281 }
 0x2d8   : > { %v5289_v8 = vunpack.i.h.bf16 %v5287_v0  ;;  %v5288_v27 = vunpack.i.l.bf16 %v5287_v0  ;;  %v5284_v36 = vunpack.i.h.bf16 %v5282_v41  ;;  %v5283_v29 = vunpack.i.l.bf16 %v5282_v41 }
 0x2d9   : > { %v2972_v53 = vsel %vm298_vm0, %v5517_v4, %v5279_v49  ;;  %v2971_v0 = vsel %vm298_vm0, %v6913_v40, %v5278_v31 }
 0x2da   : > { %v3097_v26 = vsel %vm1229_vm3, %v3065_v11, %v5288_v27  ;;  %v3098_v23 = vsel %vm1229_vm3, %v3066_v5, %v5289_v8  ;;  %v3003_v48 = vsel %vm1229_vm3, %v2971_v0, %v5283_v29  ;;  %v3004_v47 = vsel %vm1229_vm3, %v2972_v53, %v5284_v36 }
 0x2db   : > { %v5292_v15 = vpop.permute.xlu0 %5291 }
 0x2dc   : > { %v5294_v39 = vunpack.i.h.bf16 %v5292_v15  ;;  %v5293_v18 = vunpack.i.l.bf16 %v5292_v15  ;;  %v5302_v22 = vpop.permute.xlu1 %5301 }
 0x2dd   : > { %v5304_v1 = vunpack.i.h.bf16 %v5302_v22  ;;  %v5303_v7 = vunpack.i.l.bf16 %v5302_v22 }
 0x2de   : > { %v3129_v37 = vsel %vm1262_vm4, %v3097_v26, %v5293_v18  ;;  %v3130_v35 = vsel %vm1262_vm4, %v3098_v23, %v5294_v39 }
 0x2df   : > { %v5297_v38 = vpop.permute.xlu0 %5296  ;;  %v3173_v16 = vpack.c.bf16 %v3130_v35, %v3129_v37  ;;  %v3035_v40 = vsel %vm1262_vm4, %v3003_v48, %v5303_v7  ;;  %v3036_v14 = vsel %vm1262_vm4, %v3004_v47, %v5304_v1 }
 0x2e0   : > { %v5307_v20 = vpop.permute.xlu1 %5306  ;;  %v5299_v17 = vunpack.i.h.bf16 %v5297_v38  ;;  %v5298_v32 = vunpack.i.l.bf16 %v5297_v38  ;;  %v3175_v5 = vpack.c.bf16 %v3036_v14, %v3035_v40 }
 0x2e1   : > { %3499 = vmatprep.mubr.bf16.mxu1 %v3173_v16  ;;  %v5308_v11 = vunpack.i.l.bf16 %v5307_v20 }
 0x2e2   : > { %3500 = vmatmul.mubr.bf16.gmra.mxu1 %v3172_v44  ;;  %v3068_v41 = vsel %vm298_vm0, %v6982_v61, %v5299_v17  ;;  %v3067_v54 = vsel %vm298_vm0, %v6989_v10, %v5298_v32  ;;  %v5309_v10 = vunpack.i.h.bf16 %v5307_v20 }
 0x2e3   : > { %v5317_v33 = vpop.permute.xlu0 %5316  ;;  %v2973_v44 = vsel %vm298_vm0, %v6971_v46, %v5308_v11 }
 0x2e4   : > { %v5312_v3 = vpop.permute.xlu1 %5311  ;;  %v5319_v9 = vunpack.i.h.bf16 %v5317_v33  ;;  %v5318_v57 = vunpack.i.l.bf16 %v5317_v33  ;;  %v2974_v16 = vsel %vm298_vm0, %v6960_v12, %v5309_v10 }
 0x2e5   : > { %v5314_v39 = vunpack.i.h.bf16 %v5312_v3  ;;  %v5313_v18 = vunpack.i.l.bf16 %v5312_v3 }
 0x2e6   : > { %v3099_v34 = vsel %vm1229_vm3, %v3067_v54, %v5318_v57  ;;  %v3100_v6 = vsel %vm1229_vm3, %v3068_v41, %v5319_v9 }
 0x2e7   : > { %v5322_v42 = vpop.permute.xlu0 %5321  ;;  %v3005_v49 = vsel %vm1229_vm3, %v2973_v44, %v5313_v18  ;;  %v3006_v20 = vsel %vm1229_vm3, %v2974_v16, %v5314_v39 }
 0x2e8   : > { %v5324_v50 = vunpack.i.h.bf16 %v5322_v42  ;;  %v5323_v8 = vunpack.i.l.bf16 %v5322_v42  ;;  %v5332_v27 = vpop.permute.xlu1 %5331 }
 0x2e9   : > { %v5334_v13 = vunpack.i.h.bf16 %v5332_v27  ;;  %v5333_v37 = vunpack.i.l.bf16 %v5332_v27 }
 0x2ea   : > { %v3131_v52 = vsel %vm1262_vm4, %v3099_v34, %v5323_v8  ;;  %v3132_v63 = vsel %vm1262_vm4, %v3100_v6, %v5324_v50 }
 0x2eb   : > { %v5327_v58 = vpop.permute.xlu0 %5326  ;;  %v3176_v61 = vpack.c.bf16 %v3132_v63, %v3131_v52  ;;  %v3037_v46 = vsel %vm1262_vm4, %v3005_v49, %v5333_v37  ;;  %v3038_v1 = vsel %vm1262_vm4, %v3006_v20, %v5334_v13 }
 0x2ec   : > { %v5337_v15 = vpop.permute.xlu1 %5336  ;;  %v5329_v26 = vunpack.i.h.bf16 %v5327_v58  ;;  %v5328_v23 = vunpack.i.l.bf16 %v5327_v58  ;;  %v3178_v53 = vpack.c.bf16 %v3038_v1, %v3037_v46 }
 0x2ed   : > { %3507 = vmatprep.mubr.bf16.mxu1 %v3176_v61  ;;  %v5338_v0 = vunpack.i.l.bf16 %v5337_v15 }
 0x2ee   : > { %3508 = vmatmul.mubr.bf16.gmra.mxu1 %v3175_v5  ;;  %v3070_v36 = vsel %vm298_vm0, %v7027_v60, %v5329_v26  ;;  %v3069_v29 = vsel %vm298_vm0, %v7035_v25, %v5328_v23  ;;  %v5339_v25 = vunpack.i.h.bf16 %v5337_v15 }
 0x2ef   : > { %v5347_v22 = vpop.permute.xlu0 %5346  ;;  %v2975_v6 = vsel %vm298_vm0, %v7019_v21, %v5338_v0 }
 0x2f0   : > { %v5342_v43 = vpop.permute.xlu1 %5341  ;;  %v5349_v35 = vunpack.i.h.bf16 %v5347_v22  ;;  %v5348_v38 = vunpack.i.l.bf16 %v5347_v22  ;;  %v2976_v34 = vsel %vm298_vm0, %v7013_v56, %v5339_v25  ;;  %v4352_v25 = vpop.f32.mrf.mxu0 }
 0x2f1   : > { %v5344_v48 = vunpack.i.h.bf16 %v5342_v43  ;;  %v5343_v47 = vunpack.i.l.bf16 %v5342_v43 }
 0x2f2   : > { %v3101_v3 = vsel %vm1229_vm3, %v3069_v29, %v5348_v38  ;;  %v3102_v12 = vsel %vm1229_vm3, %v3070_v36, %v5349_v35  ;;  %v4934_v36 = vunpack.i.h.bf16 %v6854_v59  ;;  %v4933_v29 = vunpack.i.l.bf16 %v6854_v59  ;;  %v3574_v0 = vpop.f32.mrf.mxu0 }
 0x2f3   : > { %v5352_v31 = vpop.permute.xlu0 %5351  ;;  %v3007_v52 = vsel %vm1229_vm3, %v2975_v6, %v5343_v47  ;;  %v3008_v63 = vsel %vm1229_vm3, %v2976_v34, %v5344_v48  ;;  %v3779_v6 = vld [vmem:[%s5765_s15] sm:$0xff] }
 0x2f4   : > { %v5354_v33 = vunpack.i.h.bf16 %v5352_v31  ;;  %v5353_v17 = vunpack.i.l.bf16 %v5352_v31  ;;  %v5362_v32 = vpop.permute.xlu1 %5361 }
 0x2f5   : > { %v5364_v42 = vunpack.i.h.bf16 %v5362_v32  ;;  %v5363_v41 = vunpack.i.l.bf16 %v5362_v32 }
 0x2f6   : > { %v3133_v7 = vsel %vm1262_vm4, %v3101_v3, %v5353_v17  ;;  %v3134_v9 = vsel %vm1262_vm4, %v3102_v12, %v5354_v33 }
 0x2f7   : > { %v5357_v57 = vpop.permute.xlu0 %5356  ;;  %v3179_v60 = vpack.c.bf16 %v3134_v9, %v3133_v7  ;;  %v3039_v61 = vsel %vm1262_vm4, %v3007_v52, %v5363_v41  ;;  %v3040_v15 = vsel %vm1262_vm4, %v3008_v63, %v5364_v42  ;;  %v4353_v41 = vpop.f32.mrf.mxu0 }
 0x2f8   : > { %v5367_v4 = vpop.permute.xlu1 %5366  ;;  %v5359_v50 = vunpack.i.h.bf16 %v5357_v57  ;;  %v5358_v8 = vunpack.i.l.bf16 %v5357_v57  ;;  %v3181_v35 = vpack.c.bf16 %v3040_v15, %v3039_v61  ;;  %v3780_v61 = vld [vmem:[%s5765_s15 + $0x8] sm:$0xff] }
 0x2f9   : > { %3515 = vmatprep.mubr.bf16.mxu1 %v3179_v60  ;;  %v5369_v23 = vunpack.i.h.bf16 %v5367_v4  ;;  %v5368_v43 = vunpack.i.l.bf16 %v5367_v4  ;;  %v2265_v60 = vld [vmem:[#allocation2 + $0x19a] sm:$0xff]  ;;  %v2266_v4 = vld [vmem:[#allocation2 + $0x1a2] sm:$0xff]  ;;  %v3577_v34 = vpop.f32.mrf.mxu0 }
 0x2fa   : > { %3516 = vmatmul.mubr.bf16.gmra.mxu1 %v3178_v53  ;;  %v3072_v5 = vsel %vm298_vm0, %v7067_v55, %v5359_v50  ;;  %v3071_v56 = vsel %vm298_vm0, %v7075_v30, %v5358_v8  ;;  %v3186_v53 = vpack.c.bf16 %v2266_v4, %v2265_v60 }
 0x2fb   : > { %v5377_v54 = vpop.permute.xlu0 %5376  ;;  %v2978_v33 = vsel %vm298_vm0, %v7053_v28, %v5369_v23  ;;  %v2977_v17 = vsel %vm298_vm0, %v7059_v2, %v5368_v43  ;;  %v3781_v23 = vld [vmem:[%s5765_s15 + $0x10] sm:$0xff] }
 0x2fc   : > { %v5372_v27 = vpop.permute.xlu1 %5371  ;;  %v5379_v40 = vunpack.i.h.bf16 %v5377_v54  ;;  %v5378_v14 = vunpack.i.l.bf16 %v5377_v54  ;;  %v7291_v54 = vld [vmem:[%s7517_s5] ss:$0 sm:$0xff] }
 0x2fd   : > { %v5374_v55 = vunpack.i.h.bf16 %v5372_v27  ;;  %v5373_v38 = vunpack.i.l.bf16 %v5372_v27 }
 0x2fe   : > { %v3103_v21 = vsel %vm1229_vm3, %v3071_v56, %v5378_v14  ;;  %v3104_v39 = vsel %vm1229_vm3, %v3072_v5, %v5379_v40 }
 0x2ff   : > { %v5382_v58 = vpop.permute.xlu0 %5381  ;;  %v3009_v3 = vsel %vm1229_vm3, %v2977_v17, %v5373_v38  ;;  %v3010_v12 = vsel %vm1229_vm3, %v2978_v33, %v5374_v55  ;;  %v3782_v38 = vld [vmem:[%s5765_s15 + $0x18] sm:$0xff] }
 0x300   : > { %v5384_v10 = vunpack.i.h.bf16 %v5382_v58  ;;  %v5383_v11 = vunpack.i.l.bf16 %v5382_v58  ;;  %v5397_v18 = vpop.permute.xlu1 %5396 }
 0x301   : > { %v5399_v44 = vunpack.i.h.bf16 %v5397_v18  ;;  %v5398_v49 = vunpack.i.l.bf16 %v5397_v18 }
 0x302   : > { %v3135_v22 = vsel %vm1262_vm4, %v3103_v21, %v5383_v11  ;;  %v3136_v26 = vsel %vm1262_vm4, %v3104_v39, %v5384_v10 }
 0x303   : > { %v5387_v13 = vpop.permute.xlu0 %5386  ;;  %v3182_v37 = vpack.c.bf16 %v3136_v26, %v3135_v22  ;;  %v3041_v7 = vsel %vm1262_vm4, %v3009_v3, %v5398_v49  ;;  %v3042_v59 = vsel %vm1262_vm4, %v3010_v12, %v5399_v44  ;;  %v4356_v26 = vpop.f32.mrf.mxu0  ;;  %v3783_v12 = vld [vmem:[%s5765_s15 + $0x20] sm:$0xff] }
 0x304   : > { %v5389_v16 = vunpack.i.h.bf16 %v5387_v13  ;;  %v5388_v30 = vunpack.i.l.bf16 %v5387_v13  ;;  %v3184_v57 = vpack.c.bf16 %v3042_v59, %v3041_v7  ;;  %v3784_v7 = vld [vmem:[%s5765_s15 + $0x28] sm:$0xff] }
 0x305   : > { %3523 = vmatprep.mubr.bf16.mxu1 %v3182_v37  ;;  %v3590_v55 = vpop.f32.mrf.mxu0 }
 0x306   : > { %v3074_v20 = vsel %vm298_vm0, %v7101_v62, %v5389_v16  ;;  %v3073_v31 = vsel %vm298_vm0, %v7109_v51, %v5388_v30  ;;  %3524 = vmatmul.mubr.bf16.gmra.mxu1 %v3181_v35 }
 0x307   : > { %v5392_v32 = vpop.permute.xlu0 %5391  ;;  %v3105_v51 = vsel %vm1229_vm3, %v3073_v31, %v4933_v29  ;;  %v3106_v1 = vsel %vm1229_vm3, %v3074_v20, %v4934_v36  ;;  %v4357_v31 = vpop.f32.mrf.mxu0 }
 0x308   : > { %v5394_v62 = vunpack.i.h.bf16 %v5392_v32  ;;  %v5393_v46 = vunpack.i.l.bf16 %v5392_v32 }
 0x309   : > { %v3593_v3 = vpop.f32.mrf.mxu0 }
 0x30a   : > { %v3137_v28 = vsel %vm1262_vm4, %v3105_v51, %v5393_v46  ;;  %v3138_v9 = vsel %vm1262_vm4, %v3106_v1, %v5394_v62 }
 0x30b   : > { %v3185_v2 = vpack.c.bf16 %v3138_v9, %v3137_v28 }
 0x30d   : > { %3531 = vmatprep.mubr.bf16.mxu1 %v3185_v2 }
 0x30e   : > { %3532 = vmatmul.mubr.bf16.gmra.mxu1 %v3184_v57 }
 0x30f   : > { %4378 = vmatprep.mubr.msk.bf16.mxu1 %vm298_vm0, %v3183_v45  ;;  %v7296_v45 = vld [vmem:[%s7518_s6] ss:$0 sm:$0xff] }
 0x316   : > { %4379 = vmatmul.mubr.msk.bf16.vlgmr.msra.gmra.mxu1 %vm298_vm0, %v3186_v53 }
 0x31f   : > { %v4196_v48 = vpop.f32.mrf.mxu1 }
 0x321   : > { %v4197_v47 = vpop.f32.mrf.mxu1 }
 0x322   : > { %v4198_v42 = vadd.f32 %v4197_v47, %v4196_v48  ;;  %v4360_v48 = vpop.f32.mrf.mxu0  ;;  %v3785_v47 = vld [vmem:[%s5765_s15 + $0x30] sm:$0xff] }
 0x323   : > { %v4199_v24 = vpop.f32.mrf.mxu1 }
 0x324   : > { %v3575_v19 = vadd.f32 %v4198_v42, %v3574_v0 }
 0x325   : > { %v4200_v50 = vpop.f32.mrf.mxu1 }
 0x326   : > { %v3708_v8 = vmul.f32 %v7291_v54, %v3575_v19  ;;  %v4201_v27 = vadd.f32 %v4200_v50, %v4199_v24  ;;  %v3606_v50 = vpop.f32.mrf.mxu0 }
 0x328   : > { %v3747_v40 = vadd.f32 %v7296_v45, %v3708_v8  ;;  %v3578_v14 = vadd.f32 %v4201_v27, %v3577_v34  ;;  %v3786_v8 = vld [vmem:[%s5765_s15 + $0x38] sm:$0xff] }
 0x32a   : > { %v4202_v52 = vpop.f32.mrf.mxu1  ;;  %v3811_v63 = vadd.f32 %v3779_v6, %v3747_v40  ;;  %v3709_v58 = vmul.f32 %v7291_v54, %v3578_v14 }
 0x32c   : > { %v4203_v15 = vpop.f32.mrf.mxu1  ;;  %3843 = vst.msk [vmem:[%s7305_s21] sm:$0xff] %vm298_vm0, %v3811_v63  ;;  %v3748_v5 = vadd.f32 %v7296_v45, %v3709_v58 }
 0x32d   : > { %v4204_v56 = vadd.f32 %v4203_v15, %v4202_v52  ;;  %v4361_v52 = vpop.f32.mrf.mxu0 }
 0x32e   : > { %v4205_v10 = vpop.f32.mrf.mxu1  ;;  %v3812_v11 = vadd.f32 %v3780_v61, %v3748_v5 }
 0x32f   : > { %v3583_v21 = vadd.f32 %v4352_v25, %v4204_v56  ;;  %v3609_v56 = vpop.f32.mrf.mxu0 }
 0x330   : > { %v4206_v39 = vpop.f32.mrf.mxu1  ;;  %3844 = vst.msk [vmem:[%s7305_s21 + $0x8] sm:$0xff] %vm298_vm0, %v3812_v11 }
 0x331   : > { %v3710_v18 = vmul.f32 %v7291_v54, %v3583_v21  ;;  %v4207_v22 = vadd.f32 %v4206_v39, %v4205_v10  ;;  %v3787_v10 = vld [vmem:[%s5765_s15 + $0x40] sm:$0xff] }
 0x333   : > { %v3749_v43 = vadd.f32 %v7296_v45, %v3710_v18  ;;  %v3586_v13 = vadd.f32 %v4353_v41, %v4207_v22  ;;  %v3788_v22 = vld [vmem:[%s5765_s15 + $0x48] sm:$0xff] }
 0x335   : > { %v3813_v37 = vadd.f32 %v3781_v23, %v3749_v43  ;;  %v3711_v35 = vmul.f32 %v7291_v54, %v3586_v13 }
 0x336   : > { %v4208_v16 = vpop.f32.mrf.mxu1 }
 0x337   : > { %3845 = vst.msk [vmem:[%s7305_s21 + $0x10] sm:$0xff] %vm298_vm0, %v3813_v37  ;;  %v3750_v30 = vadd.f32 %v7296_v45, %v3711_v35 }
 0x338   : > { %v4209_v44 = vpop.f32.mrf.mxu1 }
 0x339   : > { %v3814_v49 = vadd.f32 %v3782_v38, %v3750_v30  ;;  %v4210_v20 = vadd.f32 %v4209_v44, %v4208_v16  ;;  %v4364_v44 = vpop.f32.mrf.mxu0 }
 0x33a   : > { %v4211_v36 = vpop.f32.mrf.mxu1 }
 0x33b   : > { %3846 = vst.msk [vmem:[%s7305_s21 + $0x18] sm:$0xff] %vm298_vm0, %v3814_v49  ;;  %v3591_v29 = vadd.f32 %v4210_v20, %v3590_v55  ;;  %v3789_v49 = vld [vmem:[%s5765_s15 + $0x50] sm:$0xff] }
 0x33c   : > { %v4212_v33 = vpop.f32.mrf.mxu1 }
 0x33d   : > { %v3712_v17 = vmul.f32 %v7291_v54, %v3591_v29  ;;  %v4213_v32 = vadd.f32 %v4212_v33, %v4211_v36  ;;  %v3622_v33 = vpop.f32.mrf.mxu0 }
 0x33f   : > { %v3751_v62 = vadd.f32 %v7296_v45, %v3712_v17  ;;  %v3594_v46 = vadd.f32 %v4213_v32, %v3593_v3  ;;  %v3790_v17 = vld [vmem:[%s5765_s15 + $0x58] sm:$0xff] }
 0x341   : > { %v3815_v51 = vadd.f32 %v3783_v12, %v3751_v62  ;;  %v3713_v1 = vmul.f32 %v7291_v54, %v3594_v46 }
 0x342   : > { %v4214_v59 = vpop.f32.mrf.mxu1 }
 0x343   : > { %3847 = vst.msk [vmem:[%s7305_s21 + $0x20] sm:$0xff] %vm298_vm0, %v3815_v51  ;;  %v3752_v28 = vadd.f32 %v7296_v45, %v3713_v1  ;;  %v4365_v51 = vpop.f32.mrf.mxu0 }
 0x344   : > { %v4215_v9 = vpop.f32.mrf.mxu1 }
 0x345   : > { %v3816_v2 = vadd.f32 %v3784_v7, %v3752_v28  ;;  %v4216_v57 = vadd.f32 %v4215_v9, %v4214_v59 }
 0x346   : > { %v4217_v60 = vpop.f32.mrf.mxu1 }
 0x347   : > { %3848 = vst.msk [vmem:[%s7305_s21 + $0x28] sm:$0xff] %vm298_vm0, %v3816_v2  ;;  %v3599_v4 = vadd.f32 %v4356_v26, %v4216_v57  ;;  %v3625_v2 = vpop.f32.mrf.mxu0  ;;  %v3791_v57 = vld [vmem:[%s5765_s15 + $0x60] sm:$0xff] }
 0x348   : > { %v4218_v53 = vpop.f32.mrf.mxu1 }
 0x349   : > { %v3714_v25 = vmul.f32 %v7291_v54, %v3599_v4  ;;  %v4219_v0 = vadd.f32 %v4218_v53, %v4217_v60 }
 0x34b   : > { %v3753_v42 = vadd.f32 %v7296_v45, %v3714_v25  ;;  %v3602_v41 = vadd.f32 %v4357_v31, %v4219_v0  ;;  %v3792_v0 = vld [vmem:[%s5765_s15 + $0x68] sm:$0xff] }
 0x34d   : > { %v3817_v24 = vadd.f32 %v3785_v47, %v3753_v42  ;;  %v3715_v19 = vmul.f32 %v7291_v54, %v3602_v41 }
 0x34e   : > { %v4220_v27 = vpop.f32.mrf.mxu1 }
 0x34f   : > { %3849 = vst.msk [vmem:[%s7305_s21 + $0x30] sm:$0xff] %vm298_vm0, %v3817_v24  ;;  %v3754_v34 = vadd.f32 %v7296_v45, %v3715_v19 }
 0x350   : > { %v4221_v6 = vpop.f32.mrf.mxu1 }
 0x351   : > { %v3818_v40 = vadd.f32 %v3786_v8, %v3754_v34  ;;  %v4222_v14 = vadd.f32 %v4221_v6, %v4220_v27  ;;  %v4368_v6 = vpop.f32.mrf.mxu0 }
 0x352   : > { %v4223_v63 = vpop.f32.mrf.mxu1 }
 0x353   : > { %3850 = vst.msk [vmem:[%s7305_s21 + $0x38] sm:$0xff] %vm298_vm0, %v3818_v40  ;;  %v3607_v58 = vadd.f32 %v4222_v14, %v3606_v50  ;;  %v3793_v40 = vld [vmem:[%s5765_s15 + $0x70] sm:$0xff] }
 0x354   : > { %v4224_v61 = vpop.f32.mrf.mxu1 }
 0x355   : > { %v3716_v15 = vmul.f32 %v7291_v54, %v3607_v58  ;;  %v4225_v5 = vadd.f32 %v4224_v61, %v4223_v63  ;;  %v3638_v61 = vpop.f32.mrf.mxu0 }
 0x357   : > { %v3755_v11 = vadd.f32 %v7296_v45, %v3716_v15  ;;  %v3610_v21 = vadd.f32 %v4225_v5, %v3609_v56  ;;  %v3794_v15 = vld [vmem:[%s5765_s15 + $0x78] sm:$0xff] }
 0x359   : > { %v3819_v39 = vadd.f32 %v3787_v10, %v3755_v11  ;;  %v3717_v18 = vmul.f32 %v7291_v54, %v3610_v21 }
 0x35a   : > { %v4226_v26 = vpop.f32.mrf.mxu1 }
 0x35b   : > { %3851 = vst.msk [vmem:[%s7305_s21 + $0x40] sm:$0xff] %vm298_vm0, %v3819_v39  ;;  %v3756_v23 = vadd.f32 %v7296_v45, %v3717_v18  ;;  %v4369_v39 = vpop.f32.mrf.mxu0 }
 0x35c   : > { %v4227_v43 = vpop.f32.mrf.mxu1 }
 0x35d   : > { %v3820_v13 = vadd.f32 %v3788_v22, %v3756_v23  ;;  %v4228_v37 = vadd.f32 %v4227_v43, %v4226_v26 }
 0x35e   : > { %v4229_v35 = vpop.f32.mrf.mxu1 }
 0x35f   : > { %3852 = vst.msk [vmem:[%s7305_s21 + $0x48] sm:$0xff] %vm298_vm0, %v3820_v13  ;;  %v3615_v55 = vadd.f32 %v4360_v48, %v4228_v37  ;;  %v3641_v13 = vpop.f32.mrf.mxu0  ;;  %v3795_v37 = vld [vmem:[%s5765_s15 + $0x80] sm:$0xff] }
 0x360   : > { %v4230_v38 = vpop.f32.mrf.mxu1 }
 0x361   : > { %v3718_v16 = vmul.f32 %v7291_v54, %v3615_v55  ;;  %v4231_v30 = vadd.f32 %v4230_v38, %v4229_v35 }
 0x363   : > { %v3757_v20 = vadd.f32 %v7296_v45, %v3718_v16  ;;  %v3618_v31 = vadd.f32 %v4361_v52, %v4231_v30  ;;  %v3796_v30 = vld [vmem:[%s5765_s15 + $0x88] sm:$0xff] }
 0x365   : > { %v3821_v36 = vadd.f32 %v3789_v49, %v3757_v20  ;;  %v3719_v29 = vmul.f32 %v7291_v54, %v3618_v31 }
 0x366   : > { %v4232_v32 = vpop.f32.mrf.mxu1 }
 0x367   : > { %3853 = vst.msk [vmem:[%s7305_s21 + $0x50] sm:$0xff] %vm298_vm0, %v3821_v36  ;;  %v3758_v3 = vadd.f32 %v7296_v45, %v3719_v29 }
 0x368   : > { %v4233_v12 = vpop.f32.mrf.mxu1 }
 0x369   : > { %v3822_v62 = vadd.f32 %v3790_v17, %v3758_v3  ;;  %v4234_v46 = vadd.f32 %v4233_v12, %v4232_v32  ;;  %v4372_v12 = vpop.f32.mrf.mxu0 }
 0x36a   : > { %v4235_v1 = vpop.f32.mrf.mxu1 }
 0x36b   : > { %3854 = vst.msk [vmem:[%s7305_s21 + $0x58] sm:$0xff] %vm298_vm0, %v3822_v62  ;;  %v3623_v7 = vadd.f32 %v4234_v46, %v3622_v33  ;;  %v3797_v62 = vld [vmem:[%s5765_s15 + $0x90] sm:$0xff] }
 0x36c   : > { %v4236_v59 = vpop.f32.mrf.mxu1 }
 0x36d   : > { %v3720_v28 = vmul.f32 %v7291_v54, %v3623_v7  ;;  %v4237_v9 = vadd.f32 %v4236_v59, %v4235_v1  ;;  %v3654_v59 = vpop.f32.mrf.mxu0 }
 0x36f   : > { %v3759_v60 = vadd.f32 %v7296_v45, %v3720_v28  ;;  %v3626_v4 = vadd.f32 %v4237_v9, %v3625_v2  ;;  %v3798_v28 = vld [vmem:[%s5765_s15 + $0x98] sm:$0xff] }
 0x371   : > { %v3823_v53 = vadd.f32 %v3791_v57, %v3759_v60  ;;  %v3721_v25 = vmul.f32 %v7291_v54, %v3626_v4 }
 0x372   : > { %v4238_v48 = vpop.f32.mrf.mxu1 }
 0x373   : > { %3855 = vst.msk [vmem:[%s7305_s21 + $0x60] sm:$0xff] %vm298_vm0, %v3823_v53  ;;  %v3760_v47 = vadd.f32 %v7296_v45, %v3721_v25  ;;  %v4373_v53 = vpop.f32.mrf.mxu0 }
 0x374   : > { %v4239_v42 = vpop.f32.mrf.mxu1 }
 0x375   : > { %v3824_v41 = vadd.f32 %v3792_v0, %v3760_v47  ;;  %v4240_v24 = vadd.f32 %v4239_v42, %v4238_v48 }
 0x376   : > { %v4241_v19 = vpop.f32.mrf.mxu1 }
 0x377   : > { %3856 = vst.msk [vmem:[%s7305_s21 + $0x68] sm:$0xff] %vm298_vm0, %v3824_v41  ;;  %v3631_v50 = vadd.f32 %v4364_v44, %v4240_v24  ;;  %v3657_v41 = vpop.f32.mrf.mxu0  ;;  %v3799_v24 = vld [vmem:[%s5765_s15 + $0xa0] sm:$0xff] }
 0x378   : > { %v4242_v8 = vpop.f32.mrf.mxu1 }
 0x379   : > { %v3722_v27 = vmul.f32 %v7291_v54, %v3631_v50  ;;  %v4243_v34 = vadd.f32 %v4242_v8, %v4241_v19 }
 0x37b   : > { %v3761_v14 = vadd.f32 %v7296_v45, %v3722_v27  ;;  %v3634_v52 = vadd.f32 %v4365_v51, %v4243_v34  ;;  %v3800_v34 = vld [vmem:[%s5765_s15 + $0xa8] sm:$0xff] }
 0x37d   : > { %v3825_v63 = vadd.f32 %v3793_v40, %v3761_v14  ;;  %v3723_v58 = vmul.f32 %v7291_v54, %v3634_v52 }
 0x37e   : > { %v4244_v5 = vpop.f32.mrf.mxu1 }
 0x37f   : > { %3857 = vst.msk [vmem:[%s7305_s21 + $0x70] sm:$0xff] %vm298_vm0, %v3825_v63  ;;  %v3762_v56 = vadd.f32 %v7296_v45, %v3723_v58 }
 0x380   : > { %v4245_v10 = vpop.f32.mrf.mxu1 }
 0x381   : > { %v3826_v11 = vadd.f32 %v3794_v15, %v3762_v56  ;;  %v4246_v21 = vadd.f32 %v4245_v10, %v4244_v5  ;;  %v4376_v10 = vpop.f32.mrf.mxu0 }
 0x382   : > { %v4247_v18 = vpop.f32.mrf.mxu1 }
 0x383   : > { %3858 = vst.msk [vmem:[%s7305_s21 + $0x78] sm:$0xff] %vm298_vm0, %v3826_v11  ;;  %v3639_v22 = vadd.f32 %v4246_v21, %v3638_v61  ;;  %v3801_v11 = vld [vmem:[%s5765_s15 + $0xb0] sm:$0xff] }
 0x384   : > { %v4248_v26 = vpop.f32.mrf.mxu1 }
 0x385   : > { %v3724_v23 = vmul.f32 %v7291_v54, %v3639_v22  ;;  %v4249_v43 = vadd.f32 %v4248_v26, %v4247_v18  ;;  %v3670_v26 = vpop.f32.mrf.mxu0 }
 0x387   : > { %v3763_v35 = vadd.f32 %v7296_v45, %v3724_v23  ;;  %v3642_v55 = vadd.f32 %v4249_v43, %v3641_v13  ;;  %v3802_v23 = vld [vmem:[%s5765_s15 + $0xb8] sm:$0xff] }
 0x389   : > { %v3827_v38 = vadd.f32 %v3795_v37, %v3763_v35  ;;  %v3725_v16 = vmul.f32 %v7291_v54, %v3642_v55 }
 0x38a   : > { %v4250_v44 = vpop.f32.mrf.mxu1 }
 0x38b   : > { %3859 = vst.msk [vmem:[%s7305_s21 + $0x80] sm:$0xff] %vm298_vm0, %v3827_v38  ;;  %v3764_v49 = vadd.f32 %v7296_v45, %v3725_v16  ;;  %v4377_v38 = vpop.f32.mrf.mxu0 }
 0x38c   : > { %v4251_v20 = vpop.f32.mrf.mxu1 }
 0x38d   : > { %v3828_v31 = vadd.f32 %v3796_v30, %v3764_v49  ;;  %v4252_v36 = vadd.f32 %v4251_v20, %v4250_v44 }
 0x38e   : > { %v4253_v29 = vpop.f32.mrf.mxu1 }
 0x38f   : > { %3860 = vst.msk [vmem:[%s7305_s21 + $0x88] sm:$0xff] %vm298_vm0, %v3828_v31  ;;  %v3647_v33 = vadd.f32 %v4368_v6, %v4252_v36  ;;  %v3673_v31 = vpop.f32.mrf.mxu0  ;;  %v3803_v36 = vld [vmem:[%s5765_s15 + $0xc0] sm:$0xff] }
 0x390   : > { %v4254_v17 = vpop.f32.mrf.mxu1 }
 0x391   : > { %v3726_v32 = vmul.f32 %v7291_v54, %v3647_v33  ;;  %v4255_v3 = vadd.f32 %v4254_v17, %v4253_v29 }
 0x393   : > { %v3765_v46 = vadd.f32 %v7296_v45, %v3726_v32  ;;  %v3650_v51 = vadd.f32 %v4369_v39, %v4255_v3  ;;  %v3804_v3 = vld [vmem:[%s5765_s15 + $0xc8] sm:$0xff] }
 0x395   : > { %v3829_v1 = vadd.f32 %v3797_v62, %v3765_v46  ;;  %v3727_v7 = vmul.f32 %v7291_v54, %v3650_v51 }
 0x396   : > { %v4256_v9 = vpop.f32.mrf.mxu1 }
 0x397   : > { %3861 = vst.msk [vmem:[%s7305_s21 + $0x90] sm:$0xff] %vm298_vm0, %v3829_v1  ;;  %v3766_v2 = vadd.f32 %v7296_v45, %v3727_v7 }
 0x398   : > { %v4257_v57 = vpop.f32.mrf.mxu1 }
 0x399   : > { %v3830_v60 = vadd.f32 %v3798_v28, %v3766_v2  ;;  %v4258_v4 = vadd.f32 %v4257_v57, %v4256_v9  ;;  %v3805_v57 = vld [vmem:[%s5765_s15 + $0xd0] sm:$0xff] }
 0x39a   : > { %v4259_v25 = vpop.f32.mrf.mxu1 }
 0x39b   : > { %3862 = vst.msk [vmem:[%s7305_s21 + $0x98] sm:$0xff] %vm298_vm0, %v3830_v60  ;;  %v3655_v0 = vadd.f32 %v4258_v4, %v3654_v59 }
 0x39c   : > { %v4260_v48 = vpop.f32.mrf.mxu1 }
 0x39d   : > { %v3728_v47 = vmul.f32 %v7291_v54, %v3655_v0  ;;  %v4261_v42 = vadd.f32 %v4260_v48, %v4259_v25  ;;  %v3806_v0 = vld [vmem:[%s5765_s15 + $0xd8] sm:$0xff] }
 0x39f   : > { %v3767_v19 = vadd.f32 %v7296_v45, %v3728_v47  ;;  %v3658_v50 = vadd.f32 %v4261_v42, %v3657_v41 }
 0x3a1   : > { %v3831_v8 = vadd.f32 %v3799_v24, %v3767_v19  ;;  %v3729_v27 = vmul.f32 %v7291_v54, %v3658_v50 }
 0x3a2   : > { %v4262_v6 = vpop.f32.mrf.mxu1 }
 0x3a3   : > { %3863 = vst.msk [vmem:[%s7305_s21 + $0xa0] sm:$0xff] %vm298_vm0, %v3831_v8  ;;  %v3768_v40 = vadd.f32 %v7296_v45, %v3729_v27 }
 0x3a4   : > { %v4263_v14 = vpop.f32.mrf.mxu1 }
 0x3a5   : > { %v3832_v52 = vadd.f32 %v3800_v34, %v3768_v40  ;;  %v4264_v63 = vadd.f32 %v4263_v14, %v4262_v6 }
 0x3a6   : > { %v4265_v58 = vpop.f32.mrf.mxu1 }
 0x3a7   : > { %3864 = vst.msk [vmem:[%s7305_s21 + $0xa8] sm:$0xff] %vm298_vm0, %v3832_v52  ;;  %v3663_v61 = vadd.f32 %v4372_v12, %v4264_v63 }
 0x3a8   : > { %v4266_v15 = vpop.f32.mrf.mxu1 }
 0x3a9   : > { %v3730_v5 = vmul.f32 %v7291_v54, %v3663_v61  ;;  %v4267_v56 = vadd.f32 %v4266_v15, %v4265_v58 }
 0x3ab   : > { %v3769_v21 = vadd.f32 %v7296_v45, %v3730_v5  ;;  %v3666_v39 = vadd.f32 %v4373_v53, %v4267_v56  ;;  %v3809_v5 = vld [vmem:[%s5765_s15 + $0xf0] sm:$0xff] }
 0x3ad   : > { %v3833_v18 = vadd.f32 %v3801_v11, %v3769_v21  ;;  %v3731_v22 = vmul.f32 %v7291_v54, %v3666_v39 }
 0x3ae   : > { %v4268_v43 = vpop.f32.mrf.mxu1 }
 0x3af   : > { %3865 = vst.msk [vmem:[%s7305_s21 + $0xb0] sm:$0xff] %vm298_vm0, %v3833_v18  ;;  %v3770_v13 = vadd.f32 %v7296_v45, %v3731_v22  ;;  %v3807_v18 = vld [vmem:[%s5765_s15 + $0xe0] sm:$0xff] }
 0x3b0   : > { %v4269_v37 = vpop.f32.mrf.mxu1 }
 0x3b1   : > { %v3834_v35 = vadd.f32 %v3802_v23, %v3770_v13  ;;  %v4270_v55 = vadd.f32 %v4269_v37, %v4268_v43  ;;  %v3810_v37 = vld [vmem:[%s5765_s15 + $0xf8] sm:$0xff] }
 0x3b2   : > { %v4271_v16 = vpop.f32.mrf.mxu1 }
 0x3b3   : > { %3866 = vst.msk [vmem:[%s7305_s21 + $0xb8] sm:$0xff] %vm298_vm0, %v3834_v35  ;;  %v3671_v30 = vadd.f32 %v4270_v55, %v3670_v26 }
 0x3b4   : > { %v4272_v44 = vpop.f32.mrf.mxu1 }
 0x3b5   : > { %v3732_v49 = vmul.f32 %v7291_v54, %v3671_v30  ;;  %v4273_v20 = vadd.f32 %v4272_v44, %v4271_v16  ;;  %v3808_v16 = vld [vmem:[%s5765_s15 + $0xe8] sm:$0xff]  ;;  %s5546_s15 = scalar_lea.vmem %s7465_s9, 4096 }
 0x3b6   : > { %p5547_p11 = scmp.ne.s32.totalorder %s7465_s9, %s5546_s15  ;;  %p5554_p7 = scmp.lt.s32.totalorder %s5552_s12, %s5546_s15 }
 0x3b7   : > { %v3771_v29 = vadd.f32 %v7296_v45, %v3732_v49  ;;  %v3674_v33 = vadd.f32 %v4273_v20, %v3673_v31 }
 0x3b8   : > { %p5548_p13 = pnand %p5547_p11, %p7555_p12  ;;  %p5555_p8 = por %p5554_p7, %p5553_p5 }
 0x3b9   : > { %v3835_v17 = vadd.f32 %v3803_v36, %v3771_v29  ;;  %v3733_v32 = vmul.f32 %v7291_v54, %v3674_v33 }
 0x3ba   : > { %v4274_v12 = vpop.f32.mrf.mxu1  ;;  %p5549_p4 = pneg %p5548_p13 }
 0x3bb   : > { %3867 = vst.msk [vmem:[%s7305_s21 + $0xc0] sm:$0xff] %vm298_vm0, %v3835_v17  ;;  %v3772_v62 = vadd.f32 %v7296_v45, %v3733_v32 }
 0x3bc   : > { %v4275_v46 = vpop.f32.mrf.mxu1  ;;  %p5556_p10 = pnand %p5555_p8, %p5549_p4 }
 0x3bd   : > { %v3836_v51 = vadd.f32 %v3804_v3, %v3772_v62  ;;  %v4276_v1 = vadd.f32 %v4275_v46, %v4274_v12 }
 0x3be   : > { %v4277_v7 = vpop.f32.mrf.mxu1 }
 0x3bf   : > { %3868 = vst.msk [vmem:[%s7305_s21 + $0xc8] sm:$0xff] %vm298_vm0, %v3836_v51  ;;  %v3679_v59 = vadd.f32 %v4376_v10, %v4276_v1 }
 0x3c0   : > { %v4278_v28 = vpop.f32.mrf.mxu1 }
 0x3c1   : > { %v3734_v9 = vmul.f32 %v7291_v54, %v3679_v59  ;;  %v4279_v2 = vadd.f32 %v4278_v28, %v4277_v7 }
 0x3c3   : > { %v3773_v60 = vadd.f32 %v7296_v45, %v3734_v9  ;;  %v3682_v4 = vadd.f32 %v4377_v38, %v4279_v2 }
 0x3c5   : > { %v3837_v53 = vadd.f32 %v3805_v57, %v3773_v60  ;;  %v3735_v25 = vmul.f32 %v7291_v54, %v3682_v4 }
 0x3c6   : > { %v4280_v48 = vpop.f32.mrf.mxu1 }
 0x3c7   : > { %3869 = vst.msk [vmem:[%s7305_s21 + $0xd0] sm:$0xff] %vm298_vm0, %v3837_v53  ;;  %v3774_v47 = vadd.f32 %v7296_v45, %v3735_v25 }
 0x3c8   : > { %v4281_v42 = vpop.f32.mrf.mxu1 }
 0x3c9   : > { %v3838_v41 = vadd.f32 %v3806_v0, %v3774_v47  ;;  %v4282_v14 = vadd.f32 %v4281_v42, %v4280_v48 }
 0x3ca   : > { %v4283_v24 = vpop.f32.mrf.mxu1 }
 0x3cb   : > { %3870 = vst.msk [vmem:[%s7305_s21 + $0xd8] sm:$0xff] %vm298_vm0, %v3838_v41 }
 0x3cc   : > { %v4284_v19 = vpop.f32.mrf.mxu1 }
 0x3cd   : > { %v4285_v10 = vadd.f32 %v4284_v19, %v4283_v24 }
 0x3ce   : > { %v4286_v50 = vpop.f32.mrf.mxu1 }
 0x3d0   : > { %v4287_v8 = vpop.f32.mrf.mxu1 }
 0x3d1   : > { %v4288_v6 = vadd.f32 %v4287_v8, %v4286_v50 }
 0x3d2   : > { %v4289_v27 = vpop.f32.mrf.mxu1 }
 0x3d4   : > { %v4290_v34 = vpop.f32.mrf.mxu1 }
 0x3d5   : > { %v4291_v58 = vadd.f32 %v4290_v34, %v4289_v27 }
 0x3d6   : > { %v4380_v40 = vpop.f32.mrf.mxu1 }
 0x3d7   : > { %v3695_v52 = vadd.f32 %v4380_v40, %v4288_v6 }
 0x3d8   : > { %v3686_v63 = vpop.f32.mrf.mxu1 }
 0x3d9   : > { %v3738_v61 = vmul.f32 %v7291_v54, %v3695_v52  ;;  %v3687_v15 = vadd.f32 %v4282_v14, %v3686_v63 }
 0x3da   : > { %v4381_v56 = vpop.f32.mrf.mxu1 }
 0x3db   : > { %v3777_v11 = vadd.f32 %v7296_v45, %v3738_v61  ;;  %v3736_v21 = vmul.f32 %v7291_v54, %v3687_v15  ;;  %v3698_v39 = vadd.f32 %v4381_v56, %v4291_v58 }
 0x3dc   : > { %v3689_v22 = vpop.f32.mrf.mxu1 }
 0x3dd   : > { %v3841_v26 = vadd.f32 %v3809_v5, %v3777_v11  ;;  %v3775_v23 = vadd.f32 %v7296_v45, %v3736_v21  ;;  %v3739_v43 = vmul.f32 %v7291_v54, %v3698_v39  ;;  %v3690_v13 = vadd.f32 %v4285_v10, %v3689_v22 }
 0x3df   : > { %3873 = vst.msk [vmem:[%s7305_s21 + $0xf0] sm:$0xff] %vm298_vm0, %v3841_v26  ;;  %v3839_v35 = vadd.f32 %v3807_v18, %v3775_v23  ;;  %v3778_v55 = vadd.f32 %v7296_v45, %v3739_v43  ;;  %v3737_v38 = vmul.f32 %v7291_v54, %v3690_v13 }
 0x3e1   : > { %3871 = vst.msk [vmem:[%s7305_s21 + $0xe0] sm:$0xff] %vm298_vm0, %v3839_v35  ;;  %v3842_v30 = vadd.f32 %v3810_v37, %v3778_v55  ;;  %v3776_v44 = vadd.f32 %v7296_v45, %v3737_v38 }
 0x3e3   : > { %3874 = vst.msk [vmem:[%s7305_s21 + $0xf8] sm:$0xff] %vm298_vm0, %v3842_v30  ;;  %v3840_v54 = vadd.f32 %v3808_v16, %v3776_v44 }
 0x3e5   : > { %3872 = vst.msk [vmem:[%s7305_s21 + $0xe8] sm:$0xff] %vm298_vm0, %v3840_v54 }
 0x3e6   : > { %5559 = shalt.err (!%p5556_p10)
}
 0x3e7   : > { %s5560_s19 = scalar_lea.hbm %s7463_s18, 4096  ;;  %s5564_s21 = scalar_lea.hbm %s7519_s7, 8192 }
 0x3e8   : > { %p5561_p0 = scmp.ne.s32.totalorder %s7463_s18, %s5560_s19  ;;  %p5565_p1 = scmp.lt.s32.totalorder %s7463_s18, %s7519_s7 }
 0x3e9   : > { %p5566_p3 = scmp.lt.s32.totalorder %s5564_s21, %s5560_s19 }
 0x3ea   : > { %p5562_p2 = pnand %p5561_p0, %p7555_p12 }
 0x3eb   : > { %p5567_p6 = por %p5566_p3, %p5565_p1 }
 0x3ec   : > { %p5563_p9 = pneg %p5562_p2 }
 0x3ee   : > { %p5568_p11 = pnand %p5567_p6, %p5563_p9 }
 0x3f0   : > { %5571 = shalt.err (!%p5568_p11)
}
 0x3f1   : > { %s5620_s16 = smov 128   ;;  %s5621_s15 = smov 8  }
 0x3f2   : > { %4388 = dma.vmem_to_hbm [thread:$0]  (%p7555_p12), %s7465_s9, 4096, %s7463_s18, %s3876_s28, %s5620_s16, %s5620_s16, %s5621_s15  }
 0x3f3 PF: > { %s3904_s22 = sand.u32 1, %s5598_s24   ;;  %p7556_p13 = scmp.ne.s32.totalorder %s7534_s14, 0 }
 0x3f4   : > { %p7557_p4 = scmp.ge.s32.totalorder %s5610_s27, 2  ;;  %s3905_s23 = scalar_lea.sflag [#allocation5], %s3904_s22 }
 0x3f6   : > { %p4395_p5 = pnand %p7557_p4, %p7556_p13 }
 0x3f8   : > { %p4396_p7 = pneg %p4395_p5 }
 0x3fa   : > { %5593 = dma.done.wait (%p4396_p7), %s3905_s23, 4096  }
 0x3fb   : > { %5595 = vsyncadd (%p4396_p7), %s3905_s23, 4294963200  ;;  %p20_p8 = scmp.ge.s32.totalorder %s5687_s30, 4   ;;  %s7558_s24 = smov %s5602_s25 }
 0x3fc   : > { %s7559_s25 = smov %s5606_s26  ;;  %s7560_s26 = smov %s5699_s10 }
 0x3fd   : > { %s7561_s27 = smov %s5687_s30  ;;  %22 = sbr.rel (!%p20_p8) target bundleno = 5 (0x5), region = 95 }
 0x402   :  { %3910 = vsyncpa [#allocation4], 1 }
 0x403   :  { %3912 = vsyncpa [#allocation4 + $0x1], 1 }
 0x404   :  { %3913 = vsyncpa [#allocation5], 1 }
 0x405   :  { %3915 = vsyncpa [#allocation5 + $0x1], 1 }

</bundles_post_ra>
